<compile_context>
chip_gen: v5e
topology: v5e:2x2
jax: 0.10.0
libtpu: 0.0.40
codegen_flags: <defaults>
</compile_context>

<pallas_src>
import functools

import jax
import jax.numpy as jnp
from jax.experimental import pallas as pl
from jax.experimental.pallas import tpu as pltpu


def _round_up(x, m):
    return ((x + m - 1) // m) * m


def _lstm_attn_kernel(x_ref, wih_ref, whh_ref, bg_ref,
                      watt_ref, batt_ref, wcls_ref, bcls_ref,
                      out_ref, *, seq_len, block_b, hidden_pad):
    """One grid step handles a block of BB batch elements.

    x_ref:    (1, T*BB, F)   time-major rows: row t*BB + b is timestep t of batch b
    wih_ref:  (F, 4*HP)      LSTM input weights, gate order (i,f,o,g), each gate lane-padded to HP
    whh_ref:  (HP, 4*HP)     LSTM recurrent weights, same layout, rows zero-padded to HP
    bg_ref:   (1, 4*HP)      b_ih + b_hh, same layout
    watt_ref: (1, HP)        attention Linear(H, 1) weight (zero-padded row)
    batt_ref: (1, 1)         attention bias
    wcls_ref: (1, HP)        classifier Linear(H, 1) weight (zero-padded row)
    bcls_ref: (1, 1)         classifier bias
    out_ref:  (1, 1, BB)     output probabilities for this batch block (lane-dense)
    """
    T, BB, HP = seq_len, block_b, hidden_pad

    wih = wih_ref[...]                  # (F, 4HP)
    whh = whh_ref[...]                  # (HP, 4HP)
    bg = bg_ref[...]                    # (1, 4HP)
    watt = watt_ref[...]                # (1, HP)
    batt = batt_ref[...]                # (1, 1)

    # Hoisted input projection: all timesteps & batch rows in one MXU matmul.
    x_all = x_ref[0]                                                         # (T*BB, F)
    gates_x = jnp.dot(x_all, wih, preferred_element_type=jnp.float32) + bg   # (T*BB, 4HP)

    h = jnp.zeros((BB, HP), jnp.float32)
    c = jnp.zeros((BB, HP), jnp.float32)
    # Online-softmax accumulators over the time axis.
    m = jnp.full((BB, 1), -jnp.inf, jnp.float32)
    l = jnp.zeros((BB, 1), jnp.float32)
    acc = jnp.zeros((BB, HP), jnp.float32)   # unnormalized attention context

    # T is small and static at trace time -> full unroll so the LLO scheduler can
    # overlap the recurrent matmul, EUP sigmoid/tanh and VPU gate math.
    for t in range(T):
        g = gates_x[t * BB:(t + 1) * BB, :] + jnp.dot(
            h, whh, preferred_element_type=jnp.float32)                      # (BB, 4HP)
        # gate order (i, f, o, g): one sigmoid over the contiguous first 3 slots,
        # one tanh over the last slot; every slice is 128-lane aligned.
        ifo = jax.nn.sigmoid(g[:, :3 * HP])
        g_g = jnp.tanh(g[:, 3 * HP:])
        i_g = ifo[:, :HP]
        f_g = ifo[:, HP:2 * HP]
        o_g = ifo[:, 2 * HP:]
        c = f_g * c + i_g * g_g
        h = o_g * jnp.tanh(c)

        # attention score for this timestep: Linear(H, 1) -> lane reduce over HP
        s = jnp.sum(h * watt, axis=-1, keepdims=True) + batt                 # (BB, 1)
        # online softmax update (identical math to post-hoc softmax)
        m_new = jnp.maximum(m, s)
        alpha = jnp.exp(m - m_new)
        p = jnp.exp(s - m_new)
        l = alpha * l + p
        acc = alpha * acc + p * h
        m = m_new

    # Normalize the attention context (exact division; off the hot recurrence path).
    context = acc * (1.0 / l)                                                # (BB, HP)

    # Classifier Linear(H, 1) + sigmoid, computed lane-dense:
    # (1, HP) contracted with (BB, HP) over HP -> (1, BB)  (wcls @ context^T on the MXU)
    logit = jax.lax.dot_general(
        wcls_ref[...], context, (((1,), (1,)), ((), ())),
        preferred_element_type=jnp.float32) + bcls_ref[...]                  # (1, BB)
    out_ref[...] = jax.nn.sigmoid(logit).reshape(1, 1, BB)


def _pack_params(params):
    """Reorder gates (i,f,g,o)->(i,f,o,g) and lane-pad each gate slot to HP=round_up(H,128)."""
    H = params["whh_t"].shape[0]
    HP = _round_up(H, 128)

    def split_reorder(w):
        i, f, g, o = jnp.split(w, 4, axis=1)
        return [i, f, o, g]

    def pad_cols(w):
        return jnp.pad(w, ((0, 0), (0, HP - H))) if HP != H else w

    wih = jnp.concatenate([pad_cols(w) for w in split_reorder(params["wih_t"])], axis=1)   # (F, 4HP)
    whh = jnp.concatenate([pad_cols(w) for w in split_reorder(params["whh_t"])], axis=1)   # (H, 4HP)
    whh = jnp.pad(whh, ((0, HP - H), (0, 0))) if HP != H else whh                          # (HP, 4HP)
    bg = jnp.concatenate([pad_cols(b) for b in split_reorder(params["b_gates"])], axis=1)  # (1, 4HP)
    watt = pad_cols(params["w_att"])                                                       # (1, HP)
    wcls = pad_cols(params["w_cls"])                                                       # (1, HP)
    return wih, whh, bg, watt, wcls, HP


def lstm_anomaly_forward(x, params, block_b=128):
    """x: (B, T, F) float32. params: dict of weights. Returns (B, 1) float32."""
    B, T, F = x.shape

    # Batch block: as large as reasonable (MXU rows / grid-step amortization), but not
    # larger than the (8-padded) batch; always a multiple of 8 so T*BB keeps sublane alignment.
    BB = max(8, min(_round_up(block_b, 8), _round_up(B, 8)))
    n_blocks = pl.cdiv(B, BB)
    B_pad = n_blocks * BB
    x_p = jnp.pad(x, ((0, B_pad - B), (0, 0), (0, 0))) if B_pad != B else x

    # Layout plumbing (wrapper-side, tiny): present each batch block as time-major
    # rows so the kernel's per-timestep slice is a contiguous sublane slice.
    # (B_pad, T, F) -> (n_blocks, BB, T, F) -> (n_blocks, T, BB, F) -> (n_blocks, T*BB, F)
    x_blk = (x_p.reshape(n_blocks, BB, T, F)
                 .transpose(0, 2, 1, 3)
                 .reshape(n_blocks, T * BB, F))

    wih, whh, bg, watt, wcls, HP = _pack_params(params)
    G = 4 * HP

    kernel = functools.partial(_lstm_attn_kernel, seq_len=T, block_b=BB, hidden_pad=HP)

    grid_spec = pltpu.PrefetchScalarGridSpec(
        num_scalar_prefetch=0,
        grid=(n_blocks,),
        in_specs=[
            pl.BlockSpec((1, T * BB, F), lambda b: (b, 0, 0)),  # x (per-block slab)
            pl.BlockSpec((F, G), lambda b: (0, 0)),             # W_ih^T (padded, reordered)
            pl.BlockSpec((HP, G), lambda b: (0, 0)),            # W_hh^T (padded, reordered)
            pl.BlockSpec((1, G), lambda b: (0, 0)),             # b_ih + b_hh
            pl.BlockSpec((1, HP), lambda b: (0, 0)),            # attention weight row
            pl.BlockSpec((1, 1), lambda b: (0, 0)),             # attention bias
            pl.BlockSpec((1, HP), lambda b: (0, 0)),            # classifier weight row
            pl.BlockSpec((1, 1), lambda b: (0, 0)),             # classifier bias
        ],
        out_specs=pl.BlockSpec((1, 1, BB), lambda b: (b, 0, 0)),  # lane-dense output row
    )

    out = pl.pallas_call(
        kernel,
        out_shape=jax.ShapeDtypeStruct((n_blocks, 1, BB), jnp.float32),
        grid_spec=grid_spec,
        compiler_params=pltpu.CompilerParams(dimension_semantics=("parallel",)),
    )(x_blk, wih, whh, bg, watt, params["b_att"], wcls, params["b_cls"])

    return out.reshape(B_pad, 1)[:B]


def reference_forward(x, params):
    """Pure-JAX reference of the same forward pass (for a sanity check)."""
    B, T, F = x.shape
    H = params["whh_t"].shape[0]

    def one_batch(xb):  # xb: (T, F)
        def step(carry, x_t):
            h, c = carry
            gates = x_t @ params["wih_t"] + h @ params["whh_t"] + params["b_gates"][0]
            i_g = jax.nn.sigmoid(gates[0 * H:1 * H])
            f_g = jax.nn.sigmoid(gates[1 * H:2 * H])
            g_g = jnp.tanh(gates[2 * H:3 * H])
            o_g = jax.nn.sigmoid(gates[3 * H:4 * H])
            c_new = f_g * c + i_g * g_g
            h_new = o_g * jnp.tanh(c_new)
            return (h_new, c_new), h_new

        init = (jnp.zeros((H,), jnp.float32), jnp.zeros((H,), jnp.float32))
        _, lstm_out = jax.lax.scan(step, init, xb)                       # (T, H)
        scores = lstm_out @ params["w_att"][0] + params["b_att"][0, 0]   # (T,)
        attn = jax.nn.softmax(scores)
        context = attn @ lstm_out                                        # (H,)
        logit = context @ params["w_cls"][0] + params["b_cls"][0, 0]
        return jax.nn.sigmoid(logit)[None]                               # (1,)

    return jax.vmap(one_batch)(x)                                        # (B, 1)


def init_params(key, input_size, hidden_size):
    G = 4 * hidden_size
    ks = jax.random.split(key, 8)
    s = 0.1
    return {
        "wih_t": s * jax.random.normal(ks[0], (input_size, G), jnp.float32),
        "whh_t": s * jax.random.normal(ks[1], (hidden_size, G), jnp.float32),
        "b_gates": s * jax.random.normal(ks[2], (1, G), jnp.float32),
        "w_att": s * jax.random.normal(ks[3], (1, hidden_size), jnp.float32),
        "b_att": s * jax.random.normal(ks[4], (1, 1), jnp.float32),
        "w_cls": s * jax.random.normal(ks[5], (1, hidden_size), jnp.float32),
        "b_cls": s * jax.random.normal(ks[6], (1, 1), jnp.float32),
    }


if __name__ == "__main__":
    # Small shapes consistent with the module: batch=2, seq=8 (station features),
    # input_size=8 (window length), hidden=32.
    B, T, F, H = 2, 8, 8, 32
    key = jax.random.PRNGKey(0)
    k_x, k_p = jax.random.split(key)
    x = jax.random.normal(k_x, (B, T, F), jnp.float32)
    params = init_params(k_p, F, H)

    out = jax.block_until_ready(lstm_anomaly_forward(x, params))
    ref = jax.block_until_ready(reference_forward(x, params))
    assert out.shape == (B, 1)
    assert jnp.allclose(out, ref, atol=1e-3, rtol=1e-3), (out, ref)

    # Exercise the padded-batch path (12 stations as in the module).
    B2 = 12
    x2 = jax.random.normal(jax.random.PRNGKey(1), (B2, T, F), jnp.float32)
    out2 = jax.block_until_ready(lstm_anomaly_forward(x2, params))
    ref2 = jax.block_until_ready(reference_forward(x2, params))
    assert out2.shape == (B2, 1)
    assert jnp.allclose(out2, ref2, atol=1e-3, rtol=1e-3), (out2, ref2)

    # Exercise the full-size batch block (BB=128) and the multi-block grid path.
    B3 = 300
    x3 = jax.random.normal(jax.random.PRNGKey(2), (B3, T, F), jnp.float32)
    out3 = jax.block_until_ready(lstm_anomaly_forward(x3, params))
    ref3 = jax.block_until_ready(reference_forward(x3, params))
    assert out3.shape == (B3, 1)
    assert jnp.allclose(out3, ref3, atol=1e-3, rtol=1e-3), (out3, ref3)

    print("KERNEL_OK")
</pallas_src>

<mosaic_0001>
module attributes {stable_mosaic.version = 11 : i64} {
  func.func @_lstm_attn_kernel(%arg0: i32, %arg1: memref<1x64x8xf32, #tpu.memory_space<vmem>>, %arg2: memref<8x512xf32, #tpu.memory_space<vmem>>, %arg3: memref<128x512xf32, #tpu.memory_space<vmem>>, %arg4: memref<1x512xf32, #tpu.memory_space<vmem>>, %arg5: memref<1x128xf32, #tpu.memory_space<vmem>>, %arg6: memref<1x1xf32, #tpu.memory_space<vmem>>, %arg7: memref<1x128xf32, #tpu.memory_space<vmem>>, %arg8: memref<1x1xf32, #tpu.memory_space<vmem>>, %arg9: memref<1x1x8xf32, #tpu.memory_space<vmem>>) attributes {dimension_semantics = [#tpu.dimension_semantics<parallel>], iteration_bounds = array<i64: 1>, scalar_prefetch = 0 : i64, scratch_operands = 0 : i64, tpu.core_type = #tpu.core_type<tc>, window_params = [{transform_indices = @transform_0, window_bounds = array<i64: 1, 64, 8>}, {pipeline_mode = #tpu.pipeline_mode<synchronous>, transform_indices = @transform_1, window_bounds = array<i64: 8, 512>}, {pipeline_mode = #tpu.pipeline_mode<synchronous>, transform_indices = @transform_2, window_bounds = array<i64: 128, 512>}, {pipeline_mode = #tpu.pipeline_mode<synchronous>, transform_indices = @transform_3, window_bounds = array<i64: 1, 512>}, {pipeline_mode = #tpu.pipeline_mode<synchronous>, transform_indices = @transform_4, window_bounds = array<i64: 1, 128>}, {pipeline_mode = #tpu.pipeline_mode<synchronous>, transform_indices = @transform_5, window_bounds = array<i64: 1, 1>}, {pipeline_mode = #tpu.pipeline_mode<synchronous>, transform_indices = @transform_6, window_bounds = array<i64: 1, 128>}, {pipeline_mode = #tpu.pipeline_mode<synchronous>, transform_indices = @transform_7, window_bounds = array<i64: 1, 1>}, {transform_indices = @transform_8, window_bounds = array<i64: 1, 1, 8>}]} {
    %c0 = arith.constant 0 : index
    %c0_0 = arith.constant 0 : index
    %0 = vector.load %arg2[%c0, %c0_0] : memref<8x512xf32, #tpu.memory_space<vmem>>, vector<8x512xf32>
    %c0_1 = arith.constant 0 : index
    %c0_2 = arith.constant 0 : index
    %1 = vector.load %arg3[%c0_1, %c0_2] : memref<128x512xf32, #tpu.memory_space<vmem>>, vector<128x512xf32>
    %c0_3 = arith.constant 0 : index
    %c0_4 = arith.constant 0 : index
    %2 = vector.load %arg4[%c0_3, %c0_4] : memref<1x512xf32, #tpu.memory_space<vmem>>, vector<1x512xf32>
    %c0_5 = arith.constant 0 : index
    %c0_6 = arith.constant 0 : index
    %3 = vector.load %arg5[%c0_5, %c0_6] : memref<1x128xf32, #tpu.memory_space<vmem>>, vector<1x128xf32>
    %c0_7 = arith.constant 0 : index
    %c0_8 = arith.constant 0 : index
    %4 = vector.load %arg6[%c0_7, %c0_8] : memref<1x1xf32, #tpu.memory_space<vmem>>, vector<1x1xf32>
    %c0_9 = arith.constant 0 : index
    %c0_10 = arith.constant 0 : index
    %c0_11 = arith.constant 0 : index
    %5 = vector.load %arg1[%c0_9, %c0_10, %c0_11] : memref<1x64x8xf32, #tpu.memory_space<vmem>>, vector<1x64x8xf32>
    %6 = vector.shape_cast %5 : vector<1x64x8xf32> to vector<64x8xf32>
    %cst = arith.constant dense<0.000000e+00> : vector<64x512xf32>
    %7 = tpu.matmul %6, %0, %cst {dimension_numbers = #tpu.dot_dimension_numbers<[1], [0], [0], [1], [0, 0, 1, 1], [], []>} : vector<64x8xf32>, vector<8x512xf32>, vector<64x512xf32> -> vector<64x512xf32>
    %8 = vector.broadcast %2 : vector<1x512xf32> to vector<64x512xf32>
    %9 = arith.addf %7, %8 : vector<64x512xf32>
    %cst_12 = arith.constant 0.000000e+00 : f32
    %10 = vector.broadcast %cst_12 : f32 to vector<8x128xf32>
    %cst_13 = arith.constant 0.000000e+00 : f32
    %11 = vector.broadcast %cst_13 : f32 to vector<8x128xf32>
    %cst_14 = arith.constant 0xFF800000 : f32
    %12 = vector.broadcast %cst_14 : f32 to vector<8x1xf32>
    %cst_15 = arith.constant 0.000000e+00 : f32
    %13 = vector.broadcast %cst_15 : f32 to vector<8x1xf32>
    %cst_16 = arith.constant 0.000000e+00 : f32
    %14 = vector.broadcast %cst_16 : f32 to vector<8x128xf32>
    %15 = vector.extract_strided_slice %9 {offsets = [0, 0], sizes = [8, 512], strides = [1, 1]} : vector<64x512xf32> to vector<8x512xf32>
    %cst_17 = arith.constant dense<0.000000e+00> : vector<8x512xf32>
    %16 = tpu.matmul %10, %1, %cst_17 {dimension_numbers = #tpu.dot_dimension_numbers<[1], [0], [0], [1], [0, 0, 1, 1], [], []>} : vector<8x128xf32>, vector<128x512xf32>, vector<8x512xf32> -> vector<8x512xf32>
    %17 = arith.addf %15, %16 : vector<8x512xf32>
    %18 = vector.extract_strided_slice %17 {offsets = [0, 0], sizes = [8, 384], strides = [1, 1]} : vector<8x512xf32> to vector<8x384xf32>
    %19 = arith.negf %18 : vector<8x384xf32>
    %20 = math.exp %19 : vector<8x384xf32>
    %cst_18 = arith.constant 1.000000e+00 : f32
    %21 = vector.broadcast %cst_18 : f32 to vector<8x384xf32>
    %22 = arith.addf %21, %20 : vector<8x384xf32>
    %23 = arith.divf %21, %22 : vector<8x384xf32>
    %24 = vector.extract_strided_slice %17 {offsets = [0, 384], sizes = [8, 128], strides = [1, 1]} : vector<8x512xf32> to vector<8x128xf32>
    %25 = math.tanh %24 : vector<8x128xf32>
    %26 = vector.extract_strided_slice %23 {offsets = [0, 0], sizes = [8, 128], strides = [1, 1]} : vector<8x384xf32> to vector<8x128xf32>
    %27 = vector.extract_strided_slice %23 {offsets = [0, 128], sizes = [8, 128], strides = [1, 1]} : vector<8x384xf32> to vector<8x128xf32>
    %28 = vector.extract_strided_slice %23 {offsets = [0, 256], sizes = [8, 128], strides = [1, 1]} : vector<8x384xf32> to vector<8x128xf32>
    %29 = arith.mulf %27, %11 : vector<8x128xf32>
    %30 = arith.mulf %26, %25 : vector<8x128xf32>
    %31 = arith.addf %29, %30 : vector<8x128xf32>
    %32 = math.tanh %31 : vector<8x128xf32>
    %33 = arith.mulf %28, %32 : vector<8x128xf32>
    %34 = vector.broadcast %3 : vector<1x128xf32> to vector<8x128xf32>
    %35 = arith.mulf %33, %34 : vector<8x128xf32>
    %cst_19 = arith.constant dense<0.000000e+00> : vector<8xf32>
    %36 = vector.multi_reduction <add>, %35, %cst_19 [1] : vector<8x128xf32> to vector<8xf32>
    %37 = vector.shape_cast %36 : vector<8xf32> to vector<8x1xf32>
    %38 = vector.broadcast %4 : vector<1x1xf32> to vector<8x1xf32>
    %39 = arith.addf %37, %38 : vector<8x1xf32>
    %40 = arith.maximumf %12, %39 : vector<8x1xf32>
    %41 = arith.subf %12, %40 : vector<8x1xf32>
    %42 = math.exp %41 : vector<8x1xf32>
    %43 = arith.subf %39, %40 : vector<8x1xf32>
    %44 = math.exp %43 : vector<8x1xf32>
    %45 = arith.mulf %42, %13 : vector<8x1xf32>
    %46 = arith.addf %45, %44 : vector<8x1xf32>
    %47 = vector.broadcast %42 : vector<8x1xf32> to vector<8x128xf32>
    %48 = arith.mulf %47, %14 : vector<8x128xf32>
    %49 = vector.broadcast %44 : vector<8x1xf32> to vector<8x128xf32>
    %50 = arith.mulf %49, %33 : vector<8x128xf32>
    %51 = arith.addf %48, %50 : vector<8x128xf32>
    %52 = vector.extract_strided_slice %9 {offsets = [8, 0], sizes = [8, 512], strides = [1, 1]} : vector<64x512xf32> to vector<8x512xf32>
    %cst_20 = arith.constant dense<0.000000e+00> : vector<8x512xf32>
    %53 = tpu.matmul %33, %1, %cst_20 {dimension_numbers = #tpu.dot_dimension_numbers<[1], [0], [0], [1], [0, 0, 1, 1], [], []>} : vector<8x128xf32>, vector<128x512xf32>, vector<8x512xf32> -> vector<8x512xf32>
    %54 = arith.addf %52, %53 : vector<8x512xf32>
    %55 = vector.extract_strided_slice %54 {offsets = [0, 0], sizes = [8, 384], strides = [1, 1]} : vector<8x512xf32> to vector<8x384xf32>
    %56 = arith.negf %55 : vector<8x384xf32>
    %57 = math.exp %56 : vector<8x384xf32>
    %cst_21 = arith.constant 1.000000e+00 : f32
    %58 = vector.broadcast %cst_21 : f32 to vector<8x384xf32>
    %59 = arith.addf %58, %57 : vector<8x384xf32>
    %60 = arith.divf %58, %59 : vector<8x384xf32>
    %61 = vector.extract_strided_slice %54 {offsets = [0, 384], sizes = [8, 128], strides = [1, 1]} : vector<8x512xf32> to vector<8x128xf32>
    %62 = math.tanh %61 : vector<8x128xf32>
    %63 = vector.extract_strided_slice %60 {offsets = [0, 0], sizes = [8, 128], strides = [1, 1]} : vector<8x384xf32> to vector<8x128xf32>
    %64 = vector.extract_strided_slice %60 {offsets = [0, 128], sizes = [8, 128], strides = [1, 1]} : vector<8x384xf32> to vector<8x128xf32>
    %65 = vector.extract_strided_slice %60 {offsets = [0, 256], sizes = [8, 128], strides = [1, 1]} : vector<8x384xf32> to vector<8x128xf32>
    %66 = arith.mulf %64, %31 : vector<8x128xf32>
    %67 = arith.mulf %63, %62 : vector<8x128xf32>
    %68 = arith.addf %66, %67 : vector<8x128xf32>
    %69 = math.tanh %68 : vector<8x128xf32>
    %70 = arith.mulf %65, %69 : vector<8x128xf32>
    %71 = vector.broadcast %3 : vector<1x128xf32> to vector<8x128xf32>
    %72 = arith.mulf %70, %71 : vector<8x128xf32>
    %cst_22 = arith.constant dense<0.000000e+00> : vector<8xf32>
    %73 = vector.multi_reduction <add>, %72, %cst_22 [1] : vector<8x128xf32> to vector<8xf32>
    %74 = vector.shape_cast %73 : vector<8xf32> to vector<8x1xf32>
    %75 = vector.broadcast %4 : vector<1x1xf32> to vector<8x1xf32>
    %76 = arith.addf %74, %75 : vector<8x1xf32>
    %77 = arith.maximumf %40, %76 : vector<8x1xf32>
    %78 = arith.subf %40, %77 : vector<8x1xf32>
    %79 = math.exp %78 : vector<8x1xf32>
    %80 = arith.subf %76, %77 : vector<8x1xf32>
    %81 = math.exp %80 : vector<8x1xf32>
    %82 = arith.mulf %79, %46 : vector<8x1xf32>
    %83 = arith.addf %82, %81 : vector<8x1xf32>
    %84 = vector.broadcast %79 : vector<8x1xf32> to vector<8x128xf32>
    %85 = arith.mulf %84, %51 : vector<8x128xf32>
    %86 = vector.broadcast %81 : vector<8x1xf32> to vector<8x128xf32>
    %87 = arith.mulf %86, %70 : vector<8x128xf32>
    %88 = arith.addf %85, %87 : vector<8x128xf32>
    %89 = vector.extract_strided_slice %9 {offsets = [16, 0], sizes = [8, 512], strides = [1, 1]} : vector<64x512xf32> to vector<8x512xf32>
    %cst_23 = arith.constant dense<0.000000e+00> : vector<8x512xf32>
    %90 = tpu.matmul %70, %1, %cst_23 {dimension_numbers = #tpu.dot_dimension_numbers<[1], [0], [0], [1], [0, 0, 1, 1], [], []>} : vector<8x128xf32>, vector<128x512xf32>, vector<8x512xf32> -> vector<8x512xf32>
    %91 = arith.addf %89, %90 : vector<8x512xf32>
    %92 = vector.extract_strided_slice %91 {offsets = [0, 0], sizes = [8, 384], strides = [1, 1]} : vector<8x512xf32> to vector<8x384xf32>
    %93 = arith.negf %92 : vector<8x384xf32>
    %94 = math.exp %93 : vector<8x384xf32>
    %cst_24 = arith.constant 1.000000e+00 : f32
    %95 = vector.broadcast %cst_24 : f32 to vector<8x384xf32>
    %96 = arith.addf %95, %94 : vector<8x384xf32>
    %97 = arith.divf %95, %96 : vector<8x384xf32>
    %98 = vector.extract_strided_slice %91 {offsets = [0, 384], sizes = [8, 128], strides = [1, 1]} : vector<8x512xf32> to vector<8x128xf32>
    %99 = math.tanh %98 : vector<8x128xf32>
    %100 = vector.extract_strided_slice %97 {offsets = [0, 0], sizes = [8, 128], strides = [1, 1]} : vector<8x384xf32> to vector<8x128xf32>
    %101 = vector.extract_strided_slice %97 {offsets = [0, 128], sizes = [8, 128], strides = [1, 1]} : vector<8x384xf32> to vector<8x128xf32>
    %102 = vector.extract_strided_slice %97 {offsets = [0, 256], sizes = [8, 128], strides = [1, 1]} : vector<8x384xf32> to vector<8x128xf32>
    %103 = arith.mulf %101, %68 : vector<8x128xf32>
    %104 = arith.mulf %100, %99 : vector<8x128xf32>
    %105 = arith.addf %103, %104 : vector<8x128xf32>
    %106 = math.tanh %105 : vector<8x128xf32>
    %107 = arith.mulf %102, %106 : vector<8x128xf32>
    %108 = vector.broadcast %3 : vector<1x128xf32> to vector<8x128xf32>
    %109 = arith.mulf %107, %108 : vector<8x128xf32>
    %cst_25 = arith.constant dense<0.000000e+00> : vector<8xf32>
    %110 = vector.multi_reduction <add>, %109, %cst_25 [1] : vector<8x128xf32> to vector<8xf32>
    %111 = vector.shape_cast %110 : vector<8xf32> to vector<8x1xf32>
    %112 = vector.broadcast %4 : vector<1x1xf32> to vector<8x1xf32>
    %113 = arith.addf %111, %112 : vector<8x1xf32>
    %114 = arith.maximumf %77, %113 : vector<8x1xf32>
    %115 = arith.subf %77, %114 : vector<8x1xf32>
    %116 = math.exp %115 : vector<8x1xf32>
    %117 = arith.subf %113, %114 : vector<8x1xf32>
    %118 = math.exp %117 : vector<8x1xf32>
    %119 = arith.mulf %116, %83 : vector<8x1xf32>
    %120 = arith.addf %119, %118 : vector<8x1xf32>
    %121 = vector.broadcast %116 : vector<8x1xf32> to vector<8x128xf32>
    %122 = arith.mulf %121, %88 : vector<8x128xf32>
    %123 = vector.broadcast %118 : vector<8x1xf32> to vector<8x128xf32>
    %124 = arith.mulf %123, %107 : vector<8x128xf32>
    %125 = arith.addf %122, %124 : vector<8x128xf32>
    %126 = vector.extract_strided_slice %9 {offsets = [24, 0], sizes = [8, 512], strides = [1, 1]} : vector<64x512xf32> to vector<8x512xf32>
    %cst_26 = arith.constant dense<0.000000e+00> : vector<8x512xf32>
    %127 = tpu.matmul %107, %1, %cst_26 {dimension_numbers = #tpu.dot_dimension_numbers<[1], [0], [0], [1], [0, 0, 1, 1], [], []>} : vector<8x128xf32>, vector<128x512xf32>, vector<8x512xf32> -> vector<8x512xf32>
    %128 = arith.addf %126, %127 : vector<8x512xf32>
    %129 = vector.extract_strided_slice %128 {offsets = [0, 0], sizes = [8, 384], strides = [1, 1]} : vector<8x512xf32> to vector<8x384xf32>
    %130 = arith.negf %129 : vector<8x384xf32>
    %131 = math.exp %130 : vector<8x384xf32>
    %cst_27 = arith.constant 1.000000e+00 : f32
    %132 = vector.broadcast %cst_27 : f32 to vector<8x384xf32>
    %133 = arith.addf %132, %131 : vector<8x384xf32>
    %134 = arith.divf %132, %133 : vector<8x384xf32>
    %135 = vector.extract_strided_slice %128 {offsets = [0, 384], sizes = [8, 128], strides = [1, 1]} : vector<8x512xf32> to vector<8x128xf32>
    %136 = math.tanh %135 : vector<8x128xf32>
    %137 = vector.extract_strided_slice %134 {offsets = [0, 0], sizes = [8, 128], strides = [1, 1]} : vector<8x384xf32> to vector<8x128xf32>
    %138 = vector.extract_strided_slice %134 {offsets = [0, 128], sizes = [8, 128], strides = [1, 1]} : vector<8x384xf32> to vector<8x128xf32>
    %139 = vector.extract_strided_slice %134 {offsets = [0, 256], sizes = [8, 128], strides = [1, 1]} : vector<8x384xf32> to vector<8x128xf32>
    %140 = arith.mulf %138, %105 : vector<8x128xf32>
    %141 = arith.mulf %137, %136 : vector<8x128xf32>
    %142 = arith.addf %140, %141 : vector<8x128xf32>
    %143 = math.tanh %142 : vector<8x128xf32>
    %144 = arith.mulf %139, %143 : vector<8x128xf32>
    %145 = vector.broadcast %3 : vector<1x128xf32> to vector<8x128xf32>
    %146 = arith.mulf %144, %145 : vector<8x128xf32>
    %cst_28 = arith.constant dense<0.000000e+00> : vector<8xf32>
    %147 = vector.multi_reduction <add>, %146, %cst_28 [1] : vector<8x128xf32> to vector<8xf32>
    %148 = vector.shape_cast %147 : vector<8xf32> to vector<8x1xf32>
    %149 = vector.broadcast %4 : vector<1x1xf32> to vector<8x1xf32>
    %150 = arith.addf %148, %149 : vector<8x1xf32>
    %151 = arith.maximumf %114, %150 : vector<8x1xf32>
    %152 = arith.subf %114, %151 : vector<8x1xf32>
    %153 = math.exp %152 : vector<8x1xf32>
    %154 = arith.subf %150, %151 : vector<8x1xf32>
    %155 = math.exp %154 : vector<8x1xf32>
    %156 = arith.mulf %153, %120 : vector<8x1xf32>
    %157 = arith.addf %156, %155 : vector<8x1xf32>
    %158 = vector.broadcast %153 : vector<8x1xf32> to vector<8x128xf32>
    %159 = arith.mulf %158, %125 : vector<8x128xf32>
    %160 = vector.broadcast %155 : vector<8x1xf32> to vector<8x128xf32>
    %161 = arith.mulf %160, %144 : vector<8x128xf32>
    %162 = arith.addf %159, %161 : vector<8x128xf32>
    %163 = vector.extract_strided_slice %9 {offsets = [32, 0], sizes = [8, 512], strides = [1, 1]} : vector<64x512xf32> to vector<8x512xf32>
    %cst_29 = arith.constant dense<0.000000e+00> : vector<8x512xf32>
    %164 = tpu.matmul %144, %1, %cst_29 {dimension_numbers = #tpu.dot_dimension_numbers<[1], [0], [0], [1], [0, 0, 1, 1], [], []>} : vector<8x128xf32>, vector<128x512xf32>, vector<8x512xf32> -> vector<8x512xf32>
    %165 = arith.addf %163, %164 : vector<8x512xf32>
    %166 = vector.extract_strided_slice %165 {offsets = [0, 0], sizes = [8, 384], strides = [1, 1]} : vector<8x512xf32> to vector<8x384xf32>
    %167 = arith.negf %166 : vector<8x384xf32>
    %168 = math.exp %167 : vector<8x384xf32>
    %cst_30 = arith.constant 1.000000e+00 : f32
    %169 = vector.broadcast %cst_30 : f32 to vector<8x384xf32>
    %170 = arith.addf %169, %168 : vector<8x384xf32>
    %171 = arith.divf %169, %170 : vector<8x384xf32>
    %172 = vector.extract_strided_slice %165 {offsets = [0, 384], sizes = [8, 128], strides = [1, 1]} : vector<8x512xf32> to vector<8x128xf32>
    %173 = math.tanh %172 : vector<8x128xf32>
    %174 = vector.extract_strided_slice %171 {offsets = [0, 0], sizes = [8, 128], strides = [1, 1]} : vector<8x384xf32> to vector<8x128xf32>
    %175 = vector.extract_strided_slice %171 {offsets = [0, 128], sizes = [8, 128], strides = [1, 1]} : vector<8x384xf32> to vector<8x128xf32>
    %176 = vector.extract_strided_slice %171 {offsets = [0, 256], sizes = [8, 128], strides = [1, 1]} : vector<8x384xf32> to vector<8x128xf32>
    %177 = arith.mulf %175, %142 : vector<8x128xf32>
    %178 = arith.mulf %174, %173 : vector<8x128xf32>
    %179 = arith.addf %177, %178 : vector<8x128xf32>
    %180 = math.tanh %179 : vector<8x128xf32>
    %181 = arith.mulf %176, %180 : vector<8x128xf32>
    %182 = vector.broadcast %3 : vector<1x128xf32> to vector<8x128xf32>
    %183 = arith.mulf %181, %182 : vector<8x128xf32>
    %cst_31 = arith.constant dense<0.000000e+00> : vector<8xf32>
    %184 = vector.multi_reduction <add>, %183, %cst_31 [1] : vector<8x128xf32> to vector<8xf32>
    %185 = vector.shape_cast %184 : vector<8xf32> to vector<8x1xf32>
    %186 = vector.broadcast %4 : vector<1x1xf32> to vector<8x1xf32>
    %187 = arith.addf %185, %186 : vector<8x1xf32>
    %188 = arith.maximumf %151, %187 : vector<8x1xf32>
    %189 = arith.subf %151, %188 : vector<8x1xf32>
    %190 = math.exp %189 : vector<8x1xf32>
    %191 = arith.subf %187, %188 : vector<8x1xf32>
    %192 = math.exp %191 : vector<8x1xf32>
    %193 = arith.mulf %190, %157 : vector<8x1xf32>
    %194 = arith.addf %193, %192 : vector<8x1xf32>
    %195 = vector.broadcast %190 : vector<8x1xf32> to vector<8x128xf32>
    %196 = arith.mulf %195, %162 : vector<8x128xf32>
    %197 = vector.broadcast %192 : vector<8x1xf32> to vector<8x128xf32>
    %198 = arith.mulf %197, %181 : vector<8x128xf32>
    %199 = arith.addf %196, %198 : vector<8x128xf32>
    %200 = vector.extract_strided_slice %9 {offsets = [40, 0], sizes = [8, 512], strides = [1, 1]} : vector<64x512xf32> to vector<8x512xf32>
    %cst_32 = arith.constant dense<0.000000e+00> : vector<8x512xf32>
    %201 = tpu.matmul %181, %1, %cst_32 {dimension_numbers = #tpu.dot_dimension_numbers<[1], [0], [0], [1], [0, 0, 1, 1], [], []>} : vector<8x128xf32>, vector<128x512xf32>, vector<8x512xf32> -> vector<8x512xf32>
    %202 = arith.addf %200, %201 : vector<8x512xf32>
    %203 = vector.extract_strided_slice %202 {offsets = [0, 0], sizes = [8, 384], strides = [1, 1]} : vector<8x512xf32> to vector<8x384xf32>
    %204 = arith.negf %203 : vector<8x384xf32>
    %205 = math.exp %204 : vector<8x384xf32>
    %cst_33 = arith.constant 1.000000e+00 : f32
    %206 = vector.broadcast %cst_33 : f32 to vector<8x384xf32>
    %207 = arith.addf %206, %205 : vector<8x384xf32>
    %208 = arith.divf %206, %207 : vector<8x384xf32>
    %209 = vector.extract_strided_slice %202 {offsets = [0, 384], sizes = [8, 128], strides = [1, 1]} : vector<8x512xf32> to vector<8x128xf32>
    %210 = math.tanh %209 : vector<8x128xf32>
    %211 = vector.extract_strided_slice %208 {offsets = [0, 0], sizes = [8, 128], strides = [1, 1]} : vector<8x384xf32> to vector<8x128xf32>
    %212 = vector.extract_strided_slice %208 {offsets = [0, 128], sizes = [8, 128], strides = [1, 1]} : vector<8x384xf32> to vector<8x128xf32>
    %213 = vector.extract_strided_slice %208 {offsets = [0, 256], sizes = [8, 128], strides = [1, 1]} : vector<8x384xf32> to vector<8x128xf32>
    %214 = arith.mulf %212, %179 : vector<8x128xf32>
    %215 = arith.mulf %211, %210 : vector<8x128xf32>
    %216 = arith.addf %214, %215 : vector<8x128xf32>
    %217 = math.tanh %216 : vector<8x128xf32>
    %218 = arith.mulf %213, %217 : vector<8x128xf32>
    %219 = vector.broadcast %3 : vector<1x128xf32> to vector<8x128xf32>
    %220 = arith.mulf %218, %219 : vector<8x128xf32>
    %cst_34 = arith.constant dense<0.000000e+00> : vector<8xf32>
    %221 = vector.multi_reduction <add>, %220, %cst_34 [1] : vector<8x128xf32> to vector<8xf32>
    %222 = vector.shape_cast %221 : vector<8xf32> to vector<8x1xf32>
    %223 = vector.broadcast %4 : vector<1x1xf32> to vector<8x1xf32>
    %224 = arith.addf %222, %223 : vector<8x1xf32>
    %225 = arith.maximumf %188, %224 : vector<8x1xf32>
    %226 = arith.subf %188, %225 : vector<8x1xf32>
    %227 = math.exp %226 : vector<8x1xf32>
    %228 = arith.subf %224, %225 : vector<8x1xf32>
    %229 = math.exp %228 : vector<8x1xf32>
    %230 = arith.mulf %227, %194 : vector<8x1xf32>
    %231 = arith.addf %230, %229 : vector<8x1xf32>
    %232 = vector.broadcast %227 : vector<8x1xf32> to vector<8x128xf32>
    %233 = arith.mulf %232, %199 : vector<8x128xf32>
    %234 = vector.broadcast %229 : vector<8x1xf32> to vector<8x128xf32>
    %235 = arith.mulf %234, %218 : vector<8x128xf32>
    %236 = arith.addf %233, %235 : vector<8x128xf32>
    %237 = vector.extract_strided_slice %9 {offsets = [48, 0], sizes = [8, 512], strides = [1, 1]} : vector<64x512xf32> to vector<8x512xf32>
    %cst_35 = arith.constant dense<0.000000e+00> : vector<8x512xf32>
    %238 = tpu.matmul %218, %1, %cst_35 {dimension_numbers = #tpu.dot_dimension_numbers<[1], [0], [0], [1], [0, 0, 1, 1], [], []>} : vector<8x128xf32>, vector<128x512xf32>, vector<8x512xf32> -> vector<8x512xf32>
    %239 = arith.addf %237, %238 : vector<8x512xf32>
    %240 = vector.extract_strided_slice %239 {offsets = [0, 0], sizes = [8, 384], strides = [1, 1]} : vector<8x512xf32> to vector<8x384xf32>
    %241 = arith.negf %240 : vector<8x384xf32>
    %242 = math.exp %241 : vector<8x384xf32>
    %cst_36 = arith.constant 1.000000e+00 : f32
    %243 = vector.broadcast %cst_36 : f32 to vector<8x384xf32>
    %244 = arith.addf %243, %242 : vector<8x384xf32>
    %245 = arith.divf %243, %244 : vector<8x384xf32>
    %246 = vector.extract_strided_slice %239 {offsets = [0, 384], sizes = [8, 128], strides = [1, 1]} : vector<8x512xf32> to vector<8x128xf32>
    %247 = math.tanh %246 : vector<8x128xf32>
    %248 = vector.extract_strided_slice %245 {offsets = [0, 0], sizes = [8, 128], strides = [1, 1]} : vector<8x384xf32> to vector<8x128xf32>
    %249 = vector.extract_strided_slice %245 {offsets = [0, 128], sizes = [8, 128], strides = [1, 1]} : vector<8x384xf32> to vector<8x128xf32>
    %250 = vector.extract_strided_slice %245 {offsets = [0, 256], sizes = [8, 128], strides = [1, 1]} : vector<8x384xf32> to vector<8x128xf32>
    %251 = arith.mulf %249, %216 : vector<8x128xf32>
    %252 = arith.mulf %248, %247 : vector<8x128xf32>
    %253 = arith.addf %251, %252 : vector<8x128xf32>
    %254 = math.tanh %253 : vector<8x128xf32>
    %255 = arith.mulf %250, %254 : vector<8x128xf32>
    %256 = vector.broadcast %3 : vector<1x128xf32> to vector<8x128xf32>
    %257 = arith.mulf %255, %256 : vector<8x128xf32>
    %cst_37 = arith.constant dense<0.000000e+00> : vector<8xf32>
    %258 = vector.multi_reduction <add>, %257, %cst_37 [1] : vector<8x128xf32> to vector<8xf32>
    %259 = vector.shape_cast %258 : vector<8xf32> to vector<8x1xf32>
    %260 = vector.broadcast %4 : vector<1x1xf32> to vector<8x1xf32>
    %261 = arith.addf %259, %260 : vector<8x1xf32>
    %262 = arith.maximumf %225, %261 : vector<8x1xf32>
    %263 = arith.subf %225, %262 : vector<8x1xf32>
    %264 = math.exp %263 : vector<8x1xf32>
    %265 = arith.subf %261, %262 : vector<8x1xf32>
    %266 = math.exp %265 : vector<8x1xf32>
    %267 = arith.mulf %264, %231 : vector<8x1xf32>
    %268 = arith.addf %267, %266 : vector<8x1xf32>
    %269 = vector.broadcast %264 : vector<8x1xf32> to vector<8x128xf32>
    %270 = arith.mulf %269, %236 : vector<8x128xf32>
    %271 = vector.broadcast %266 : vector<8x1xf32> to vector<8x128xf32>
    %272 = arith.mulf %271, %255 : vector<8x128xf32>
    %273 = arith.addf %270, %272 : vector<8x128xf32>
    %274 = vector.extract_strided_slice %9 {offsets = [56, 0], sizes = [8, 512], strides = [1, 1]} : vector<64x512xf32> to vector<8x512xf32>
    %cst_38 = arith.constant dense<0.000000e+00> : vector<8x512xf32>
    %275 = tpu.matmul %255, %1, %cst_38 {dimension_numbers = #tpu.dot_dimension_numbers<[1], [0], [0], [1], [0, 0, 1, 1], [], []>} : vector<8x128xf32>, vector<128x512xf32>, vector<8x512xf32> -> vector<8x512xf32>
    %276 = arith.addf %274, %275 : vector<8x512xf32>
    %277 = vector.extract_strided_slice %276 {offsets = [0, 0], sizes = [8, 384], strides = [1, 1]} : vector<8x512xf32> to vector<8x384xf32>
    %278 = arith.negf %277 : vector<8x384xf32>
    %279 = math.exp %278 : vector<8x384xf32>
    %cst_39 = arith.constant 1.000000e+00 : f32
    %280 = vector.broadcast %cst_39 : f32 to vector<8x384xf32>
    %281 = arith.addf %280, %279 : vector<8x384xf32>
    %282 = arith.divf %280, %281 : vector<8x384xf32>
    %283 = vector.extract_strided_slice %276 {offsets = [0, 384], sizes = [8, 128], strides = [1, 1]} : vector<8x512xf32> to vector<8x128xf32>
    %284 = math.tanh %283 : vector<8x128xf32>
    %285 = vector.extract_strided_slice %282 {offsets = [0, 0], sizes = [8, 128], strides = [1, 1]} : vector<8x384xf32> to vector<8x128xf32>
    %286 = vector.extract_strided_slice %282 {offsets = [0, 128], sizes = [8, 128], strides = [1, 1]} : vector<8x384xf32> to vector<8x128xf32>
    %287 = vector.extract_strided_slice %282 {offsets = [0, 256], sizes = [8, 128], strides = [1, 1]} : vector<8x384xf32> to vector<8x128xf32>
    %288 = arith.mulf %286, %253 : vector<8x128xf32>
    %289 = arith.mulf %285, %284 : vector<8x128xf32>
    %290 = arith.addf %288, %289 : vector<8x128xf32>
    %291 = math.tanh %290 : vector<8x128xf32>
    %292 = arith.mulf %287, %291 : vector<8x128xf32>
    %293 = vector.broadcast %3 : vector<1x128xf32> to vector<8x128xf32>
    %294 = arith.mulf %292, %293 : vector<8x128xf32>
    %cst_40 = arith.constant dense<0.000000e+00> : vector<8xf32>
    %295 = vector.multi_reduction <add>, %294, %cst_40 [1] : vector<8x128xf32> to vector<8xf32>
    %296 = vector.shape_cast %295 : vector<8xf32> to vector<8x1xf32>
    %297 = vector.broadcast %4 : vector<1x1xf32> to vector<8x1xf32>
    %298 = arith.addf %296, %297 : vector<8x1xf32>
    %299 = arith.maximumf %262, %298 : vector<8x1xf32>
    %300 = arith.subf %262, %299 : vector<8x1xf32>
    %301 = math.exp %300 : vector<8x1xf32>
    %302 = arith.subf %298, %299 : vector<8x1xf32>
    %303 = math.exp %302 : vector<8x1xf32>
    %304 = arith.mulf %301, %268 : vector<8x1xf32>
    %305 = arith.addf %304, %303 : vector<8x1xf32>
    %306 = vector.broadcast %301 : vector<8x1xf32> to vector<8x128xf32>
    %307 = arith.mulf %306, %273 : vector<8x128xf32>
    %308 = vector.broadcast %303 : vector<8x1xf32> to vector<8x128xf32>
    %309 = arith.mulf %308, %292 : vector<8x128xf32>
    %310 = arith.addf %307, %309 : vector<8x128xf32>
    %cst_41 = arith.constant 1.000000e+00 : f32
    %311 = vector.broadcast %cst_41 : f32 to vector<8x1xf32>
    %312 = arith.divf %311, %305 : vector<8x1xf32>
    %313 = vector.broadcast %312 : vector<8x1xf32> to vector<8x128xf32>
    %314 = arith.mulf %310, %313 : vector<8x128xf32>
    %c0_42 = arith.constant 0 : index
    %c0_43 = arith.constant 0 : index
    %315 = vector.load %arg7[%c0_42, %c0_43] : memref<1x128xf32, #tpu.memory_space<vmem>>, vector<1x128xf32>
    %cst_44 = arith.constant dense<0.000000e+00> : vector<1x8xf32>
    %316 = tpu.matmul %315, %314, %cst_44 {dimension_numbers = #tpu.dot_dimension_numbers<[1], [1], [0], [0], [0, 0, 1, 0], [], []>} : vector<1x128xf32>, vector<8x128xf32>, vector<1x8xf32> -> vector<1x8xf32>
    %c0_45 = arith.constant 0 : index
    %c0_46 = arith.constant 0 : index
    %317 = vector.load %arg8[%c0_45, %c0_46] : memref<1x1xf32, #tpu.memory_space<vmem>>, vector<1x1xf32>
    %318 = vector.broadcast %317 : vector<1x1xf32> to vector<1x8xf32>
    %319 = arith.addf %316, %318 : vector<1x8xf32>
    %320 = arith.negf %319 : vector<1x8xf32>
    %321 = math.exp %320 : vector<1x8xf32>
    %cst_47 = arith.constant 1.000000e+00 : f32
    %322 = vector.broadcast %cst_47 : f32 to vector<1x8xf32>
    %323 = arith.addf %322, %321 : vector<1x8xf32>
    %324 = arith.divf %322, %323 : vector<1x8xf32>
    %325 = vector.shape_cast %324 : vector<1x8xf32> to vector<1x1x8xf32>
    %c0_48 = arith.constant 0 : index
    %c0_49 = arith.constant 0 : index
    %c0_50 = arith.constant 0 : index
    %326 = vector.load %arg9[%c0_48, %c0_49, %c0_50] : memref<1x1x8xf32, #tpu.memory_space<vmem>>, vector<1x1x8xf32>
    tpu.vector_store %arg9[%c0_48, %c0_49, %c0_50], %325 {strides = array<i32>} : memref<1x1x8xf32, #tpu.memory_space<vmem>>, vector<1x1x8xf32>,
    return
  }
  func.func @transform_0(%arg0: i32) -> (i32, i32, i32) {
    %c0_i32 = arith.constant 0 : i32
    %c0_i32_0 = arith.constant 0 : i32
    %c0_i32_1 = arith.constant 0 : i32
    return %arg0, %c0_i32, %c0_i32_0 : i32, i32, i32
  }
  func.func @transform_1(%arg0: i32) -> (i32, i32) {
    %c0_i32 = arith.constant 0 : i32
    %c0_i32_0 = arith.constant 0 : i32
    %c0_i32_1 = arith.constant 0 : i32
    return %c0_i32, %c0_i32_0 : i32, i32
  }
  func.func @transform_2(%arg0: i32) -> (i32, i32) {
    %c0_i32 = arith.constant 0 : i32
    %c0_i32_0 = arith.constant 0 : i32
    %c0_i32_1 = arith.constant 0 : i32
    return %c0_i32, %c0_i32_0 : i32, i32
  }
  func.func @transform_3(%arg0: i32) -> (i32, i32) {
    %c0_i32 = arith.constant 0 : i32
    %c0_i32_0 = arith.constant 0 : i32
    %c0_i32_1 = arith.constant 0 : i32
    return %c0_i32, %c0_i32_0 : i32, i32
  }
  func.func @transform_4(%arg0: i32) -> (i32, i32) {
    %c0_i32 = arith.constant 0 : i32
    %c0_i32_0 = arith.constant 0 : i32
    %c0_i32_1 = arith.constant 0 : i32
    return %c0_i32, %c0_i32_0 : i32, i32
  }
  func.func @transform_5(%arg0: i32) -> (i32, i32) {
    %c0_i32 = arith.constant 0 : i32
    %c0_i32_0 = arith.constant 0 : i32
    %c0_i32_1 = arith.constant 0 : i32
    return %c0_i32, %c0_i32_0 : i32, i32
  }
  func.func @transform_6(%arg0: i32) -> (i32, i32) {
    %c0_i32 = arith.constant 0 : i32
    %c0_i32_0 = arith.constant 0 : i32
    %c0_i32_1 = arith.constant 0 : i32
    return %c0_i32, %c0_i32_0 : i32, i32
  }
  func.func @transform_7(%arg0: i32) -> (i32, i32) {
    %c0_i32 = arith.constant 0 : i32
    %c0_i32_0 = arith.constant 0 : i32
    %c0_i32_1 = arith.constant 0 : i32
    return %c0_i32, %c0_i32_0 : i32, i32
  }
  func.func @transform_8(%arg0: i32) -> (i32, i32, i32) {
    %c0_i32 = arith.constant 0 : i32
    %c0_i32_0 = arith.constant 0 : i32
    %c0_i32_1 = arith.constant 0 : i32
    return %arg0, %c0_i32, %c0_i32_0 : i32, i32, i32
  }
}

</mosaic_0001>

<bundles_post_ra>
// kernel: tpu_custom_call.1
= control target key start
LH: loop header
LB: loop body
LE: loop exit
PB: predicated region body
PF: predicated region fallthrough
CT: control target
= control target key end

     0   :  { %s3376_s0 = inlined_call_operand.vmem [shape: f32[1,64,8], index: 0, kind: input, shape index: {}]   ;;  %s3377_s1 = inlined_call_operand.vmem [shape: f32[8,512], index: 1, kind: input, shape index: {}]   ;;  %s3378_s2 = inlined_call_operand.hbm [shape: f32[128,512], index: 2, kind: input, shape index: {}]   ;;  %s3379_s3 = inlined_call_operand.vmem [shape: f32[1,512], index: 3, kind: input, shape index: {}]   ;;  %s3380_s4 = inlined_call_operand.vmem [shape: f32[1,128], index: 4, kind: input, shape index: {}]   ;;  %s3381_s5 = inlined_call_operand.<no memory space> [shape: f32[1,1], index: 5, kind: input, shape index: {}]   ;;  %s3382_s6 = inlined_call_operand.vmem [shape: f32[1,128], index: 6, kind: input, shape index: {}]   ;;  %s3383_s8 = inlined_call_operand.hbm [shape: f32[1,1,8], index: 8, kind: output, shape index: {}]   ;;  %s3384_s7 = inlined_call_operand.<no memory space> [shape: f32[1,1], index: 7, kind: input, shape index: {}]  }
   0x1   :  { %v13_v0 = vstv %s3381_s5  ;;  %v15_v1 = vstv %s3384_s7 }
   0x2   :  { %14 = vst [vmem:[#allocation2] sm:$0x1] %v13_v0 }
   0x3   :  { %16 = vst [vmem:[#allocation3] sm:$0x1] %v15_v1 }
   0x4   :  { %17 = vsyncpa [#allocation5], 0 }
   0x5   :  { %18 = vsyncpa [#allocation6], 0  ;;  %s27_s11 = sshll.u32 %s3378_s2, 4  ;;  %s2154_s12 = smov [#allocation4]   ;;  %s28_s11 = int_to_ptr.hbm [resolvable:$true] %s27_s11 }
   0x6   :  { %s29_s13 = sshll.u32 %s2154_s12, 4  ;;  %s2155_s14 = smov 512   ;;  %s30_s13 = int_to_ptr.vmem [resolvable:$true] %s29_s13 }
   0x7   :  { %s2156_s15 = smov 32  }
   0x8   :  { %35 = dma.hbm_to_vmem [thread:$0]  %s28_s11, 8192, %s30_s13, [#allocation5], %s2155_s14, %s2155_s14, %s2156_s15  }
   0x9   :  { %2150 = dma.done.wait [#allocation5], 8192  }
   0xa   :  { %2151 = vsyncadd [#allocation5], 4294959104  ;;  %v50_v2 = vld [vmem:[%s3377_s1] sm:$0xff]  ;;  %v51_v3 = vld [vmem:[%s3377_s1 + $0x8] sm:$0xff]  ;;  %vm138_vm0 = vcmask 64512   ;;  %s2159_s17 = smov [#allocation7]  }
   0xb   :  { %v52_v4 = vld [vmem:[%s3377_s1 + $0x10] sm:$0xff]  ;;  %178 = vmatpush.msra.mxu0 %v50_v2  ;;  %219 = vmatpush.msra.mxu1 %v51_v3  ;;  %v53_v5 = vld [vmem:[%s3377_s1 + $0x18] sm:$0xff]  ;;  %v121_v6 = vld [vmem:[%s3376_s0] sm:$0xff]  ;;  %s1791_s18 = sshll.u32 %s2159_s17, 4  ;;  %s1793_s2 = sshll.u32 %s3383_s8, 4  ;;  %s1792_s18 = int_to_ptr.vmem [resolvable:$true] %s1791_s18  ;;  %s1794_s2 = int_to_ptr.hbm [resolvable:$true] %s1793_s2 }
   0xc   :  { %260 = vmatpush.msra.mxu2 %v52_v4  ;;  %301 = vmatpush.msra.mxu3 %v53_v5  ;;  %v2229_v7 = vld [vmem:[#allocation4 + $0x1e0] sm:$0xff]  ;;  %v2231_v8 = vld [vmem:[#allocation4 + $0x1e8] sm:$0xff]  ;;  %v2235_v9 = vld [vmem:[#allocation4 + $0x1f0] sm:$0xff] }
   0xd   :  { %1803 = vmatmul.msk.f32.vlgmr.msra.gmra.mxu0 %vm138_vm0, %v121_v6  ;;  %1811 = vmatmul.msk.f32.vlgmr.msra.gmra.mxu1 %vm138_vm0, %v121_v6  ;;  %v2239_v10 = vld [vmem:[#allocation4 + $0x1c0] sm:$0xff]  ;;  %v2241_v11 = vld [vmem:[#allocation4 + $0x1c8] sm:$0xff]  ;;  %v2245_v12 = vld [vmem:[#allocation4 + $0x1d0] sm:$0xff] }
   0xe   :  { %1819 = vmatmul.msk.f32.vlgmr.msra.gmra.mxu2 %vm138_vm0, %v121_v6  ;;  %1827 = vmatmul.msk.f32.vlgmr.msra.gmra.mxu3 %vm138_vm0, %v121_v6  ;;  %v2248_v13 = vld [vmem:[#allocation4 + $0x1a0] sm:$0xff]  ;;  %v2250_v14 = vld [vmem:[#allocation4 + $0x1a8] sm:$0xff]  ;;  %v2252_v15 = vld [vmem:[#allocation4 + $0x1f8] sm:$0xff] }
   0xf   :  { %327 = vmatpush.msrb.mxu0 %v2229_v7  ;;  %347 = vmatpush.msrb.mxu1 %v2231_v8  ;;  %v2256_v16 = vld [vmem:[#allocation4 + $0x1b0] sm:$0xff]  ;;  %v2258_v17 = vld [vmem:[#allocation4 + $0x1d8] sm:$0xff]  ;;  %v122_v18 = vld [vmem:[%s3376_s0 + $0x8] sm:$0xff] }
  0x10   :  { %367 = vmatpush.msrb.mxu2 %v2235_v9  ;;  %387 = vmatpush.msrb.mxu3 %v2252_v15  ;;  %v2267_v19 = vld [vmem:[#allocation4 + $0x180] sm:$0xff]  ;;  %v2269_v20 = vld [vmem:[#allocation4 + $0x188] sm:$0xff]  ;;  %v2275_v21 = vld [vmem:[#allocation4 + $0x190] sm:$0xff] }
  0x11   :  { %328 = vmatpush.msrb.mxu0 %v2239_v10  ;;  %348 = vmatpush.msrb.mxu1 %v2241_v11  ;;  %v2277_v22 = vld [vmem:[#allocation4 + $0x1b8] sm:$0xff]  ;;  %v2281_v23 = vld [vmem:[#allocation4 + $0x160] sm:$0xff]  ;;  %v2283_v24 = vld [vmem:[#allocation4 + $0x168] sm:$0xff] }
  0x12   :  { %368 = vmatpush.msrb.mxu2 %v2245_v12  ;;  %388 = vmatpush.msrb.mxu3 %v2258_v17  ;;  %v2287_v25 = vld [vmem:[#allocation4 + $0x170] sm:$0xff]  ;;  %v2289_v26 = vld [vmem:[#allocation4 + $0x198] sm:$0xff]  ;;  %v2292_v27 = vld [vmem:[#allocation4 + $0x140] sm:$0xff] }
  0x13   :  { %329 = vmatpush.msrb.mxu0 %v2248_v13  ;;  %349 = vmatpush.msrb.mxu1 %v2250_v14  ;;  %v2294_v28 = vld [vmem:[#allocation4 + $0x148] sm:$0xff]  ;;  %v2299_v29 = vld [vmem:[#allocation4 + $0x150] sm:$0xff]  ;;  %v2301_v30 = vld [vmem:[#allocation4 + $0x178] sm:$0xff] }
  0x14   :  { %369 = vmatpush.msrb.mxu2 %v2256_v16  ;;  %389 = vmatpush.msrb.mxu3 %v2277_v22  ;;  %v123_v31 = vld [vmem:[%s3376_s0 + $0x10] sm:$0xff]  ;;  %v2310_v32 = vld [vmem:[#allocation4 + $0x120] sm:$0xff]  ;;  %v2320_v35 = vld [vmem:[#allocation4 + $0x158] sm:$0xff] }
  0x15   :  { %1804 = vmatmul.msk.f32.gmra.mxu0 %vm138_vm0, %v122_v18  ;;  %1812 = vmatmul.msk.f32.gmra.mxu1 %vm138_vm0, %v122_v18  ;;  %v2312_v33 = vld [vmem:[#allocation4 + $0x128] sm:$0xff]  ;;  %v2318_v34 = vld [vmem:[#allocation4 + $0x130] sm:$0xff]  ;;  %v2324_v36 = vld [vmem:[#allocation4 + $0x100] sm:$0xff] }
  0x16   :  { %1820 = vmatmul.msk.f32.gmra.mxu2 %vm138_vm0, %v122_v18  ;;  %1828 = vmatmul.msk.f32.gmra.mxu3 %vm138_vm0, %v122_v18  ;;  %v2326_v37 = vld [vmem:[#allocation4 + $0x108] sm:$0xff]  ;;  %v2330_v38 = vld [vmem:[#allocation4 + $0x110] sm:$0xff]  ;;  %v2332_v39 = vld [vmem:[#allocation4 + $0x138] sm:$0xff] }
  0x17   :  { %330 = vmatpush.msrb.mxu0 %v2267_v19  ;;  %350 = vmatpush.msrb.mxu1 %v2269_v20  ;;  %v2335_v40 = vld [vmem:[#allocation4 + $0xe0] sm:$0xff]  ;;  %v2337_v41 = vld [vmem:[#allocation4 + $0xe8] sm:$0xff]  ;;  %v2342_v42 = vld [vmem:[#allocation4 + $0xf0] sm:$0xff] }
  0x18   :  { %370 = vmatpush.msrb.mxu2 %v2275_v21  ;;  %390 = vmatpush.msrb.mxu3 %v2289_v26  ;;  %v2344_v43 = vld [vmem:[#allocation4 + $0x118] sm:$0xff]  ;;  %v2353_v45 = vld [vmem:[#allocation4 + $0xc0] sm:$0xff]  ;;  %v2355_v46 = vld [vmem:[#allocation4 + $0xc8] sm:$0xff] }
  0x19   :  { %331 = vmatpush.msrb.mxu0 %v2281_v23  ;;  %351 = vmatpush.msrb.mxu1 %v2283_v24  ;;  %v124_v44 = vld [vmem:[%s3376_s0 + $0x18] sm:$0xff]  ;;  %v2367_v49 = vld [vmem:[#allocation4 + $0xa0] sm:$0xff]  ;;  %v2369_v50 = vld [vmem:[#allocation4 + $0xa8] sm:$0xff] }
  0x1a   :  { %371 = vmatpush.msrb.mxu2 %v2287_v25  ;;  %391 = vmatpush.msrb.mxu3 %v2301_v30  ;;  %v2361_v47 = vld [vmem:[#allocation4 + $0xd0] sm:$0xff]  ;;  %v2363_v48 = vld [vmem:[#allocation4 + $0xf8] sm:$0xff]  ;;  %3479 = vst [vmem:[#allocation11_spill] sm:$0xff] %v2367_v49  ;;  %v2378_v53 = vld [vmem:[#allocation4 + $0x80] sm:$0xff] }
  0x1b   :  { %332 = vmatpush.msrb.mxu0 %v2292_v27  ;;  %352 = vmatpush.msrb.mxu1 %v2294_v28  ;;  %3478 = vst [vmem:[#allocation10_spill] sm:$0xff] %v2361_v47  ;;  %v2373_v51 = vld [vmem:[#allocation4 + $0xb0] sm:$0xff]  ;;  %v2375_v52 = vld [vmem:[#allocation4 + $0xd8] sm:$0xff]  ;;  %v2380_v54 = vld [vmem:[#allocation4 + $0x88] sm:$0xff] }
  0x1c   :  { %372 = vmatpush.msrb.mxu2 %v2299_v29  ;;  %392 = vmatpush.msrb.mxu3 %v2320_v35  ;;  %3480 = vst [vmem:[#allocation12_spill] sm:$0xff] %v2369_v50  ;;  %v2385_v55 = vld [vmem:[#allocation4 + $0xb8] sm:$0xff]  ;;  %v2387_v56 = vld [vmem:[#allocation4 + $0x90] sm:$0xff]  ;;  %v2396_v58 = vld [vmem:[#allocation4 + $0x60] sm:$0xff] }
  0x1d   :  { %1805 = vmatmul.msk.f32.gmra.mxu0 %vm138_vm0, %v123_v31  ;;  %1813 = vmatmul.msk.f32.gmra.mxu1 %vm138_vm0, %v123_v31  ;;  %3481 = vst [vmem:[#allocation13_spill] sm:$0xff] %v2373_v51  ;;  %v125_v57 = vld [vmem:[%s3376_s0 + $0x20] sm:$0xff]  ;;  %v2398_v59 = vld [vmem:[#allocation4 + $0x68] sm:$0xff]  ;;  %v2406_v61 = vld [vmem:[#allocation4 + $0x70] sm:$0xff] }
  0x1e   :  { %1821 = vmatmul.msk.f32.gmra.mxu2 %vm138_vm0, %v123_v31  ;;  %1829 = vmatmul.msk.f32.gmra.mxu3 %vm138_vm0, %v123_v31  ;;  %3482 = vst [vmem:[#allocation14_spill] sm:$0xff] %v2375_v52  ;;  %v2404_v60 = vld [vmem:[#allocation4 + $0x98] sm:$0xff]  ;;  %v2410_v62 = vld [vmem:[#allocation4 + $0x40] sm:$0xff]  ;;  %v2412_v63 = vld [vmem:[#allocation4 + $0x48] sm:$0xff] }
  0x1f   :  { %333 = vmatpush.msrb.mxu0 %v2310_v32  ;;  %353 = vmatpush.msrb.mxu1 %v2312_v33  ;;  %3483 = vst [vmem:[#allocation15_spill] sm:$0xff] %v2378_v53  ;;  %v2416_v0 = vld [vmem:[#allocation4 + $0x78] sm:$0xff]  ;;  %v2418_v1 = vld [vmem:[#allocation4 + $0x50] sm:$0xff]  ;;  %v2422_v2 = vld [vmem:[#allocation4 + $0x20] sm:$0xff] }
  0x20   :  { %373 = vmatpush.msrb.mxu2 %v2318_v34  ;;  %393 = vmatpush.msrb.mxu3 %v2332_v39  ;;  %3484 = vst [vmem:[#allocation16_spill] sm:$0xff] %v2380_v54  ;;  %v2424_v3 = vld [vmem:[#allocation4 + $0x28] sm:$0xff]  ;;  %v2428_v4 = vld [vmem:[#allocation4 + $0x58] sm:$0xff]  ;;  %v2430_v5 = vld [vmem:[#allocation4 + $0x30] sm:$0xff] }
  0x21   :  { %334 = vmatpush.msrb.mxu0 %v2324_v36  ;;  %354 = vmatpush.msrb.mxu1 %v2326_v37  ;;  %3485 = vst [vmem:[#allocation17_spill] sm:$0xff] %v2385_v55  ;;  %v126_v6 = vld [vmem:[%s3376_s0 + $0x28] sm:$0xff]  ;;  %v2441_v18 = vld [vmem:[#allocation4 + $0x38] sm:$0xff] }
  0x22   :  { %374 = vmatpush.msrb.mxu2 %v2330_v38  ;;  %394 = vmatpush.msrb.mxu3 %v2344_v43  ;;  %3486 = vst [vmem:[#allocation18_spill] sm:$0xff] %v2387_v56  ;;  %v2443_v31 = vld [vmem:[#allocation4] sm:$0xff] }
  0x23   :  { %335 = vmatpush.msrb.mxu0 %v2335_v40  ;;  %355 = vmatpush.msrb.mxu1 %v2337_v41  ;;  %3487 = vst [vmem:[#allocation19_spill] sm:$0xff] %v2396_v58 }
  0x24   :  { %375 = vmatpush.msrb.mxu2 %v2342_v42  ;;  %395 = vmatpush.msrb.mxu3 %v2363_v48  ;;  %3488 = vst [vmem:[#allocation20_spill] sm:$0xff] %v2398_v59 }
  0x25   :  { %1806 = vmatmul.msk.f32.gmra.mxu0 %vm138_vm0, %v124_v44  ;;  %1814 = vmatmul.msk.f32.gmra.mxu1 %vm138_vm0, %v124_v44  ;;  %3489 = vst [vmem:[#allocation21_spill] sm:$0xff] %v2404_v60 }
  0x26   :  { %1822 = vmatmul.msk.f32.gmra.mxu2 %vm138_vm0, %v124_v44  ;;  %1830 = vmatmul.msk.f32.gmra.mxu3 %vm138_vm0, %v124_v44  ;;  %3490 = vst [vmem:[#allocation22_spill] sm:$0xff] %v2406_v61  ;;  %v2447_v44 = vld [vmem:[#allocation4 + $0x8] sm:$0xff] }
  0x27   :  { %336 = vmatpush.msrb.mxu0 %v2353_v45  ;;  %356 = vmatpush.msrb.mxu1 %v2355_v46  ;;  %3491 = vst [vmem:[#allocation23_spill] sm:$0xff] %v2410_v62 }
  0x28   :  { %376 = vmatpush.msrb.mxu2 %v2361_v47  ;;  %396 = vmatpush.msrb.mxu3 %v2375_v52  ;;  %3492 = vst [vmem:[#allocation24_spill] sm:$0xff] %v2412_v63 }
  0x29   :  { %337 = vmatpush.msrb.mxu0 %v2367_v49  ;;  %357 = vmatpush.msrb.mxu1 %v2369_v50  ;;  %3493 = vst [vmem:[#allocation25_spill] sm:$0xff] %v2416_v0 }
  0x2a   :  { %377 = vmatpush.msrb.mxu2 %v2373_v51  ;;  %397 = vmatpush.msrb.mxu3 %v2385_v55  ;;  %3494 = vst [vmem:[#allocation26_spill] sm:$0xff] %v2418_v1 }
  0x2b   :  { %338 = vmatpush.msrb.mxu0 %v2378_v53  ;;  %358 = vmatpush.msrb.mxu1 %v2380_v54  ;;  %3495 = vst [vmem:[#allocation27_spill] sm:$0xff] %v2422_v2 }
  0x2c   :  { %378 = vmatpush.msrb.mxu2 %v2387_v56  ;;  %398 = vmatpush.msrb.mxu3 %v2404_v60  ;;  %3496 = vst [vmem:[#allocation28_spill] sm:$0xff] %v2424_v3 }
  0x2d   :  { %1807 = vmatmul.msk.f32.gmra.mxu0 %vm138_vm0, %v125_v57  ;;  %1815 = vmatmul.msk.f32.gmra.mxu1 %vm138_vm0, %v125_v57  ;;  %3497 = vst [vmem:[#allocation29_spill] sm:$0xff] %v2428_v4 }
  0x2e   :  { %1823 = vmatmul.msk.f32.gmra.mxu2 %vm138_vm0, %v125_v57  ;;  %1831 = vmatmul.msk.f32.gmra.mxu3 %vm138_vm0, %v125_v57  ;;  %3498 = vst [vmem:[#allocation30_spill] sm:$0xff] %v2430_v5  ;;  %v2449_v57 = vld [vmem:[#allocation4 + $0x10] sm:$0xff] }
  0x2f   :  { %339 = vmatpush.msrb.mxu0 %v2396_v58  ;;  %359 = vmatpush.msrb.mxu1 %v2398_v59  ;;  %3499 = vst [vmem:[#allocation31_spill] sm:$0xff] %v2441_v18 }
  0x30   :  { %379 = vmatpush.msrb.mxu2 %v2406_v61  ;;  %399 = vmatpush.msrb.mxu3 %v2416_v0  ;;  %3500 = vst [vmem:[#allocation32_spill] sm:$0xff] %v2443_v31 }
  0x31   :  { %340 = vmatpush.msrb.mxu0 %v2410_v62  ;;  %360 = vmatpush.msrb.mxu1 %v2412_v63  ;;  %3501 = vst [vmem:[#allocation33_spill] sm:$0xff] %v2447_v44 }
  0x32   :  { %380 = vmatpush.msrb.mxu2 %v2418_v1  ;;  %400 = vmatpush.msrb.mxu3 %v2428_v4  ;;  %3502 = vst [vmem:[#allocation34_spill] sm:$0xff] %v2449_v57 }
  0x33   :  { %341 = vmatpush.msrb.mxu0 %v2422_v2  ;;  %361 = vmatpush.msrb.mxu1 %v2424_v3  ;;  %v2453_v3 = vld [vmem:[#allocation4 + $0x18] sm:$0xff] }
  0x34   :  { %381 = vmatpush.msrb.mxu2 %v2430_v5  ;;  %3503 = vst [vmem:[#allocation35_spill] sm:$0xff] %v2453_v3  ;;  %401 = vmatpush.msrb.mxu3 %v2441_v18  ;;  %v127_v5 = vld [vmem:[%s3376_s0 + $0x30] sm:$0xff] }
  0x35   :  { %1808 = vmatmul.msk.f32.gmra.mxu0 %vm138_vm0, %v126_v6  ;;  %1816 = vmatmul.msk.f32.gmra.mxu1 %vm138_vm0, %v126_v6 }
  0x36   :  { %1824 = vmatmul.msk.f32.gmra.mxu2 %vm138_vm0, %v126_v6  ;;  %1832 = vmatmul.msk.f32.gmra.mxu3 %vm138_vm0, %v126_v6  ;;  %v128_v6 = vld [vmem:[%s3376_s0 + $0x38] sm:$0xff] }
  0x37   :  { %342 = vmatpush.msrb.mxu0 %v2443_v31  ;;  %362 = vmatpush.msrb.mxu1 %v2447_v44 }
  0x38   :  { %382 = vmatpush.msrb.mxu2 %v2449_v57  ;;  %402 = vmatpush.msrb.mxu3 %v2453_v3 }
  0x39   :  { %505 = vmatpush.msra.mxu0 %v2229_v7  ;;  %525 = vmatpush.msra.mxu1 %v2231_v8 }
  0x3a   :  { %545 = vmatpush.msra.mxu2 %v2235_v9  ;;  %565 = vmatpush.msra.mxu3 %v2252_v15 }
  0x3b   :  { %506 = vmatpush.msra.mxu0 %v2239_v10  ;;  %526 = vmatpush.msra.mxu1 %v2241_v11 }
  0x3c   :  { %546 = vmatpush.msra.mxu2 %v2245_v12  ;;  %566 = vmatpush.msra.mxu3 %v2258_v17 }
  0x3d   :  { %1809 = vmatmul.msk.f32.gmra.mxu0 %vm138_vm0, %v127_v5  ;;  %1817 = vmatmul.msk.f32.gmra.mxu1 %vm138_vm0, %v127_v5 }
  0x3e   :  { %1825 = vmatmul.msk.f32.gmra.mxu2 %vm138_vm0, %v127_v5  ;;  %1833 = vmatmul.msk.f32.gmra.mxu3 %vm138_vm0, %v127_v5  ;;  %v2157_v5 = vmov 0.0  }
  0x3f   :  { %507 = vmatpush.msra.mxu0 %v2248_v13  ;;  %527 = vmatpush.msra.mxu1 %v2250_v14 }
  0x40   :  { %547 = vmatpush.msra.mxu2 %v2256_v16  ;;  %567 = vmatpush.msra.mxu3 %v2277_v22 }
  0x41   :  { %508 = vmatpush.msra.mxu0 %v2267_v19  ;;  %528 = vmatpush.msra.mxu1 %v2269_v20 }
  0x42   :  { %548 = vmatpush.msra.mxu2 %v2275_v21  ;;  %568 = vmatpush.msra.mxu3 %v2289_v26 }
  0x43   :  { %509 = vmatpush.msra.mxu0 %v2281_v23  ;;  %529 = vmatpush.msra.mxu1 %v2283_v24 }
  0x44   :  { %549 = vmatpush.msra.mxu2 %v2287_v25  ;;  %569 = vmatpush.msra.mxu3 %v2301_v30 }
  0x45   :  { %1810 = vmatmul.msk.f32.gmra.mxu0 %vm138_vm0, %v128_v6  ;;  %1818 = vmatmul.msk.f32.gmra.mxu1 %vm138_vm0, %v128_v6 }
  0x46   :  { %1826 = vmatmul.msk.f32.gmra.mxu2 %vm138_vm0, %v128_v6  ;;  %1834 = vmatmul.msk.f32.gmra.mxu3 %vm138_vm0, %v128_v6  ;;  %v3504_v6 = vld [vmem:[#allocation28_spill] sm:$0xff] }
  0x47   :  { %510 = vmatpush.msra.mxu0 %v2292_v27  ;;  %530 = vmatpush.msra.mxu1 %v2294_v28 }
  0x48   :  { %550 = vmatpush.msra.mxu2 %v2299_v29  ;;  %570 = vmatpush.msra.mxu3 %v2320_v35 }
  0x49   :  { %511 = vmatpush.msra.mxu0 %v2310_v32  ;;  %531 = vmatpush.msra.mxu1 %v2312_v33 }
  0x4a   :  { %551 = vmatpush.msra.mxu2 %v2318_v34  ;;  %571 = vmatpush.msra.mxu3 %v2332_v39 }
  0x4b   :  { %512 = vmatpush.msra.mxu0 %v2324_v36  ;;  %532 = vmatpush.msra.mxu1 %v2326_v37 }
  0x4c   :  { %552 = vmatpush.msra.mxu2 %v2330_v38  ;;  %572 = vmatpush.msra.mxu3 %v2344_v43 }
  0x4d   :  { %343 = vmatmul.f32.vlgmr.msrb.gmra.mxu0 %v2157_v5  ;;  %363 = vmatmul.f32.vlgmr.msrb.gmra.mxu1 %v2157_v5 }
  0x4e   :  { %383 = vmatmul.f32.vlgmr.msrb.gmra.mxu2 %v2157_v5  ;;  %403 = vmatmul.f32.vlgmr.msrb.gmra.mxu3 %v2157_v5  ;;  %v3505_v5 = vld [vmem:[#allocation30_spill] sm:$0xff] }
  0x4f   :  { %513 = vmatpush.msra.mxu0 %v2335_v40  ;;  %533 = vmatpush.msra.mxu1 %v2337_v41 }
  0x50   :  { %553 = vmatpush.msra.mxu2 %v2342_v42  ;;  %573 = vmatpush.msra.mxu3 %v2363_v48 }
  0x51   :  { %514 = vmatpush.msra.mxu0 %v2353_v45  ;;  %534 = vmatpush.msra.mxu1 %v2355_v46 }
  0x52   :  { %554 = vmatpush.msra.mxu2 %v2361_v47  ;;  %574 = vmatpush.msra.mxu3 %v2375_v52 }
  0x53   :  { %515 = vmatpush.msra.mxu0 %v2367_v49  ;;  %535 = vmatpush.msra.mxu1 %v2369_v50 }
  0x54   :  { %555 = vmatpush.msra.mxu2 %v2373_v51  ;;  %575 = vmatpush.msra.mxu3 %v2385_v55 }
  0x55   :  { %516 = vmatpush.msra.mxu0 %v2378_v53  ;;  %536 = vmatpush.msra.mxu1 %v2380_v54 }
  0x56   :  { %556 = vmatpush.msra.mxu2 %v2387_v56  ;;  %576 = vmatpush.msra.mxu3 %v2404_v60 }
  0x57   :  { %517 = vmatpush.msra.mxu0 %v2396_v58  ;;  %537 = vmatpush.msra.mxu1 %v2398_v59 }
  0x58   :  { %557 = vmatpush.msra.mxu2 %v2406_v61  ;;  %577 = vmatpush.msra.mxu3 %v2416_v0 }
  0x59   :  { %518 = vmatpush.msra.mxu0 %v2410_v62  ;;  %538 = vmatpush.msra.mxu1 %v2412_v63 }
  0x5a   :  { %558 = vmatpush.msra.mxu2 %v2418_v1  ;;  %578 = vmatpush.msra.mxu3 %v2428_v4 }
  0x5b   :  { %519 = vmatpush.msra.mxu0 %v2422_v2  ;;  %539 = vmatpush.msra.mxu1 %v3504_v6 }
  0x5c   :  { %559 = vmatpush.msra.mxu2 %v3505_v5  ;;  %579 = vmatpush.msra.mxu3 %v2441_v18 }
  0x5d   :  { %520 = vmatpush.msra.mxu0 %v2443_v31  ;;  %540 = vmatpush.msra.mxu1 %v2447_v44 }
  0x5e   :  { %560 = vmatpush.msra.mxu2 %v2449_v57  ;;  %580 = vmatpush.msra.mxu3 %v2453_v3 }
  0x5f   :  { %678 = vmatpush.msrb.mxu0 %v2229_v7  ;;  %698 = vmatpush.msrb.mxu1 %v2231_v8 }
  0x60   :  { %718 = vmatpush.msrb.mxu2 %v2235_v9  ;;  %738 = vmatpush.msrb.mxu3 %v2252_v15 }
  0x61   :  { %679 = vmatpush.msrb.mxu0 %v2239_v10  ;;  %699 = vmatpush.msrb.mxu1 %v2241_v11 }
  0x62   :  { %719 = vmatpush.msrb.mxu2 %v2245_v12  ;;  %739 = vmatpush.msrb.mxu3 %v2258_v17 }
  0x63   :  { %680 = vmatpush.msrb.mxu0 %v2248_v13  ;;  %700 = vmatpush.msrb.mxu1 %v2250_v14 }
  0x64   :  { %720 = vmatpush.msrb.mxu2 %v2256_v16  ;;  %740 = vmatpush.msrb.mxu3 %v2277_v22 }
  0x65   :  { %681 = vmatpush.msrb.mxu0 %v2267_v19  ;;  %701 = vmatpush.msrb.mxu1 %v2269_v20 }
  0x66   :  { %721 = vmatpush.msrb.mxu2 %v2275_v21  ;;  %741 = vmatpush.msrb.mxu3 %v2289_v26 }
  0x67   :  { %682 = vmatpush.msrb.mxu0 %v2281_v23  ;;  %702 = vmatpush.msrb.mxu1 %v2283_v24 }
  0x68   :  { %722 = vmatpush.msrb.mxu2 %v2287_v25  ;;  %742 = vmatpush.msrb.mxu3 %v2301_v30 }
  0x69   :  { %683 = vmatpush.msrb.mxu0 %v2292_v27  ;;  %703 = vmatpush.msrb.mxu1 %v2294_v28 }
  0x6a   :  { %723 = vmatpush.msrb.mxu2 %v2299_v29  ;;  %743 = vmatpush.msrb.mxu3 %v2320_v35 }
  0x6b   :  { %684 = vmatpush.msrb.mxu0 %v2310_v32  ;;  %704 = vmatpush.msrb.mxu1 %v2312_v33 }
  0x6c   :  { %724 = vmatpush.msrb.mxu2 %v2318_v34  ;;  %744 = vmatpush.msrb.mxu3 %v2332_v39 }
  0x6d   :  { %685 = vmatpush.msrb.mxu0 %v2324_v36  ;;  %705 = vmatpush.msrb.mxu1 %v2326_v37 }
  0x6e   :  { %725 = vmatpush.msrb.mxu2 %v2330_v38  ;;  %745 = vmatpush.msrb.mxu3 %v2344_v43 }
  0x6f   :  { %686 = vmatpush.msrb.mxu0 %v2335_v40  ;;  %706 = vmatpush.msrb.mxu1 %v2337_v41 }
  0x70   :  { %726 = vmatpush.msrb.mxu2 %v2342_v42  ;;  %746 = vmatpush.msrb.mxu3 %v2363_v48 }
  0x71   :  { %687 = vmatpush.msrb.mxu0 %v2353_v45  ;;  %707 = vmatpush.msrb.mxu1 %v2355_v46 }
  0x72   :  { %727 = vmatpush.msrb.mxu2 %v2361_v47  ;;  %747 = vmatpush.msrb.mxu3 %v2375_v52 }
  0x73   :  { %688 = vmatpush.msrb.mxu0 %v2367_v49  ;;  %708 = vmatpush.msrb.mxu1 %v2369_v50 }
  0x74   :  { %728 = vmatpush.msrb.mxu2 %v2373_v51  ;;  %748 = vmatpush.msrb.mxu3 %v2385_v55 }
  0x75   :  { %689 = vmatpush.msrb.mxu0 %v2378_v53  ;;  %709 = vmatpush.msrb.mxu1 %v2380_v54 }
  0x76   :  { %729 = vmatpush.msrb.mxu2 %v2387_v56  ;;  %749 = vmatpush.msrb.mxu3 %v2404_v60 }
  0x77   :  { %690 = vmatpush.msrb.mxu0 %v2396_v58  ;;  %710 = vmatpush.msrb.mxu1 %v2398_v59 }
  0x78   :  { %730 = vmatpush.msrb.mxu2 %v2406_v61  ;;  %750 = vmatpush.msrb.mxu3 %v2416_v0 }
  0x79   :  { %691 = vmatpush.msrb.mxu0 %v2410_v62  ;;  %711 = vmatpush.msrb.mxu1 %v2412_v63 }
  0x7a   :  { %731 = vmatpush.msrb.mxu2 %v2418_v1  ;;  %751 = vmatpush.msrb.mxu3 %v2428_v4 }
  0x7b   :  { %692 = vmatpush.msrb.mxu0 %v2422_v2  ;;  %712 = vmatpush.msrb.mxu1 %v3504_v6  ;;  %v118_v2 = vld [vmem:[%s3379_s3] sm:$0xf] }
  0x7c   :  { %732 = vmatpush.msrb.mxu2 %v3505_v5  ;;  %752 = vmatpush.msrb.mxu3 %v2441_v18  ;;  %v130_v4 = vperm.slane %v118_v2, 0  ;;  %v131_v6 = vperm.slane %v118_v2, 1 }
  0x7d   :  { %693 = vmatpush.msrb.mxu0 %v2443_v31  ;;  %713 = vmatpush.msrb.mxu1 %v2447_v44 }
  0x7e   :  { %733 = vmatpush.msrb.mxu2 %v2449_v57  ;;  %753 = vmatpush.msrb.mxu3 %v2453_v3  ;;  %v2613_v57 = vperm.slane %v118_v2, 2  ;;  %v2615_v3 = vperm.slane %v118_v2, 3 }
  0x8a   :  { %v180_v63 = vpop.f32.mrf.mxu0  ;;  %v221_v1 = vpop.f32.mrf.mxu1 }
  0x91   :  { %v2605_v62 = vpop.f32.mrf.mxu2  ;;  %v2607_v5 = vpop.f32.mrf.mxu3 }
  0x92   :  { %v183_v18 = vpop.f32.mrf.mxu0  ;;  %v224_v31 = vpop.f32.mrf.mxu1 }
  0x93   :  { %v2609_v0 = vadd.f32 %v183_v18, %v130_v4  ;;  %v2611_v44 = vadd.f32 %v224_v31, %v131_v6 }
  0x95   :  { %3506 = vst [vmem:[#allocation36_spill] sm:$0xff] %v2609_v0 }
  0x96   :  { %3507 = vst [vmem:[#allocation37_spill] sm:$0xff] %v2611_v44 }
  0x99   :  { %v265_v61 = vpop.f32.mrf.mxu2  ;;  %v306_v59 = vpop.f32.mrf.mxu3 }
  0x9a   :  { %v2618_v58 = vadd.f32 %v265_v61, %v2613_v57  ;;  %v2621_v60 = vadd.f32 %v306_v59, %v2615_v3  ;;  %v186_v56 = vpop.f32.mrf.mxu0  ;;  %v227_v54 = vpop.f32.mrf.mxu1 }
  0x9b   :  { %v2623_v53 = vadd.f32 %v186_v56, %v130_v4  ;;  %v2625_v18 = vadd.f32 %v227_v54, %v131_v6 }
  0x9c   :  { %3508 = vst [vmem:[#allocation38_spill] sm:$0xff] %v2618_v58 }
  0x9d   :  { %3509 = vst [vmem:[#allocation39_spill] sm:$0xff] %v2621_v60 }
  0x9e   :  { %3510 = vst [vmem:[#allocation40_spill] sm:$0xff] %v2623_v53 }
  0x9f   :  { %3511 = vst [vmem:[#allocation41_spill] sm:$0xff] %v2625_v18 }
  0xa1   :  { %v268_v31 = vpop.f32.mrf.mxu2  ;;  %v309_v44 = vpop.f32.mrf.mxu3 }
  0xa2   :  { %v2628_v0 = vadd.f32 %v268_v31, %v2613_v57  ;;  %v2631_v2 = vadd.f32 %v309_v44, %v2615_v3  ;;  %v189_v55 = vpop.f32.mrf.mxu0  ;;  %v230_v61 = vpop.f32.mrf.mxu1 }
  0xa3   :  { %v2633_v58 = vadd.f32 %v189_v55, %v130_v4  ;;  %v2635_v59 = vadd.f32 %v230_v61, %v131_v6 }
  0xa4   :  { %3512 = vst [vmem:[#allocation42_spill] sm:$0xff] %v2628_v0 }
  0xa5   :  { %3513 = vst [vmem:[#allocation43_spill] sm:$0xff] %v2631_v2 }
  0xa6   :  { %3514 = vst [vmem:[#allocation44_spill] sm:$0xff] %v2633_v58 }
  0xa7   :  { %3515 = vst [vmem:[#allocation45_spill] sm:$0xff] %v2635_v59 }
  0xa9   :  { %v271_v60 = vpop.f32.mrf.mxu2  ;;  %v312_v51 = vpop.f32.mrf.mxu3 }
  0xaa   :  { %v2638_v56 = vadd.f32 %v271_v60, %v2613_v57  ;;  %v2641_v54 = vadd.f32 %v312_v51, %v2615_v3  ;;  %v192_v18 = vpop.f32.mrf.mxu0  ;;  %v233_v31 = vpop.f32.mrf.mxu1 }
  0xab   :  { %v2643_v0 = vadd.f32 %v192_v18, %v130_v4  ;;  %v2645_v44 = vadd.f32 %v233_v31, %v131_v6 }
  0xac   :  { %3516 = vst [vmem:[#allocation46_spill] sm:$0xff] %v2638_v56 }
  0xad   :  { %3517 = vst [vmem:[#allocation47_spill] sm:$0xff] %v2641_v54 }
  0xae   :  { %3518 = vst [vmem:[#allocation48_spill] sm:$0xff] %v2643_v0 }
  0xaf   :  { %3519 = vst [vmem:[#allocation49_spill] sm:$0xff] %v2645_v44 }
  0xb1   :  { %v274_v2 = vpop.f32.mrf.mxu2  ;;  %v315_v53 = vpop.f32.mrf.mxu3 }
  0xb2   :  { %v2648_v55 = vadd.f32 %v274_v2, %v2613_v57  ;;  %v2651_v61 = vadd.f32 %v315_v53, %v2615_v3  ;;  %v195_v59 = vpop.f32.mrf.mxu0  ;;  %v236_v60 = vpop.f32.mrf.mxu1 }
  0xb3   :  { %v2653_v56 = vadd.f32 %v195_v59, %v130_v4  ;;  %v2655_v51 = vadd.f32 %v236_v60, %v131_v6 }
  0xb4   :  { %3520 = vst [vmem:[#allocation50_spill] sm:$0xff] %v2648_v55 }
  0xb5   :  { %3521 = vst [vmem:[#allocation51_spill] sm:$0xff] %v2651_v61 }
  0xb6   :  { %3522 = vst [vmem:[#allocation52_spill] sm:$0xff] %v2653_v56  ;;  %v222_v56 = vadd.f32 %v221_v1, %v131_v6 }
  0xb7   :  { %3523 = vst [vmem:[#allocation53_spill] sm:$0xff] %v2655_v51 }
  0xb9   :  { %v277_v54 = vpop.f32.mrf.mxu2  ;;  %v318_v58 = vpop.f32.mrf.mxu3 }
  0xba   :  { %v2658_v18 = vadd.f32 %v277_v54, %v2613_v57  ;;  %v2661_v31 = vadd.f32 %v318_v58, %v2615_v3  ;;  %v198_v44 = vpop.f32.mrf.mxu0  ;;  %v239_v2 = vpop.f32.mrf.mxu1 }
  0xbb   :  { %v2663_v55 = vadd.f32 %v198_v44, %v130_v4  ;;  %v2665_v53 = vadd.f32 %v239_v2, %v131_v6 }
  0xbc   :  { %3524 = vst [vmem:[#allocation54_spill] sm:$0xff] %v2658_v18 }
  0xbd   :  { %3525 = vst [vmem:[#allocation55_spill] sm:$0xff] %v2661_v31  ;;  %v181_v31 = vadd.f32 %v180_v63, %v130_v4 }
  0xbe   :  { %3526 = vst [vmem:[#allocation56_spill] sm:$0xff] %v2663_v55 }
  0xbf   :  { %3527 = vst [vmem:[#allocation57_spill] sm:$0xff] %v2665_v53 }
  0xc1   :  { %v280_v61 = vpop.f32.mrf.mxu2  ;;  %v321_v0 = vpop.f32.mrf.mxu3 }
  0xc2   :  { %v2668_v59 = vadd.f32 %v280_v61, %v2613_v57  ;;  %v2671_v60 = vadd.f32 %v321_v0, %v2615_v3  ;;  %v201_v51 = vpop.f32.mrf.mxu0  ;;  %v242_v54 = vpop.f32.mrf.mxu1 }
  0xc3   :  { %v2673_v18 = vadd.f32 %v201_v51, %v130_v4  ;;  %v2675_v58 = vadd.f32 %v242_v54, %v131_v6  ;;  %v263_v51 = vadd.f32 %v2605_v62, %v2613_v57 }
  0xc4   :  { %3528 = vst [vmem:[#allocation58_spill] sm:$0xff] %v2668_v59 }
  0xc5   :  { %3529 = vst [vmem:[#allocation59_spill] sm:$0xff] %v2671_v60 }
  0xc6   :  { %3530 = vst [vmem:[#allocation60_spill] sm:$0xff] %v2673_v18 }
  0xc7   :  { %3531 = vst [vmem:[#allocation61_spill] sm:$0xff] %v2675_v58 }
  0xc9   :  { %v283_v44 = vpop.f32.mrf.mxu2  ;;  %v324_v55 = vpop.f32.mrf.mxu3 }
  0xca   :  { %v2678_v2 = vadd.f32 %v283_v44, %v2613_v57  ;;  %v2681_v53 = vadd.f32 %v324_v55, %v2615_v3  ;;  %v344_v61 = vpop.f32.mrf.mxu0  ;;  %v364_v59 = vpop.f32.mrf.mxu1 }
  0xcb   :  { %v407_v0 = vadd.f32 %v344_v61, %v181_v31  ;;  %v408_v60 = vadd.f32 %v364_v59, %v222_v56  ;;  %v304_v56 = vadd.f32 %v2607_v5, %v2615_v3 }
  0xcc   :  { %3532 = vst [vmem:[#allocation62_spill] sm:$0xff] %v2678_v2 }
  0xcd   :  { %3533 = vst [vmem:[#allocation63_spill] sm:$0xff] %v2681_v53  ;;  %v1835_v50 = vmul.f32 -1.442695, %v407_v0  ;;  %v1836_v49 = vmul.f32 -1.442695, %v408_v60 }
  0xcf   :  { %1871 = vpow2.f32 %v1835_v50 }
  0xd0   :  { %1873 = vpow2.f32 %v1836_v49 }
  0xd1   :  { %v384_v63 = vpop.f32.mrf.mxu2  ;;  %v404_v53 = vpop.f32.mrf.mxu3 }
  0xd2   :  { %v409_v1 = vadd.f32 %v384_v63, %v263_v51  ;;  %v410_v60 = vadd.f32 %v404_v53, %v304_v56 }
  0xd4   :  { %v1837_v4 = vmul.f32 -1.442695, %v409_v1 }
  0xd5   :  { %v1872_v6 = vpop.eup %1871 }
  0xd6   :  { %v1874_v54 = vpop.eup %1873  ;;  %v420_v44 = vadd.f32 1.0, %v1872_v6  ;;  %1875 = vpow2.f32 %v1837_v4 }
  0xd7   :  { %v421_v55 = vadd.f32 1.0, %v1874_v54 }
  0xd8   :  { %1877 = vrcp.f32 %v420_v44  ;;  %v434_v51 = vand.u32 2147483648, %v420_v44  ;;  %v432_v4 = vand.u32 2147483647, %v420_v44  ;;  %vm428_vm3 = vweird.f32 %v420_v44 }
  0xd9   :  { %1879 = vrcp.f32 %v421_v55  ;;  %v449_v63 = vand.u32 2147483648, %v421_v55  ;;  %v447_v54 = vand.u32 2147483647, %v421_v55  ;;  %vm443_vm4 = vweird.f32 %v421_v55 }
  0xda   :  { %v435_v53 = vor.u32 1.1754944e-38, %v434_v51  ;;  %vm433_vm6 = vcmp.eq.f32.partialorder %v432_v4, 8.507059e+37 }
  0xdb   :  { %v450_v56 = vor.u32 1.1754944e-38, %v449_v63  ;;  %vm448_vm8 = vcmp.eq.f32.partialorder %v447_v54, 8.507059e+37 }
  0xdc   :  { %v1876_v31 = vpop.eup %1875 }
  0xdd   :  { %v422_v50 = vadd.f32 1.0, %v1876_v31 }
  0xde   :  { %v1878_v59 = vpop.eup %1877 }
  0xdf   :  { %v1880_v62 = vpop.eup %1879  ;;  %v424_v49 = vmul.f32 %v1878_v59, %v420_v44  ;;  %1881 = vrcp.f32 %v422_v50  ;;  %vm429_vm1 = vweird.f32 %v1878_v59  ;;  %vm458_vm10 = vweird.f32 %v422_v50 }
  0xe0   :  { %v439_v57 = vmul.f32 %v1880_v62, %v421_v55  ;;  %1883 = vtanh.f32 %v410_v60  ;;  %vm444_vm2 = vweird.f32 %v1880_v62  ;;  %vm430_vm5 = vmor %vm428_vm3, %vm429_vm1  ;;  %v464_v55 = vand.u32 2147483648, %v422_v50 }
  0xe1   :  { %v425_v61 = vsub.f32 1.0, %v424_v49  ;;  %vm445_vm7 = vmor %vm443_vm4, %vm444_vm2 }
  0xe2   :  { %v440_v0 = vsub.f32 1.0, %v439_v57  ;;  %v465_v63 = vor.u32 1.1754944e-38, %v464_v55 }
  0xe3   :  { %v426_v1 = vmul.f32 %v1878_v59, %v425_v61 }
  0xe4   :  { %v441_v6 = vmul.f32 %v1880_v62, %v440_v0 }
  0xe5   :  { %v1882_v2 = vpop.eup %1881  ;;  %v427_v3 = vadd.f32 %v1878_v59, %v426_v1 }
  0xe6   :  { %v454_v5 = vmul.f32 %v1882_v2, %v422_v50  ;;  %v442_v31 = vadd.f32 %v1880_v62, %v441_v6  ;;  %v1884_v60 = vpop.eup %1883  ;;  %vm459_vm9 = vweird.f32 %v1882_v2 }
  0xe7   :  { %v431_v49 = vsel %vm430_vm5, %v1878_v59, %v427_v3  ;;  %v462_v59 = vand.u32 2147483647, %v422_v50  ;;  %vm460_vm11 = vmor %vm458_vm10, %vm459_vm9 }
  0xe8   :  { %v455_v57 = vsub.f32 1.0, %v454_v5  ;;  %v436_v61 = vsel %vm433_vm6, %v435_v53, %v431_v49  ;;  %v446_v58 = vsel %vm445_vm7, %v1880_v62, %v442_v31  ;;  %v3564_v31 = vld [vmem:[#allocation39_spill] sm:$0xff] }
  0xe9   :  { %v451_v0 = vsel %vm448_vm8, %v450_v56, %v446_v58  ;;  %v470_v18 = vmul.f32 %v1884_v60, %v436_v61  ;;  %vm463_vm12 = vcmp.eq.f32.partialorder %v462_v59, 8.507059e+37  ;;  %v2693_v58 = vld [vmem:[%s3380_s4] ss:$0 sm:$0xff] }
  0xea   :  { %v456_v52 = vmul.f32 %v1882_v2, %v455_v57  ;;  %v469_v47 = vmul.f32 0.0, %v451_v0 }
  0xec   :  { %v2687_v1 = vadd.f32 %v470_v18, %v469_v47  ;;  %v457_v44 = vadd.f32 %v1882_v2, %v456_v52 }
  0xee   :  { %1885 = vtanh.f32 %v2687_v1  ;;  %v461_v51 = vsel %vm460_vm11, %v1882_v2, %v457_v44 }
  0xef   :  { %v466_v4 = vsel %vm463_vm12, %v465_v63, %v461_v51 }
  0xf4   :  { %v1886_v62 = vpop.eup %1885 }
  0xf5   :  { %v2695_v47 = vmul.f32 %v1886_v62, %v466_v4 }
  0xf7   :  { %3534 = vst [vmem:[#allocation64_spill] sm:$0xff] %v2695_v47  ;;  %521 = vmatmul.f32.vlgmr.msra.gmra.mxu0 %v2695_v47  ;;  %541 = vmatmul.f32.vlgmr.msra.gmra.mxu1 %v2695_v47  ;;  %v477_v52 = vmul.f32 %v2693_v58, %v2695_v47 }
  0xf8   :  { %561 = vmatmul.f32.vlgmr.msra.gmra.mxu2 %v2695_v47  ;;  %581 = vmatmul.f32.vlgmr.msra.gmra.mxu3 %v2695_v47  ;;  %v2951_v47 = vld [vmem:[#allocation4 + $0x20] sm:$0xff] }
  0xf9   :  { %478 = vadd.xlane.f32.xlu0 %v477_v52  ;;  %851 = vmatpush.msra.mxu0 %v2229_v7  ;;  %v3535_v7 = vld [vmem:[#allocation10_spill] sm:$0xff] }
  0xfa   :  { %871 = vmatpush.msra.mxu1 %v2231_v8  ;;  %891 = vmatpush.msra.mxu2 %v2235_v9  ;;  %v3536_v8 = vld [vmem:[#allocation14_spill] sm:$0xff]  ;;  %v3537_v9 = vld [vmem:[#allocation11_spill] sm:$0xff] }
  0xfb   :  { %911 = vmatpush.msra.mxu3 %v2252_v15  ;;  %852 = vmatpush.msra.mxu0 %v2239_v10  ;;  %v3538_v10 = vld [vmem:[#allocation12_spill] sm:$0xff]  ;;  %v3543_v15 = vld [vmem:[#allocation18_spill] sm:$0xff] }
  0xfc   :  { %872 = vmatpush.msra.mxu1 %v2241_v11  ;;  %892 = vmatpush.msra.mxu2 %v2245_v12  ;;  %v3539_v11 = vld [vmem:[#allocation13_spill] sm:$0xff] }
  0xfd   :  { %912 = vmatpush.msra.mxu3 %v2258_v17  ;;  %853 = vmatpush.msra.mxu0 %v2248_v13  ;;  %v3540_v12 = vld [vmem:[#allocation17_spill] sm:$0xff]  ;;  %v3541_v13 = vld [vmem:[#allocation15_spill] sm:$0xff] }
  0xfe   :  { %873 = vmatpush.msra.mxu1 %v2250_v14  ;;  %893 = vmatpush.msra.mxu2 %v2256_v16  ;;  %v3542_v14 = vld [vmem:[#allocation16_spill] sm:$0xff]  ;;  %v3544_v16 = vld [vmem:[#allocation21_spill] sm:$0xff]  ;;  %v3545_v17 = vld [vmem:[#allocation19_spill] sm:$0xff] }
  0xff   :  { %913 = vmatpush.msra.mxu3 %v2277_v22  ;;  %854 = vmatpush.msra.mxu0 %v2267_v19  ;;  %v3546_v19 = vld [vmem:[#allocation20_spill] sm:$0xff]  ;;  %v3549_v22 = vld [vmem:[#allocation23_spill] sm:$0xff] }
 0x100   :  { %874 = vmatpush.msra.mxu1 %v2269_v20  ;;  %894 = vmatpush.msra.mxu2 %v2275_v21  ;;  %v3547_v20 = vld [vmem:[#allocation22_spill] sm:$0xff]  ;;  %v3548_v21 = vld [vmem:[#allocation25_spill] sm:$0xff] }
 0x101   :  { %914 = vmatpush.msra.mxu3 %v2289_v26  ;;  %855 = vmatpush.msra.mxu0 %v2281_v23  ;;  %v3550_v23 = vld [vmem:[#allocation24_spill] sm:$0xff]  ;;  %v3553_v26 = vld [vmem:[#allocation27_spill] sm:$0xff] }
 0x102   :  { %875 = vmatpush.msra.mxu1 %v2283_v24  ;;  %895 = vmatpush.msra.mxu2 %v2287_v25  ;;  %v3551_v24 = vld [vmem:[#allocation26_spill] sm:$0xff]  ;;  %v3552_v25 = vld [vmem:[#allocation29_spill] sm:$0xff] }
 0x103   :  { %915 = vmatpush.msra.mxu3 %v2301_v30  ;;  %856 = vmatpush.msra.mxu0 %v2292_v27  ;;  %v3554_v27 = vld [vmem:[#allocation28_spill] sm:$0xff] }
 0x104   :  { %876 = vmatpush.msra.mxu1 %v2294_v28  ;;  %896 = vmatpush.msra.mxu2 %v2299_v29  ;;  %v3555_v28 = vld [vmem:[#allocation30_spill] sm:$0xff]  ;;  %v3556_v29 = vld [vmem:[#allocation31_spill] sm:$0xff]  ;;  %v3557_v30 = vld [vmem:[#allocation32_spill] sm:$0xff] }
 0x105   :  { %916 = vmatpush.msra.mxu3 %v2320_v35  ;;  %857 = vmatpush.msra.mxu0 %v2310_v32  ;;  %v3558_v32 = vld [vmem:[#allocation33_spill] sm:$0xff]  ;;  %3585 = vst [vmem:[#allocation30_spill] sm:$0xff] %v2951_v47 }
 0x106   :  { %877 = vmatpush.msra.mxu1 %v2312_v33  ;;  %897 = vmatpush.msra.mxu2 %v2318_v34  ;;  %v3559_v33 = vld [vmem:[#allocation34_spill] sm:$0xff]  ;;  %v3560_v34 = vld [vmem:[#allocation35_spill] sm:$0xff] }
 0x107   :  { %917 = vmatpush.msra.mxu3 %v2332_v39  ;;  %858 = vmatpush.msra.mxu0 %v2324_v36  ;;  %v3562_v39 = vld [vmem:[#allocation37_spill] sm:$0xff] }
 0x108   :  { %878 = vmatpush.msra.mxu1 %v2326_v37  ;;  %898 = vmatpush.msra.mxu2 %v2330_v38  ;;  %v3561_v37 = vld [vmem:[#allocation36_spill] sm:$0xff] }
 0x109   :  { %918 = vmatpush.msra.mxu3 %v2344_v43  ;;  %859 = vmatpush.msra.mxu0 %v2335_v40 }
 0x10a   :  { %879 = vmatpush.msra.mxu1 %v2337_v41  ;;  %899 = vmatpush.msra.mxu2 %v2342_v42 }
 0x10b   :  { %919 = vmatpush.msra.mxu3 %v2363_v48  ;;  %860 = vmatpush.msra.mxu0 %v2353_v45  ;;  %v3563_v45 = vld [vmem:[#allocation38_spill] sm:$0xff] }
 0x10c   :  { %880 = vmatpush.msra.mxu1 %v2355_v46  ;;  %900 = vmatpush.msra.mxu2 %v3535_v7 }
 0x10d   :  { %920 = vmatpush.msra.mxu3 %v3536_v8  ;;  %861 = vmatpush.msra.mxu0 %v3537_v9 }
 0x10e   :  { %881 = vmatpush.msra.mxu1 %v3538_v10  ;;  %901 = vmatpush.msra.mxu2 %v3539_v11 }
 0x10f   :  { %921 = vmatpush.msra.mxu3 %v3540_v12  ;;  %862 = vmatpush.msra.mxu0 %v3541_v13 }
 0x110   :  { %882 = vmatpush.msra.mxu1 %v3542_v14  ;;  %902 = vmatpush.msra.mxu2 %v3543_v15 }
 0x111   :  { %922 = vmatpush.msra.mxu3 %v3544_v16  ;;  %863 = vmatpush.msra.mxu0 %v3545_v17 }
 0x112   :  { %883 = vmatpush.msra.mxu1 %v3546_v19  ;;  %903 = vmatpush.msra.mxu2 %v3547_v20 }
 0x113   :  { %923 = vmatpush.msra.mxu3 %v3548_v21  ;;  %864 = vmatpush.msra.mxu0 %v3549_v22 }
 0x114   :  { %884 = vmatpush.msra.mxu1 %v3550_v23  ;;  %904 = vmatpush.msra.mxu2 %v3551_v24 }
 0x115   :  { %924 = vmatpush.msra.mxu3 %v3552_v25  ;;  %865 = vmatpush.msra.mxu0 %v3553_v26 }
 0x116   :  { %885 = vmatpush.msra.mxu1 %v3554_v27  ;;  %905 = vmatpush.msra.mxu2 %v3555_v28 }
 0x117   :  { %925 = vmatpush.msra.mxu3 %v3556_v29  ;;  %866 = vmatpush.msra.mxu0 %v3557_v30 }
 0x118   :  { %886 = vmatpush.msra.mxu1 %v3558_v32  ;;  %906 = vmatpush.msra.mxu2 %v3559_v33 }
 0x119   :  { %926 = vmatpush.msra.mxu3 %v3560_v34 }
 0x174   :  { %v522_v35 = vpop.f32.mrf.mxu0  ;;  %v542_v36 = vpop.f32.mrf.mxu1 }
 0x175   :  { %v585_v38 = vadd.f32 %v522_v35, %v3561_v37  ;;  %v586_v40 = vadd.f32 %v542_v36, %v3562_v39  ;;  %v2783_v36 = vld [vmem:[#allocation4 + $0x1e0] sm:$0xff]  ;;  %v2786_v37 = vld [vmem:[#allocation4 + $0x1e8] sm:$0xff]  ;;  %v2792_v39 = vld [vmem:[#allocation4 + $0x1f8] sm:$0xff] }
 0x177   :  { %v1838_v41 = vmul.f32 -1.442695, %v585_v38  ;;  %v1839_v42 = vmul.f32 -1.442695, %v586_v40  ;;  %v2789_v38 = vld [vmem:[#allocation4 + $0x1f0] sm:$0xff]  ;;  %v2795_v40 = vld [vmem:[#allocation4 + $0x1c0] sm:$0xff] }
 0x179   :  { %1887 = vpow2.f32 %v1838_v41  ;;  %v2798_v41 = vld [vmem:[#allocation4 + $0x1c8] sm:$0xff] }
 0x17a   :  { %1889 = vpow2.f32 %v1839_v42  ;;  %v2801_v42 = vld [vmem:[#allocation4 + $0x1d0] sm:$0xff] }
 0x17b   :  { %v562_v43 = vpop.f32.mrf.mxu2  ;;  %v582_v54 = vpop.f32.mrf.mxu3 }
 0x17c   :  { %v587_v46 = vadd.f32 %v562_v43, %v3563_v45  ;;  %v588_v56 = vadd.f32 %v582_v54, %v3564_v31  ;;  %v2804_v43 = vld [vmem:[#allocation4 + $0x1d8] sm:$0xff]  ;;  %v2807_v45 = vld [vmem:[#allocation4 + $0x1a0] sm:$0xff] }
 0x17d   :  { %v2828_v54 = vld [vmem:[#allocation4 + $0x198] sm:$0xff] }
 0x17e   :  { %v1840_v48 = vmul.f32 -1.442695, %v587_v46  ;;  %v2810_v46 = vld [vmem:[#allocation4 + $0x1a8] sm:$0xff]  ;;  %v2840_v31 = vld [vmem:[#allocation4 + $0x178] sm:$0xff] }
 0x17f   :  { %v1888_v18 = vpop.eup %1887 }
 0x180   :  { %v1890_v2 = vpop.eup %1889  ;;  %v598_v50 = vadd.f32 1.0, %v1888_v18  ;;  %1891 = vpow2.f32 %v1840_v48  ;;  %v2813_v48 = vld [vmem:[#allocation4 + $0x1b0] sm:$0xff]  ;;  %v2816_v18 = vld [vmem:[#allocation4 + $0x1b8] sm:$0xff] }
 0x181   :  { %v599_v6 = vadd.f32 1.0, %v1890_v2  ;;  %v2819_v2 = vld [vmem:[#allocation4 + $0x180] sm:$0xff] }
 0x182   :  { %1893 = vrcp.f32 %v598_v50  ;;  %v612_v44 = vand.u32 2147483648, %v598_v50  ;;  %v610_v51 = vand.u32 2147483647, %v598_v50  ;;  %vm606_vm15 = vweird.f32 %v598_v50 }
 0x183   :  { %1895 = vrcp.f32 %v599_v6  ;;  %v627_v55 = vand.u32 2147483648, %v599_v6  ;;  %v625_v62 = vand.u32 2147483647, %v599_v6  ;;  %vm621_vm0 = vweird.f32 %v599_v6 }
 0x184   :  { %v613_v8 = vor.u32 1.1754944e-38, %v612_v44  ;;  %vm611_vm3 = vcmp.eq.f32.partialorder %v610_v51, 8.507059e+37  ;;  %v2861_v44 = vld [vmem:[#allocation4 + $0x130] sm:$0xff]  ;;  %v2870_v51 = vld [vmem:[#allocation4 + $0x108] sm:$0xff] }
 0x185   :  { %v628_v10 = vor.u32 1.1754944e-38, %v627_v55  ;;  %vm626_vm4 = vcmp.eq.f32.partialorder %v625_v62, 8.507059e+37  ;;  %v2864_v55 = vld [vmem:[#allocation4 + $0x138] sm:$0xff] }
 0x186   :  { %v1892_v3 = vpop.eup %1891  ;;  %v2876_v62 = vld [vmem:[#allocation4 + $0x118] sm:$0xff] }
 0x187   :  { %v600_v5 = vadd.f32 1.0, %v1892_v3  ;;  %v2831_v3 = vld [vmem:[#allocation4 + $0x160] sm:$0xff] }
 0x188   :  { %v1894_v53 = vpop.eup %1893 }
 0x189   :  { %v1896_v49 = vpop.eup %1895  ;;  %v602_v60 = vmul.f32 %v1894_v53, %v598_v50  ;;  %1897 = vrcp.f32 %v600_v5  ;;  %vm607_vm13 = vweird.f32 %v1894_v53  ;;  %v642_v23 = vand.u32 2147483648, %v600_v5  ;;  %v2822_v50 = vld [vmem:[#allocation4 + $0x188] sm:$0xff] }
 0x18a   :  { %v617_v57 = vmul.f32 %v1896_v49, %v599_v6  ;;  %1899 = vtanh.f32 %v588_v56  ;;  %vm622_vm14 = vweird.f32 %v1896_v49  ;;  %vm608_vm1 = vmor %vm606_vm15, %vm607_vm13  ;;  %vm636_vm6 = vweird.f32 %v600_v5  ;;  %v2825_v6 = vld [vmem:[#allocation4 + $0x190] sm:$0xff]  ;;  %v2843_v56 = vld [vmem:[#allocation4 + $0x140] sm:$0xff] }
 0x18b   :  { %v603_v61 = vsub.f32 1.0, %v602_v60  ;;  %vm623_vm2 = vmor %vm621_vm0, %vm622_vm14  ;;  %v640_v24 = vand.u32 2147483647, %v600_v5  ;;  %v643_v26 = vor.u32 1.1754944e-38, %v642_v23  ;;  %v2849_v60 = vld [vmem:[#allocation4 + $0x150] sm:$0xff]  ;;  %v2927_v23 = vld [vmem:[#allocation4 + $0x60] sm:$0xff] }
 0x18c   :  { %v618_v0 = vsub.f32 1.0, %v617_v57  ;;  %v2852_v57 = vld [vmem:[#allocation4 + $0x158] sm:$0xff]  ;;  %3577 = vst [vmem:[#allocation22_spill] sm:$0xff] %v2927_v23 }
 0x18d   :  { %v604_v59 = vmul.f32 %v1894_v53, %v603_v61  ;;  %vm641_vm8 = vcmp.eq.f32.partialorder %v640_v24, 8.507059e+37  ;;  %v2855_v61 = vld [vmem:[#allocation4 + $0x120] sm:$0xff]  ;;  %v2930_v24 = vld [vmem:[#allocation4 + $0x68] sm:$0xff] }
 0x18e   :  { %v619_v63 = vmul.f32 %v1896_v49, %v618_v0  ;;  %v2858_v0 = vld [vmem:[#allocation4 + $0x128] sm:$0xff]  ;;  %3578 = vst [vmem:[#allocation25_spill] sm:$0xff] %v2930_v24 }
 0x18f   :  { %v1898_v4 = vpop.eup %1897  ;;  %v605_v52 = vadd.f32 %v1894_v53, %v604_v59  ;;  %v2867_v59 = vld [vmem:[#allocation4 + $0x100] sm:$0xff] }
 0x190   :  { %v632_v7 = vmul.f32 %v1898_v4, %v600_v5  ;;  %v620_v9 = vadd.f32 %v1896_v49, %v619_v63  ;;  %v1900_v12 = vpop.eup %1899  ;;  %vm637_vm5 = vweird.f32 %v1898_v4  ;;  %v2834_v5 = vld [vmem:[#allocation4 + $0x168] sm:$0xff]  ;;  %v2873_v63 = vld [vmem:[#allocation4 + $0x110] sm:$0xff] }
 0x191   :  { %v609_v11 = vsel %vm608_vm1, %v1894_v53, %v605_v52  ;;  %vm638_vm7 = vmor %vm636_vm6, %vm637_vm5  ;;  %v2837_v53 = vld [vmem:[#allocation4 + $0x170] sm:$0xff]  ;;  %v2882_v52 = vld [vmem:[#allocation4 + $0xe8] sm:$0xff] }
 0x192   :  { %v633_v13 = vsub.f32 1.0, %v632_v7  ;;  %v614_v14 = vsel %vm611_vm3, %v613_v8, %v609_v11  ;;  %v624_v15 = vsel %vm623_vm2, %v1896_v49, %v620_v9  ;;  %v2846_v49 = vld [vmem:[#allocation4 + $0x148] sm:$0xff]  ;;  %v2885_v7 = vld [vmem:[#allocation4 + $0xf0] sm:$0xff]  ;;  %v2888_v8 = vld [vmem:[#allocation4 + $0xf8] sm:$0xff] }
 0x193   :  { %v629_v16 = vsel %vm626_vm4, %v628_v10, %v624_v15  ;;  %v648_v17 = vmul.f32 %v1900_v12, %v614_v14  ;;  %v2891_v9 = vld [vmem:[#allocation4 + $0xc0] sm:$0xff]  ;;  %v2894_v10 = vld [vmem:[#allocation4 + $0xc8] sm:$0xff]  ;;  %v2897_v11 = vld [vmem:[#allocation4 + $0xd0] sm:$0xff] }
 0x194   :  { %v634_v19 = vmul.f32 %v1898_v4, %v633_v13  ;;  %v647_v20 = vmul.f32 %v629_v16, %v2687_v1  ;;  %3566 = vst [vmem:[#allocation14_spill] sm:$0xff] %v2894_v10  ;;  %v2900_v12 = vld [vmem:[#allocation4 + $0xd8] sm:$0xff]  ;;  %v2903_v13 = vld [vmem:[#allocation4 + $0xa0] sm:$0xff]  ;;  %v2906_v14 = vld [vmem:[#allocation4 + $0xa8] sm:$0xff] }
 0x195   :  { %3567 = vst [vmem:[#allocation11_spill] sm:$0xff] %v2897_v11  ;;  %v2909_v15 = vld [vmem:[#allocation4 + $0xb0] sm:$0xff]  ;;  %v2912_v16 = vld [vmem:[#allocation4 + $0xb8] sm:$0xff] }
 0x196   :  { %v2772_v21 = vadd.f32 %v648_v17, %v647_v20  ;;  %v635_v22 = vadd.f32 %v1898_v4, %v634_v19  ;;  %3568 = vst [vmem:[#allocation12_spill] sm:$0xff] %v2900_v12  ;;  %v2915_v17 = vld [vmem:[#allocation4 + $0x80] sm:$0xff]  ;;  %v2918_v19 = vld [vmem:[#allocation4 + $0x88] sm:$0xff]  ;;  %v2921_v20 = vld [vmem:[#allocation4 + $0x90] sm:$0xff] }
 0x197   :  { %3569 = vst [vmem:[#allocation13_spill] sm:$0xff] %v2903_v13 }
 0x198   :  { %1901 = vtanh.f32 %v2772_v21  ;;  %v639_v25 = vsel %vm638_vm7, %v1898_v4, %v635_v22  ;;  %v2879_v4 = vld [vmem:[#allocation4 + $0xe0] sm:$0xff]  ;;  %3570 = vst [vmem:[#allocation17_spill] sm:$0xff] %v2906_v14  ;;  %v2924_v22 = vld [vmem:[#allocation4 + $0x98] sm:$0xff] }
 0x199   :  { %v644_v28 = vsel %vm641_vm8, %v643_v26, %v639_v25  ;;  %3571 = vst [vmem:[#allocation15_spill] sm:$0xff] %v2909_v15  ;;  %v2933_v25 = vld [vmem:[#allocation4 + $0x70] sm:$0xff]  ;;  %v2936_v26 = vld [vmem:[#allocation4 + $0x78] sm:$0xff] }
 0x19a   :  { %3572 = vst [vmem:[#allocation16_spill] sm:$0xff] %v2912_v16 }
 0x19b   :  { %3573 = vst [vmem:[#allocation18_spill] sm:$0xff] %v2915_v17 }
 0x19c   :  { %3574 = vst [vmem:[#allocation21_spill] sm:$0xff] %v2918_v19 }
 0x19d   :  { %3575 = vst [vmem:[#allocation19_spill] sm:$0xff] %v2921_v20 }
 0x19e   :  { %v1902_v27 = vpop.eup %1901  ;;  %3576 = vst [vmem:[#allocation20_spill] sm:$0xff] %v2924_v22 }
 0x19f   :  { %v2775_v35 = vmul.f32 %v1902_v27, %v644_v28  ;;  %3579 = vst [vmem:[#allocation23_spill] sm:$0xff] %v2933_v25  ;;  %v2939_v27 = vld [vmem:[#allocation4 + $0x40] sm:$0xff]  ;;  %v2942_v28 = vld [vmem:[#allocation4 + $0x48] sm:$0xff] }
 0x1a0   :  { %3580 = vst [vmem:[#allocation24_spill] sm:$0xff] %v2936_v26 }
 0x1a1   :  { %3565 = vst [vmem:[#allocation10_spill] sm:$0xff] %v2775_v35  ;;  %694 = vmatmul.f32.vlgmr.msrb.gmra.mxu0 %v2775_v35  ;;  %714 = vmatmul.f32.vlgmr.msrb.gmra.mxu1 %v2775_v35  ;;  %v652_v1 = vmul.f32 %v2693_v58, %v2775_v35 }
 0x1a2   :  { %734 = vmatmul.f32.vlgmr.msrb.gmra.mxu2 %v2775_v35  ;;  %754 = vmatmul.f32.vlgmr.msrb.gmra.mxu3 %v2775_v35  ;;  %3581 = vst [vmem:[#allocation26_spill] sm:$0xff] %v2939_v27  ;;  %v2948_v35 = vld [vmem:[#allocation4 + $0x58] sm:$0xff] }
 0x1a3   :  { %653 = vadd.xlane.f32.xlu0 %v652_v1  ;;  %1024 = vmatpush.msrb.mxu0 %v2783_v36  ;;  %3582 = vst [vmem:[#allocation29_spill] sm:$0xff] %v2942_v28  ;;  %v2945_v1 = vld [vmem:[#allocation4 + $0x50] sm:$0xff] }
 0x1a4   :  { %1044 = vmatpush.msrb.mxu1 %v2786_v37  ;;  %1064 = vmatpush.msrb.mxu2 %v2789_v38  ;;  %3583 = vst [vmem:[#allocation27_spill] sm:$0xff] %v2945_v1 }
 0x1a5   :  { %1084 = vmatpush.msrb.mxu3 %v2792_v39  ;;  %1025 = vmatpush.msrb.mxu0 %v2795_v40  ;;  %3584 = vst [vmem:[#allocation28_spill] sm:$0xff] %v2948_v35 }
 0x1a6   :  { %1045 = vmatpush.msrb.mxu1 %v2798_v41  ;;  %1065 = vmatpush.msrb.mxu2 %v2801_v42 }
 0x1a7   :  { %1085 = vmatpush.msrb.mxu3 %v2804_v43  ;;  %1026 = vmatpush.msrb.mxu0 %v2807_v45 }
 0x1a8   :  { %1046 = vmatpush.msrb.mxu1 %v2810_v46  ;;  %1066 = vmatpush.msrb.mxu2 %v2813_v48 }
 0x1a9   :  { %1086 = vmatpush.msrb.mxu3 %v2816_v18  ;;  %1027 = vmatpush.msrb.mxu0 %v2819_v2 }
 0x1aa   :  { %1047 = vmatpush.msrb.mxu1 %v2822_v50  ;;  %1067 = vmatpush.msrb.mxu2 %v2825_v6 }
 0x1ab   :  { %1087 = vmatpush.msrb.mxu3 %v2828_v54  ;;  %1028 = vmatpush.msrb.mxu0 %v2831_v3 }
 0x1ac   :  { %1048 = vmatpush.msrb.mxu1 %v2834_v5  ;;  %1068 = vmatpush.msrb.mxu2 %v2837_v53 }
 0x1ad   :  { %1088 = vmatpush.msrb.mxu3 %v2840_v31  ;;  %1029 = vmatpush.msrb.mxu0 %v2843_v56 }
 0x1ae   :  { %1049 = vmatpush.msrb.mxu1 %v2846_v49  ;;  %1069 = vmatpush.msrb.mxu2 %v2849_v60 }
 0x1af   :  { %1089 = vmatpush.msrb.mxu3 %v2852_v57  ;;  %1030 = vmatpush.msrb.mxu0 %v2855_v61 }
 0x1b0   :  { %1050 = vmatpush.msrb.mxu1 %v2858_v0  ;;  %1070 = vmatpush.msrb.mxu2 %v2861_v44 }
 0x1b1   :  { %1090 = vmatpush.msrb.mxu3 %v2864_v55  ;;  %1031 = vmatpush.msrb.mxu0 %v2867_v59 }
 0x1b2   :  { %1051 = vmatpush.msrb.mxu1 %v2870_v51  ;;  %1071 = vmatpush.msrb.mxu2 %v2873_v63 }
 0x1b3   :  { %1091 = vmatpush.msrb.mxu3 %v2876_v62  ;;  %1032 = vmatpush.msrb.mxu0 %v2879_v4 }
 0x1b4   :  { %1052 = vmatpush.msrb.mxu1 %v2882_v52  ;;  %1072 = vmatpush.msrb.mxu2 %v2885_v7 }
 0x1b5   :  { %1092 = vmatpush.msrb.mxu3 %v2888_v8  ;;  %1033 = vmatpush.msrb.mxu0 %v2891_v9 }
 0x1b6   :  { %1053 = vmatpush.msrb.mxu1 %v2894_v10  ;;  %1073 = vmatpush.msrb.mxu2 %v2897_v11 }
 0x1b7   :  { %1093 = vmatpush.msrb.mxu3 %v2900_v12  ;;  %1034 = vmatpush.msrb.mxu0 %v2903_v13 }
 0x1b8   :  { %1054 = vmatpush.msrb.mxu1 %v2906_v14  ;;  %1074 = vmatpush.msrb.mxu2 %v2909_v15 }
 0x1b9   :  { %1094 = vmatpush.msrb.mxu3 %v2912_v16  ;;  %1035 = vmatpush.msrb.mxu0 %v2915_v17 }
 0x1ba   :  { %1055 = vmatpush.msrb.mxu1 %v2918_v19  ;;  %1075 = vmatpush.msrb.mxu2 %v2921_v20 }
 0x1bb   :  { %1095 = vmatpush.msrb.mxu3 %v2924_v22  ;;  %1036 = vmatpush.msrb.mxu0 %v2927_v23 }
 0x1bc   :  { %1056 = vmatpush.msrb.mxu1 %v2930_v24  ;;  %1076 = vmatpush.msrb.mxu2 %v2933_v25  ;;  %v3589_v25 = vld [vmem:[#allocation41_spill] sm:$0xff] }
 0x1bd   :  { %1096 = vmatpush.msrb.mxu3 %v2936_v26  ;;  %1037 = vmatpush.msrb.mxu0 %v2939_v27  ;;  %v2954_v26 = vld [vmem:[#allocation4 + $0x28] sm:$0xff]  ;;  %v2957_v27 = vld [vmem:[#allocation4 + $0x30] sm:$0xff] }
 0x1be   :  { %1057 = vmatpush.msrb.mxu1 %v2942_v28  ;;  %1077 = vmatpush.msrb.mxu2 %v2945_v1  ;;  %3586 = vst [vmem:[#allocation31_spill] sm:$0xff] %v2954_v26  ;;  %v3588_v1 = vld [vmem:[#allocation40_spill] sm:$0xff] }
 0x1bf   :  { %1097 = vmatpush.msrb.mxu3 %v2948_v35  ;;  %1038 = vmatpush.msrb.mxu0 %v2951_v47  ;;  %3587 = vst [vmem:[#allocation32_spill] sm:$0xff] %v2957_v27 }
 0x1c0   :  { %1058 = vmatpush.msrb.mxu1 %v2954_v26  ;;  %1078 = vmatpush.msrb.mxu2 %v2957_v27 }
 0x1c1   :  { %1098 = vmatpush.msrb.mxu3 %v3556_v29  ;;  %1039 = vmatpush.msrb.mxu0 %v3557_v30  ;;  %v3590_v29 = vld [vmem:[#allocation42_spill] sm:$0xff] }
 0x1c2   :  { %1059 = vmatpush.msrb.mxu1 %v3558_v32  ;;  %1079 = vmatpush.msrb.mxu2 %v3559_v33 }
 0x1c3   :  { %1099 = vmatpush.msrb.mxu3 %v3560_v34 }
 0x21e   :  { %v695_v35 = vpop.f32.mrf.mxu0  ;;  %v715_v47 = vpop.f32.mrf.mxu1 }
 0x21f   :  { %v758_v28 = vadd.f32 %v695_v35, %v3588_v1  ;;  %v759_v26 = vadd.f32 %v715_v47, %v3589_v25  ;;  %v3591_v47 = vld [vmem:[#allocation43_spill] sm:$0xff] }
 0x221   :  { %v1841_v24 = vmul.f32 -1.442695, %v758_v28  ;;  %v1842_v23 = vmul.f32 -1.442695, %v759_v26 }
 0x223   :  { %1903 = vpow2.f32 %v1841_v24 }
 0x224   :  { %1905 = vpow2.f32 %v1842_v23 }
 0x225   :  { %v735_v27 = vpop.f32.mrf.mxu2  ;;  %v755_v34 = vpop.f32.mrf.mxu3 }
 0x226   :  { %v760_v22 = vadd.f32 %v735_v27, %v3590_v29  ;;  %v761_v25 = vadd.f32 %v755_v34, %v3591_v47 }
 0x228   :  { %v1843_v30 = vmul.f32 -1.442695, %v760_v22 }
 0x229   :  { %v1904_v20 = vpop.eup %1903 }
 0x22a   :  { %v1906_v32 = vpop.eup %1905  ;;  %v771_v19 = vadd.f32 1.0, %v1904_v20  ;;  %1907 = vpow2.f32 %v1843_v30 }
 0x22b   :  { %v772_v33 = vadd.f32 1.0, %v1906_v32 }
 0x22c   :  { %1909 = vrcp.f32 %v771_v19  ;;  %v785_v22 = vand.u32 2147483648, %v771_v19  ;;  %v783_v30 = vand.u32 2147483647, %v771_v19  ;;  %vm779_vm11 = vweird.f32 %v771_v19 }
 0x22d   :  { %1911 = vrcp.f32 %v772_v33  ;;  %v800_v29 = vand.u32 2147483648, %v772_v33  ;;  %v798_v16 = vand.u32 2147483647, %v772_v33  ;;  %vm794_vm12 = vweird.f32 %v772_v33 }
 0x22e   :  { %v786_v47 = vor.u32 1.1754944e-38, %v785_v22  ;;  %vm784_vm15 = vcmp.eq.f32.partialorder %v783_v30, 8.507059e+37 }
 0x22f   :  { %vm799_vm0 = vcmp.eq.f32.partialorder %v798_v16, 8.507059e+37 }
 0x230   :  { %v1908_v17 = vpop.eup %1907 }
 0x231   :  { %v773_v35 = vadd.f32 1.0, %v1908_v17 }
 0x232   :  { %v1910_v1 = vpop.eup %1909 }
 0x233   :  { %v1912_v26 = vpop.eup %1911  ;;  %v775_v24 = vmul.f32 %v1910_v1, %v771_v19  ;;  %1913 = vrcp.f32 %v773_v35  ;;  %vm780_vm9 = vweird.f32 %v1910_v1  ;;  %v815_v22 = vand.u32 2147483648, %v773_v35 }
 0x234   :  { %v790_v23 = vmul.f32 %v1912_v26, %v772_v33  ;;  %1915 = vtanh.f32 %v761_v25  ;;  %vm795_vm10 = vweird.f32 %v1912_v26  ;;  %vm781_vm13 = vmor %vm779_vm11, %vm780_vm9  ;;  %vm809_vm2 = vweird.f32 %v773_v35 }
 0x235   :  { %v776_v28 = vsub.f32 1.0, %v775_v24  ;;  %vm796_vm14 = vmor %vm794_vm12, %vm795_vm10  ;;  %v801_v24 = vor.u32 1.1754944e-38, %v800_v29  ;;  %v816_v30 = vor.u32 1.1754944e-38, %v815_v22  ;;  %v3610_v22 = vld [vmem:[#allocation27_spill] sm:$0xff] }
 0x236   :  { %v791_v27 = vsub.f32 1.0, %v790_v23 }
 0x237   :  { %v777_v20 = vmul.f32 %v1910_v1, %v776_v28 }
 0x238   :  { %v792_v32 = vmul.f32 %v1912_v26, %v791_v27 }
 0x239   :  { %v1914_v15 = vpop.eup %1913  ;;  %v778_v17 = vadd.f32 %v1910_v1, %v777_v20 }
 0x23a   :  { %v805_v34 = vmul.f32 %v1914_v15, %v773_v35  ;;  %v793_v14 = vadd.f32 %v1912_v26, %v792_v32  ;;  %v1916_v25 = vpop.eup %1915  ;;  %vm810_vm1 = vweird.f32 %v1914_v15  ;;  %v3599_v32 = vld [vmem:[#allocation16_spill] sm:$0xff] }
 0x23b   :  { %v782_v23 = vsel %vm781_vm13, %v1910_v1, %v778_v17  ;;  %v813_v1 = vand.u32 2147483647, %v773_v35  ;;  %vm811_vm3 = vmor %vm809_vm2, %vm810_vm1  ;;  %v3597_v35 = vld [vmem:[#allocation17_spill] sm:$0xff]  ;;  %v3600_v17 = vld [vmem:[#allocation18_spill] sm:$0xff] }
 0x23c   :  { %v806_v13 = vsub.f32 1.0, %v805_v34  ;;  %v787_v28 = vsel %vm784_vm15, %v786_v47, %v782_v23  ;;  %v797_v12 = vsel %vm796_vm14, %v1912_v26, %v793_v14  ;;  %v3598_v26 = vld [vmem:[#allocation15_spill] sm:$0xff]  ;;  %v3601_v34 = vld [vmem:[#allocation21_spill] sm:$0xff]  ;;  %v3604_v23 = vld [vmem:[#allocation22_spill] sm:$0xff] }
 0x23d   :  { %v802_v27 = vsel %vm799_vm0, %v801_v24, %v797_v12  ;;  %v821_v11 = vmul.f32 %v1916_v25, %v787_v28  ;;  %vm814_vm4 = vcmp.eq.f32.partialorder %v813_v1, 8.507059e+37  ;;  %v3602_v47 = vld [vmem:[#allocation19_spill] sm:$0xff]  ;;  %v3603_v24 = vld [vmem:[#allocation20_spill] sm:$0xff]  ;;  %v3605_v25 = vld [vmem:[#allocation25_spill] sm:$0xff] }
 0x23e   :  { %v807_v10 = vmul.f32 %v1914_v15, %v806_v13  ;;  %v820_v20 = vmul.f32 %v802_v27, %v2772_v21  ;;  %v3595_v13 = vld [vmem:[#allocation12_spill] sm:$0xff]  ;;  %v3606_v28 = vld [vmem:[#allocation23_spill] sm:$0xff] }
 0x23f   :  { %v3607_v27 = vld [vmem:[#allocation24_spill] sm:$0xff] }
 0x240   :  { %v2970_v19 = vadd.f32 %v821_v11, %v820_v20  ;;  %v808_v33 = vadd.f32 %v1914_v15, %v807_v10  ;;  %v3593_v10 = vld [vmem:[#allocation14_spill] sm:$0xff]  ;;  %v3594_v11 = vld [vmem:[#allocation11_spill] sm:$0xff]  ;;  %v3611_v1 = vld [vmem:[#allocation28_spill] sm:$0xff] }
 0x241   :  { %v3608_v20 = vld [vmem:[#allocation26_spill] sm:$0xff] }
 0x242   :  { %1917 = vtanh.f32 %v2970_v19  ;;  %v812_v29 = vsel %vm811_vm3, %v1914_v15, %v808_v33  ;;  %v3596_v15 = vld [vmem:[#allocation13_spill] sm:$0xff] }
 0x243   :  { %v817_v16 = vsel %vm814_vm4, %v816_v30, %v812_v29  ;;  %v3609_v33 = vld [vmem:[#allocation29_spill] sm:$0xff]  ;;  %v3612_v29 = vld [vmem:[#allocation30_spill] sm:$0xff]  ;;  %v3613_v30 = vld [vmem:[#allocation31_spill] sm:$0xff] }
 0x248   :  { %v1918_v14 = vpop.eup %1917 }
 0x249   :  { %v2973_v12 = vmul.f32 %v1918_v14, %v817_v16  ;;  %v3614_v14 = vld [vmem:[#allocation32_spill] sm:$0xff] }
 0x24a   :  { %v3040_v16 = vld [vmem:[#allocation4 + $0x38] sm:$0xff] }
 0x24b   :  { %3592 = vst [vmem:[#allocation33_spill] sm:$0xff] %v2973_v12  ;;  %867 = vmatmul.f32.vlgmr.msra.gmra.mxu0 %v2973_v12  ;;  %887 = vmatmul.f32.vlgmr.msra.gmra.mxu1 %v2973_v12  ;;  %v825_v21 = vmul.f32 %v2693_v58, %v2973_v12 }
 0x24c   :  { %907 = vmatmul.f32.vlgmr.msra.gmra.mxu2 %v2973_v12  ;;  %927 = vmatmul.f32.vlgmr.msra.gmra.mxu3 %v2973_v12  ;;  %3615 = vst [vmem:[#allocation34_spill] sm:$0xff] %v3040_v16  ;;  %v3046_v12 = vld [vmem:[#allocation4 + $0x8] sm:$0xff] }
 0x24d   :  { %826 = vadd.xlane.f32.xlu1 %v825_v21  ;;  %1197 = vmatpush.msra.mxu0 %v2783_v36  ;;  %v3043_v21 = vld [vmem:[#allocation4] sm:$0xff]  ;;  %3617 = vst [vmem:[#allocation36_spill] sm:$0xff] %v3046_v12 }
 0x24e   :  { %1217 = vmatpush.msra.mxu1 %v2786_v37  ;;  %1237 = vmatpush.msra.mxu2 %v2789_v38  ;;  %3616 = vst [vmem:[#allocation35_spill] sm:$0xff] %v3043_v21 }
 0x24f   :  { %1257 = vmatpush.msra.mxu3 %v2792_v39  ;;  %1198 = vmatpush.msra.mxu0 %v2795_v40 }
 0x250   :  { %1218 = vmatpush.msra.mxu1 %v2798_v41  ;;  %1238 = vmatpush.msra.mxu2 %v2801_v42 }
 0x251   :  { %1258 = vmatpush.msra.mxu3 %v2804_v43  ;;  %1199 = vmatpush.msra.mxu0 %v2807_v45 }
 0x252   :  { %1219 = vmatpush.msra.mxu1 %v2810_v46  ;;  %1239 = vmatpush.msra.mxu2 %v2813_v48 }
 0x253   :  { %1259 = vmatpush.msra.mxu3 %v2816_v18  ;;  %1200 = vmatpush.msra.mxu0 %v2819_v2 }
 0x254   :  { %1220 = vmatpush.msra.mxu1 %v2822_v50  ;;  %1240 = vmatpush.msra.mxu2 %v2825_v6 }
 0x255   :  { %1260 = vmatpush.msra.mxu3 %v2828_v54  ;;  %1201 = vmatpush.msra.mxu0 %v2831_v3 }
 0x256   :  { %1221 = vmatpush.msra.mxu1 %v2834_v5  ;;  %1241 = vmatpush.msra.mxu2 %v2837_v53 }
 0x257   :  { %1261 = vmatpush.msra.mxu3 %v2840_v31  ;;  %1202 = vmatpush.msra.mxu0 %v2843_v56 }
 0x258   :  { %1222 = vmatpush.msra.mxu1 %v2846_v49  ;;  %1242 = vmatpush.msra.mxu2 %v2849_v60 }
 0x259   :  { %1262 = vmatpush.msra.mxu3 %v2852_v57  ;;  %1203 = vmatpush.msra.mxu0 %v2855_v61 }
 0x25a   :  { %1223 = vmatpush.msra.mxu1 %v2858_v0  ;;  %1243 = vmatpush.msra.mxu2 %v2861_v44 }
 0x25b   :  { %1263 = vmatpush.msra.mxu3 %v2864_v55  ;;  %1204 = vmatpush.msra.mxu0 %v2867_v59 }
 0x25c   :  { %1224 = vmatpush.msra.mxu1 %v2870_v51  ;;  %1244 = vmatpush.msra.mxu2 %v2873_v63 }
 0x25d   :  { %1264 = vmatpush.msra.mxu3 %v2876_v62  ;;  %1205 = vmatpush.msra.mxu0 %v2879_v4 }
 0x25e   :  { %1225 = vmatpush.msra.mxu1 %v2882_v52  ;;  %1245 = vmatpush.msra.mxu2 %v2885_v7 }
 0x25f   :  { %1265 = vmatpush.msra.mxu3 %v2888_v8  ;;  %1206 = vmatpush.msra.mxu0 %v2891_v9 }
 0x260   :  { %1226 = vmatpush.msra.mxu1 %v3593_v10  ;;  %1246 = vmatpush.msra.mxu2 %v3594_v11 }
 0x261   :  { %1266 = vmatpush.msra.mxu3 %v3595_v13  ;;  %1207 = vmatpush.msra.mxu0 %v3596_v15 }
 0x262   :  { %1227 = vmatpush.msra.mxu1 %v3597_v35  ;;  %1247 = vmatpush.msra.mxu2 %v3598_v26 }
 0x263   :  { %1267 = vmatpush.msra.mxu3 %v3599_v32  ;;  %1208 = vmatpush.msra.mxu0 %v3600_v17 }
 0x264   :  { %1228 = vmatpush.msra.mxu1 %v3601_v34  ;;  %1248 = vmatpush.msra.mxu2 %v3602_v47 }
 0x265   :  { %1268 = vmatpush.msra.mxu3 %v3603_v24  ;;  %1209 = vmatpush.msra.mxu0 %v3604_v23 }
 0x266   :  { %1229 = vmatpush.msra.mxu1 %v3605_v25  ;;  %1249 = vmatpush.msra.mxu2 %v3606_v28 }
 0x267   :  { %1269 = vmatpush.msra.mxu3 %v3607_v27  ;;  %1210 = vmatpush.msra.mxu0 %v3608_v20 }
 0x268   :  { %1230 = vmatpush.msra.mxu1 %v3609_v33  ;;  %1250 = vmatpush.msra.mxu2 %v3610_v22  ;;  %v3049_v22 = vld [vmem:[#allocation4 + $0x10] sm:$0xff]  ;;  %v3621_v33 = vld [vmem:[#allocation45_spill] sm:$0xff] }
 0x269   :  { %1270 = vmatpush.msra.mxu3 %v3611_v1  ;;  %1211 = vmatpush.msra.mxu0 %v3612_v29  ;;  %3618 = vst [vmem:[#allocation37_spill] sm:$0xff] %v3049_v22  ;;  %v3052_v29 = vld [vmem:[#allocation4 + $0x18] sm:$0xff] }
 0x26a   :  { %1231 = vmatpush.msra.mxu1 %v3613_v30  ;;  %1251 = vmatpush.msra.mxu2 %v3614_v14  ;;  %3619 = vst [vmem:[#allocation38_spill] sm:$0xff] %v3052_v29  ;;  %v3620_v1 = vld [vmem:[#allocation44_spill] sm:$0xff] }
 0x26b   :  { %1271 = vmatpush.msra.mxu3 %v3040_v16  ;;  %1212 = vmatpush.msra.mxu0 %v3043_v21 }
 0x26c   :  { %1232 = vmatpush.msra.mxu1 %v3046_v12  ;;  %1252 = vmatpush.msra.mxu2 %v3049_v22  ;;  %v3622_v12 = vld [vmem:[#allocation46_spill] sm:$0xff] }
 0x26d   :  { %1272 = vmatpush.msra.mxu3 %v3052_v29 }
 0x2c8   :  { %v868_v14 = vpop.f32.mrf.mxu0  ;;  %v888_v30 = vpop.f32.mrf.mxu1 }
 0x2c9   :  { %v931_v16 = vadd.f32 %v868_v14, %v3620_v1  ;;  %v932_v20 = vadd.f32 %v888_v30, %v3621_v33  ;;  %v3623_v33 = vld [vmem:[#allocation47_spill] sm:$0xff] }
 0x2cb   :  { %v1844_v27 = vmul.f32 -1.442695, %v931_v16  ;;  %v1845_v21 = vmul.f32 -1.442695, %v932_v20 }
 0x2cd   :  { %1919 = vpow2.f32 %v1844_v27 }
 0x2ce   :  { %1921 = vpow2.f32 %v1845_v21 }
 0x2cf   :  { %v908_v28 = vpop.f32.mrf.mxu2  ;;  %v928_v29 = vpop.f32.mrf.mxu3 }
 0x2d0   :  { %v933_v25 = vadd.f32 %v908_v28, %v3622_v12  ;;  %v934_v30 = vadd.f32 %v928_v29, %v3623_v33 }
 0x2d2   :  { %v1846_v23 = vmul.f32 -1.442695, %v933_v25 }
 0x2d3   :  { %v1920_v24 = vpop.eup %1919 }
 0x2d4   :  { %v1922_v22 = vpop.eup %1921  ;;  %v944_v47 = vadd.f32 1.0, %v1920_v24  ;;  %1923 = vpow2.f32 %v1846_v23 }
 0x2d5   :  { %v945_v34 = vadd.f32 1.0, %v1922_v22 }
 0x2d6   :  { %1925 = vrcp.f32 %v944_v47  ;;  %v958_v25 = vand.u32 2147483648, %v944_v47  ;;  %v956_v23 = vand.u32 2147483647, %v944_v47  ;;  %vm952_vm7 = vweird.f32 %v944_v47 }
 0x2d7   :  { %1927 = vrcp.f32 %v945_v34  ;;  %v973_v28 = vand.u32 2147483648, %v945_v34  ;;  %v971_v32 = vand.u32 2147483647, %v945_v34  ;;  %vm967_vm8 = vweird.f32 %v945_v34 }
 0x2d8   :  { %v959_v33 = vor.u32 1.1754944e-38, %v958_v25  ;;  %vm957_vm11 = vcmp.eq.f32.partialorder %v956_v23, 8.507059e+37 }
 0x2d9   :  { %vm972_vm12 = vcmp.eq.f32.partialorder %v971_v32, 8.507059e+37 }
 0x2da   :  { %v1924_v17 = vpop.eup %1923 }
 0x2db   :  { %v946_v1 = vadd.f32 1.0, %v1924_v17 }
 0x2dc   :  { %v1926_v14 = vpop.eup %1925 }
 0x2dd   :  { %v1928_v20 = vpop.eup %1927  ;;  %v948_v27 = vmul.f32 %v1926_v14, %v944_v47  ;;  %1929 = vrcp.f32 %v946_v1  ;;  %vm953_vm5 = vweird.f32 %v1926_v14  ;;  %v988_v25 = vand.u32 2147483648, %v946_v1 }
 0x2de   :  { %v963_v16 = vmul.f32 %v1928_v20, %v945_v34  ;;  %1931 = vtanh.f32 %v934_v30  ;;  %vm968_vm6 = vweird.f32 %v1928_v20  ;;  %vm954_vm9 = vmor %vm952_vm7, %vm953_vm5  ;;  %vm982_vm14 = vweird.f32 %v946_v1 }
 0x2df   :  { %v949_v21 = vsub.f32 1.0, %v948_v27  ;;  %vm969_vm10 = vmor %vm967_vm8, %vm968_vm6  ;;  %v974_v27 = vor.u32 1.1754944e-38, %v973_v28  ;;  %v989_v23 = vor.u32 1.1754944e-38, %v988_v25  ;;  %v3643_v25 = vld [vmem:[#allocation28_spill] sm:$0xff] }
 0x2e0   :  { %v964_v12 = vsub.f32 1.0, %v963_v16 }
 0x2e1   :  { %v950_v24 = vmul.f32 %v1926_v14, %v949_v21 }
 0x2e2   :  { %v965_v22 = vmul.f32 %v1928_v20, %v964_v12 }
 0x2e3   :  { %v1930_v26 = vpop.eup %1929  ;;  %v951_v17 = vadd.f32 %v1926_v14, %v950_v24 }
 0x2e4   :  { %v978_v29 = vmul.f32 %v1930_v26, %v946_v1  ;;  %v966_v35 = vadd.f32 %v1928_v20, %v965_v22  ;;  %v1932_v30 = vpop.eup %1931  ;;  %vm983_vm13 = vweird.f32 %v1930_v26  ;;  %v3632_v22 = vld [vmem:[#allocation18_spill] sm:$0xff] }
 0x2e5   :  { %v955_v16 = vsel %vm954_vm9, %v1926_v14, %v951_v17  ;;  %v986_v14 = vand.u32 2147483647, %v946_v1  ;;  %vm984_vm15 = vmor %vm982_vm14, %vm983_vm13  ;;  %v3630_v1 = vld [vmem:[#allocation15_spill] sm:$0xff]  ;;  %v3633_v17 = vld [vmem:[#allocation21_spill] sm:$0xff] }
 0x2e6   :  { %v979_v15 = vsub.f32 1.0, %v978_v29  ;;  %v960_v21 = vsel %vm957_vm11, %v959_v33, %v955_v16  ;;  %v970_v13 = vsel %vm969_vm10, %v1928_v20, %v966_v35  ;;  %v3631_v20 = vld [vmem:[#allocation16_spill] sm:$0xff]  ;;  %v3634_v29 = vld [vmem:[#allocation19_spill] sm:$0xff]  ;;  %v3637_v16 = vld [vmem:[#allocation25_spill] sm:$0xff] }
 0x2e7   :  { %v975_v12 = vsel %vm972_vm12, %v974_v27, %v970_v13  ;;  %v994_v11 = vmul.f32 %v1932_v30, %v960_v21  ;;  %vm987_vm0 = vcmp.eq.f32.partialorder %v986_v14, 8.507059e+37  ;;  %v3635_v33 = vld [vmem:[#allocation20_spill] sm:$0xff]  ;;  %v3636_v27 = vld [vmem:[#allocation22_spill] sm:$0xff]  ;;  %v3638_v30 = vld [vmem:[#allocation23_spill] sm:$0xff] }
 0x2e8   :  { %v980_v10 = vmul.f32 %v1930_v26, %v979_v15  ;;  %v993_v24 = vmul.f32 %v975_v12, %v2970_v19  ;;  %v3628_v15 = vld [vmem:[#allocation13_spill] sm:$0xff]  ;;  %v3639_v21 = vld [vmem:[#allocation24_spill] sm:$0xff]  ;;  %v3640_v12 = vld [vmem:[#allocation26_spill] sm:$0xff] }
 0x2e9   :  { %v3644_v14 = vld [vmem:[#allocation30_spill] sm:$0xff] }
 0x2ea   :  { %v3060_v47 = vadd.f32 %v994_v11, %v993_v24  ;;  %v981_v34 = vadd.f32 %v1930_v26, %v980_v10  ;;  %v3626_v10 = vld [vmem:[#allocation11_spill] sm:$0xff]  ;;  %v3627_v11 = vld [vmem:[#allocation12_spill] sm:$0xff]  ;;  %v3641_v24 = vld [vmem:[#allocation29_spill] sm:$0xff] }
 0x2ec   :  { %1933 = vtanh.f32 %v3060_v47  ;;  %v985_v28 = vsel %vm984_vm15, %v1930_v26, %v981_v34  ;;  %v3629_v26 = vld [vmem:[#allocation17_spill] sm:$0xff]  ;;  %v3642_v34 = vld [vmem:[#allocation27_spill] sm:$0xff] }
 0x2ed   :  { %v990_v32 = vsel %vm987_vm0, %v989_v23, %v985_v28  ;;  %v3645_v28 = vld [vmem:[#allocation31_spill] sm:$0xff]  ;;  %v3646_v23 = vld [vmem:[#allocation32_spill] sm:$0xff] }
 0x2f2   :  { %v1934_v35 = vpop.eup %1933 }
 0x2f3   :  { %v3063_v13 = vmul.f32 %v1934_v35, %v990_v32  ;;  %v3647_v35 = vld [vmem:[#allocation34_spill] sm:$0xff]  ;;  %v3648_v32 = vld [vmem:[#allocation35_spill] sm:$0xff] }
 0x2f5   :  { %3624 = vst [vmem:[#allocation39_spill] sm:$0xff] %v3063_v13  ;;  %1040 = vmatmul.f32.vlgmr.msrb.gmra.mxu0 %v3063_v13  ;;  %1060 = vmatmul.f32.vlgmr.msrb.gmra.mxu1 %v3063_v13  ;;  %v998_v19 = vmul.f32 %v2693_v58, %v3063_v13  ;;  %v3625_v58 = vld [vmem:[#allocation14_spill] sm:$0xff] }
 0x2f6   :  { %1080 = vmatmul.f32.vlgmr.msrb.gmra.mxu2 %v3063_v13  ;;  %1100 = vmatmul.f32.vlgmr.msrb.gmra.mxu3 %v3063_v13  ;;  %v3650_v13 = vld [vmem:[#allocation37_spill] sm:$0xff] }
 0x2f7   :  { %999 = vadd.xlane.f32.xlu1 %v998_v19  ;;  %1370 = vmatpush.msrb.mxu0 %v2783_v36  ;;  %v3649_v19 = vld [vmem:[#allocation36_spill] sm:$0xff] }
 0x2f8   :  { %1390 = vmatpush.msrb.mxu1 %v2786_v37  ;;  %1410 = vmatpush.msrb.mxu2 %v2789_v38 }
 0x2f9   :  { %1430 = vmatpush.msrb.mxu3 %v2792_v39  ;;  %1371 = vmatpush.msrb.mxu0 %v2795_v40 }
 0x2fa   :  { %1391 = vmatpush.msrb.mxu1 %v2798_v41  ;;  %1411 = vmatpush.msrb.mxu2 %v2801_v42 }
 0x2fb   :  { %1431 = vmatpush.msrb.mxu3 %v2804_v43  ;;  %1372 = vmatpush.msrb.mxu0 %v2807_v45 }
 0x2fc   :  { %1392 = vmatpush.msrb.mxu1 %v2810_v46  ;;  %1412 = vmatpush.msrb.mxu2 %v2813_v48 }
 0x2fd   :  { %1432 = vmatpush.msrb.mxu3 %v2816_v18  ;;  %1373 = vmatpush.msrb.mxu0 %v2819_v2 }
 0x2fe   :  { %1393 = vmatpush.msrb.mxu1 %v2822_v50  ;;  %1413 = vmatpush.msrb.mxu2 %v2825_v6 }
 0x2ff   :  { %1433 = vmatpush.msrb.mxu3 %v2828_v54  ;;  %1374 = vmatpush.msrb.mxu0 %v2831_v3 }
 0x300   :  { %1394 = vmatpush.msrb.mxu1 %v2834_v5  ;;  %1414 = vmatpush.msrb.mxu2 %v2837_v53 }
 0x301   :  { %1434 = vmatpush.msrb.mxu3 %v2840_v31  ;;  %1375 = vmatpush.msrb.mxu0 %v2843_v56 }
 0x302   :  { %1395 = vmatpush.msrb.mxu1 %v2846_v49  ;;  %1415 = vmatpush.msrb.mxu2 %v2849_v60 }
 0x303   :  { %1435 = vmatpush.msrb.mxu3 %v2852_v57  ;;  %1376 = vmatpush.msrb.mxu0 %v2855_v61 }
 0x304   :  { %1396 = vmatpush.msrb.mxu1 %v2858_v0  ;;  %1416 = vmatpush.msrb.mxu2 %v2861_v44 }
 0x305   :  { %1436 = vmatpush.msrb.mxu3 %v2864_v55  ;;  %1377 = vmatpush.msrb.mxu0 %v2867_v59 }
 0x306   :  { %1397 = vmatpush.msrb.mxu1 %v2870_v51  ;;  %1417 = vmatpush.msrb.mxu2 %v2873_v63 }
 0x307   :  { %1437 = vmatpush.msrb.mxu3 %v2876_v62  ;;  %1378 = vmatpush.msrb.mxu0 %v2879_v4 }
 0x308   :  { %1398 = vmatpush.msrb.mxu1 %v2882_v52  ;;  %1418 = vmatpush.msrb.mxu2 %v2885_v7 }
 0x309   :  { %1438 = vmatpush.msrb.mxu3 %v2888_v8  ;;  %1379 = vmatpush.msrb.mxu0 %v2891_v9 }
 0x30a   :  { %1399 = vmatpush.msrb.mxu1 %v3625_v58  ;;  %1419 = vmatpush.msrb.mxu2 %v3626_v10 }
 0x30b   :  { %1439 = vmatpush.msrb.mxu3 %v3627_v11  ;;  %1380 = vmatpush.msrb.mxu0 %v3628_v15 }
 0x30c   :  { %1400 = vmatpush.msrb.mxu1 %v3629_v26  ;;  %1420 = vmatpush.msrb.mxu2 %v3630_v1 }
 0x30d   :  { %1440 = vmatpush.msrb.mxu3 %v3631_v20  ;;  %1381 = vmatpush.msrb.mxu0 %v3632_v22 }
 0x30e   :  { %1401 = vmatpush.msrb.mxu1 %v3633_v17  ;;  %1421 = vmatpush.msrb.mxu2 %v3634_v29 }
 0x30f   :  { %1441 = vmatpush.msrb.mxu3 %v3635_v33  ;;  %1382 = vmatpush.msrb.mxu0 %v3636_v27 }
 0x310   :  { %1402 = vmatpush.msrb.mxu1 %v3637_v16  ;;  %1422 = vmatpush.msrb.mxu2 %v3638_v30  ;;  %v3653_v30 = vld [vmem:[#allocation49_spill] sm:$0xff] }
 0x311   :  { %1442 = vmatpush.msrb.mxu3 %v3639_v21  ;;  %1383 = vmatpush.msrb.mxu0 %v3640_v12  ;;  %v3651_v12 = vld [vmem:[#allocation38_spill] sm:$0xff]  ;;  %v3652_v21 = vld [vmem:[#allocation48_spill] sm:$0xff] }
 0x312   :  { %1403 = vmatpush.msrb.mxu1 %v3641_v24  ;;  %1423 = vmatpush.msrb.mxu2 %v3642_v34 }
 0x313   :  { %1443 = vmatpush.msrb.mxu3 %v3643_v25  ;;  %1384 = vmatpush.msrb.mxu0 %v3644_v14 }
 0x314   :  { %1404 = vmatpush.msrb.mxu1 %v3645_v28  ;;  %1424 = vmatpush.msrb.mxu2 %v3646_v23 }
 0x315   :  { %1444 = vmatpush.msrb.mxu3 %v3647_v35  ;;  %1385 = vmatpush.msrb.mxu0 %v3648_v32  ;;  %v3654_v35 = vld [vmem:[#allocation50_spill] sm:$0xff] }
 0x316   :  { %1405 = vmatpush.msrb.mxu1 %v3649_v19  ;;  %1425 = vmatpush.msrb.mxu2 %v3650_v13 }
 0x317   :  { %1445 = vmatpush.msrb.mxu3 %v3651_v12 }
 0x372   :  { %v1041_v24 = vpop.f32.mrf.mxu0  ;;  %v1061_v34 = vpop.f32.mrf.mxu1 }
 0x373   :  { %v1104_v25 = vadd.f32 %v1041_v24, %v3652_v21  ;;  %v1105_v14 = vadd.f32 %v1061_v34, %v3653_v30  ;;  %v3655_v30 = vld [vmem:[#allocation51_spill] sm:$0xff] }
 0x375   :  { %v1847_v16 = vmul.f32 -1.442695, %v1104_v25  ;;  %v1848_v28 = vmul.f32 -1.442695, %v1105_v14 }
 0x377   :  { %1935 = vpow2.f32 %v1847_v16 }
 0x378   :  { %1937 = vpow2.f32 %v1848_v28 }
 0x379   :  { %v1081_v23 = vpop.f32.mrf.mxu2  ;;  %v1101_v12 = vpop.f32.mrf.mxu3 }
 0x37a   :  { %v1106_v27 = vadd.f32 %v1081_v23, %v3654_v35  ;;  %v1107_v34 = vadd.f32 %v1101_v12, %v3655_v30 }
 0x37c   :  { %v1849_v32 = vmul.f32 -1.442695, %v1106_v27 }
 0x37d   :  { %v1936_v33 = vpop.eup %1935 }
 0x37e   :  { %v1938_v19 = vpop.eup %1937  ;;  %v1117_v29 = vadd.f32 1.0, %v1936_v33  ;;  %1939 = vpow2.f32 %v1849_v32 }
 0x37f   :  { %v1118_v13 = vadd.f32 1.0, %v1938_v19 }
 0x380   :  { %1941 = vrcp.f32 %v1117_v29  ;;  %v1131_v27 = vand.u32 2147483648, %v1117_v29  ;;  %v1129_v32 = vand.u32 2147483647, %v1117_v29  ;;  %vm1125_vm3 = vweird.f32 %v1117_v29 }
 0x381   :  { %1943 = vrcp.f32 %v1118_v13  ;;  %v1146_v35 = vand.u32 2147483648, %v1118_v13  ;;  %v1144_v22 = vand.u32 2147483647, %v1118_v13  ;;  %vm1140_vm4 = vweird.f32 %v1118_v13 }
 0x382   :  { %v1132_v30 = vor.u32 1.1754944e-38, %v1131_v27  ;;  %vm1130_vm7 = vcmp.eq.f32.partialorder %v1129_v32, 8.507059e+37 }
 0x383   :  { %vm1145_vm8 = vcmp.eq.f32.partialorder %v1144_v22, 8.507059e+37 }
 0x384   :  { %v1940_v17 = vpop.eup %1939 }
 0x385   :  { %v1119_v21 = vadd.f32 1.0, %v1940_v17 }
 0x386   :  { %v1942_v24 = vpop.eup %1941 }
 0x387   :  { %v1944_v25 = vpop.eup %1943  ;;  %v1121_v16 = vmul.f32 %v1942_v24, %v1117_v29  ;;  %1945 = vrcp.f32 %v1119_v21  ;;  %vm1126_vm1 = vweird.f32 %v1942_v24  ;;  %v1161_v27 = vand.u32 2147483648, %v1119_v21 }
 0x388   :  { %v1136_v14 = vmul.f32 %v1944_v25, %v1118_v13  ;;  %1947 = vtanh.f32 %v1107_v34  ;;  %vm1141_vm2 = vweird.f32 %v1944_v25  ;;  %vm1127_vm5 = vmor %vm1125_vm3, %vm1126_vm1  ;;  %vm1155_vm10 = vweird.f32 %v1119_v21 }
 0x389   :  { %v1122_v28 = vsub.f32 1.0, %v1121_v16  ;;  %vm1142_vm6 = vmor %vm1140_vm4, %vm1141_vm2  ;;  %v1147_v16 = vor.u32 1.1754944e-38, %v1146_v35  ;;  %v1162_v32 = vor.u32 1.1754944e-38, %v1161_v27 }
 0x38a   :  { %v1137_v23 = vsub.f32 1.0, %v1136_v14 }
 0x38b   :  { %v1123_v33 = vmul.f32 %v1942_v24, %v1122_v28 }
 0x38c   :  { %v1138_v19 = vmul.f32 %v1944_v25, %v1137_v23 }
 0x38d   :  { %v1946_v20 = vpop.eup %1945  ;;  %v1124_v17 = vadd.f32 %v1942_v24, %v1123_v33 }
 0x38e   :  { %v1151_v12 = vmul.f32 %v1946_v20, %v1119_v21  ;;  %v1139_v1 = vadd.f32 %v1944_v25, %v1138_v19  ;;  %v1948_v34 = vpop.eup %1947  ;;  %vm1156_vm9 = vweird.f32 %v1946_v20  ;;  %v2158_v19 = vmov 0  }
 0x38f   :  { %v1128_v14 = vsel %vm1127_vm5, %v1942_v24, %v1124_v17  ;;  %v1159_v24 = vand.u32 2147483647, %v1119_v21  ;;  %vm1157_vm11 = vmor %vm1155_vm10, %vm1156_vm9  ;;  %1866 = vset.pattern.permute.xlu2 %v2158_v19  ;;  %1867 = vset.pattern.permute.xlu0 %v2158_v19 }
 0x390   :  { %v1152_v26 = vsub.f32 1.0, %v1151_v12  ;;  %v1133_v28 = vsel %vm1130_vm7, %v1132_v30, %v1128_v14  ;;  %v1143_v15 = vsel %vm1142_vm6, %v1944_v25, %v1139_v1  ;;  %1868 = vset.pattern.permute.xlu1 %v2158_v19 }
 0x391   :  { %v1148_v23 = vsel %vm1145_vm8, %v1147_v16, %v1143_v15  ;;  %v1167_v11 = vmul.f32 %v1948_v34, %v1133_v28  ;;  %vm1160_vm12 = vcmp.eq.f32.partialorder %v1159_v24, 8.507059e+37  ;;  %v3685_v16 = vld [vmem:[#allocation55_spill] sm:$0xff] }
 0x392   :  { %v1153_v10 = vmul.f32 %v1946_v20, %v1152_v26  ;;  %v1166_v33 = vmul.f32 %v1148_v23, %v3060_v47  ;;  %v3150_v47 = vld [vmem:[%s3380_s4] ss:$0 sm:$0xff] }
 0x394   :  { %v3140_v29 = vadd.f32 %v1167_v11, %v1166_v33  ;;  %v1154_v13 = vadd.f32 %v1946_v20, %v1153_v10 }
 0x396   :  { %1949 = vtanh.f32 %v3140_v29  ;;  %v1158_v35 = vsel %vm1157_vm11, %v1946_v20, %v1154_v13 }
 0x397   :  { %v1163_v22 = vsel %vm1160_vm12, %v1162_v32, %v1158_v35 }
 0x39c   :  { %v1950_v1 = vpop.eup %1949 }
 0x39d   :  { %v3143_v15 = vmul.f32 %v1950_v1, %v1163_v22 }
 0x39f   :  { %1213 = vmatmul.f32.vlgmr.msra.gmra.mxu0 %v3143_v15  ;;  %1233 = vmatmul.f32.vlgmr.msra.gmra.mxu1 %v3143_v15  ;;  %v1171_v10 = vmul.f32 %v3150_v47, %v3143_v15 }
 0x3a0   :  { %1253 = vmatmul.f32.vlgmr.msra.gmra.mxu2 %v3143_v15  ;;  %1273 = vmatmul.f32.vlgmr.msra.gmra.mxu3 %v3143_v15 }
 0x3a1   :  { %1172 = vadd.xlane.f32.xlu2 %v1171_v10  ;;  %1543 = vmatpush.msra.mxu0 %v2783_v36  ;;  %v3656_v36 = vld [vmem:[#allocation11_spill] sm:$0xff] }
 0x3a2   :  { %1563 = vmatpush.msra.mxu1 %v2786_v37  ;;  %1583 = vmatpush.msra.mxu2 %v2789_v38  ;;  %v3657_v37 = vld [vmem:[#allocation12_spill] sm:$0xff]  ;;  %v3658_v38 = vld [vmem:[#allocation13_spill] sm:$0xff] }
 0x3a3   :  { %1603 = vmatpush.msra.mxu3 %v2792_v39  ;;  %1544 = vmatpush.msra.mxu0 %v2795_v40  ;;  %v3659_v39 = vld [vmem:[#allocation17_spill] sm:$0xff]  ;;  %v3660_v40 = vld [vmem:[#allocation15_spill] sm:$0xff] }
 0x3a4   :  { %1564 = vmatpush.msra.mxu1 %v2798_v41  ;;  %1584 = vmatpush.msra.mxu2 %v2801_v42  ;;  %v3661_v41 = vld [vmem:[#allocation16_spill] sm:$0xff]  ;;  %v3662_v42 = vld [vmem:[#allocation18_spill] sm:$0xff] }
 0x3a5   :  { %1604 = vmatpush.msra.mxu3 %v2804_v43  ;;  %1545 = vmatpush.msra.mxu0 %v2807_v45  ;;  %v3663_v43 = vld [vmem:[#allocation21_spill] sm:$0xff]  ;;  %v3664_v45 = vld [vmem:[#allocation19_spill] sm:$0xff] }
 0x3a6   :  { %1565 = vmatpush.msra.mxu1 %v2810_v46  ;;  %1585 = vmatpush.msra.mxu2 %v2813_v48  ;;  %v3665_v46 = vld [vmem:[#allocation20_spill] sm:$0xff]  ;;  %v3666_v48 = vld [vmem:[#allocation22_spill] sm:$0xff] }
 0x3a7   :  { %1605 = vmatpush.msra.mxu3 %v2816_v18  ;;  %1546 = vmatpush.msra.mxu0 %v2819_v2  ;;  %v3667_v18 = vld [vmem:[#allocation25_spill] sm:$0xff]  ;;  %v3668_v2 = vld [vmem:[#allocation23_spill] sm:$0xff] }
 0x3a8   :  { %1566 = vmatpush.msra.mxu1 %v2822_v50  ;;  %1586 = vmatpush.msra.mxu2 %v2825_v6  ;;  %v3669_v50 = vld [vmem:[#allocation24_spill] sm:$0xff]  ;;  %v3670_v6 = vld [vmem:[#allocation26_spill] sm:$0xff] }
 0x3a9   :  { %1606 = vmatpush.msra.mxu3 %v2828_v54  ;;  %1547 = vmatpush.msra.mxu0 %v2831_v3  ;;  %v3671_v54 = vld [vmem:[#allocation29_spill] sm:$0xff]  ;;  %v3672_v3 = vld [vmem:[#allocation27_spill] sm:$0xff] }
 0x3aa   :  { %1567 = vmatpush.msra.mxu1 %v2834_v5  ;;  %1587 = vmatpush.msra.mxu2 %v2837_v53  ;;  %v3673_v5 = vld [vmem:[#allocation28_spill] sm:$0xff]  ;;  %v3674_v53 = vld [vmem:[#allocation30_spill] sm:$0xff] }
 0x3ab   :  { %1607 = vmatpush.msra.mxu3 %v2840_v31  ;;  %1548 = vmatpush.msra.mxu0 %v2843_v56  ;;  %v3675_v31 = vld [vmem:[#allocation31_spill] sm:$0xff]  ;;  %v3676_v56 = vld [vmem:[#allocation32_spill] sm:$0xff] }
 0x3ac   :  { %1568 = vmatpush.msra.mxu1 %v2846_v49  ;;  %1588 = vmatpush.msra.mxu2 %v2849_v60  ;;  %v3677_v49 = vld [vmem:[#allocation34_spill] sm:$0xff]  ;;  %v3678_v60 = vld [vmem:[#allocation35_spill] sm:$0xff] }
 0x3ad   :  { %1608 = vmatpush.msra.mxu3 %v2852_v57  ;;  %1549 = vmatpush.msra.mxu0 %v2855_v61  ;;  %v3679_v57 = vld [vmem:[#allocation36_spill] sm:$0xff]  ;;  %v3680_v61 = vld [vmem:[#allocation37_spill] sm:$0xff] }
 0x3ae   :  { %1569 = vmatpush.msra.mxu1 %v2858_v0  ;;  %1589 = vmatpush.msra.mxu2 %v2861_v44  ;;  %v3681_v0 = vld [vmem:[#allocation38_spill] sm:$0xff] }
 0x3af   :  { %1609 = vmatpush.msra.mxu3 %v2864_v55  ;;  %1550 = vmatpush.msra.mxu0 %v2867_v59  ;;  %v3682_v59 = vld [vmem:[#allocation52_spill] sm:$0xff] }
 0x3b0   :  { %1570 = vmatpush.msra.mxu1 %v2870_v51  ;;  %1590 = vmatpush.msra.mxu2 %v2873_v63  ;;  %v3683_v63 = vld [vmem:[#allocation53_spill] sm:$0xff] }
 0x3b1   :  { %1610 = vmatpush.msra.mxu3 %v2876_v62  ;;  %1551 = vmatpush.msra.mxu0 %v2879_v4 }
 0x3b2   :  { %1571 = vmatpush.msra.mxu1 %v2882_v52  ;;  %1591 = vmatpush.msra.mxu2 %v2885_v7 }
 0x3b3   :  { %1611 = vmatpush.msra.mxu3 %v2888_v8  ;;  %1552 = vmatpush.msra.mxu0 %v2891_v9  ;;  %v3684_v8 = vld [vmem:[#allocation54_spill] sm:$0xff] }
 0x3b4   :  { %1572 = vmatpush.msra.mxu1 %v3625_v58  ;;  %1592 = vmatpush.msra.mxu2 %v3656_v36 }
 0x3b5   :  { %1612 = vmatpush.msra.mxu3 %v3657_v37  ;;  %1553 = vmatpush.msra.mxu0 %v3658_v38 }
 0x3b6   :  { %1573 = vmatpush.msra.mxu1 %v3659_v39  ;;  %1593 = vmatpush.msra.mxu2 %v3660_v40 }
 0x3b7   :  { %1613 = vmatpush.msra.mxu3 %v3661_v41  ;;  %1554 = vmatpush.msra.mxu0 %v3662_v42 }
 0x3b8   :  { %1574 = vmatpush.msra.mxu1 %v3663_v43  ;;  %1594 = vmatpush.msra.mxu2 %v3664_v45 }
 0x3b9   :  { %1614 = vmatpush.msra.mxu3 %v3665_v46  ;;  %1555 = vmatpush.msra.mxu0 %v3666_v48 }
 0x3ba   :  { %1575 = vmatpush.msra.mxu1 %v3667_v18  ;;  %1595 = vmatpush.msra.mxu2 %v3668_v2 }
 0x3bb   :  { %1615 = vmatpush.msra.mxu3 %v3669_v50  ;;  %1556 = vmatpush.msra.mxu0 %v3670_v6 }
 0x3bc   :  { %1576 = vmatpush.msra.mxu1 %v3671_v54  ;;  %1596 = vmatpush.msra.mxu2 %v3672_v3 }
 0x3bd   :  { %1616 = vmatpush.msra.mxu3 %v3673_v5  ;;  %1557 = vmatpush.msra.mxu0 %v3674_v53 }
 0x3be   :  { %1577 = vmatpush.msra.mxu1 %v3675_v31  ;;  %1597 = vmatpush.msra.mxu2 %v3676_v56 }
 0x3bf   :  { %1617 = vmatpush.msra.mxu3 %v3677_v49  ;;  %1558 = vmatpush.msra.mxu0 %v3678_v60 }
 0x3c0   :  { %1578 = vmatpush.msra.mxu1 %v3679_v57  ;;  %1598 = vmatpush.msra.mxu2 %v3680_v61  ;;  %v479_v57 = vpop.xlane.xlu0 %478  ;;  %v3236_v61 = vld [vmem:[#allocation2] ss:$0 sm:$0xff] }
 0x3c1   :  { %1618 = vmatpush.msra.mxu3 %v3681_v0  ;;  %v3239_v0 = vadd.f32 %v3236_v61, %v479_v57 }
 0x41c   :  { %v1214_v44 = vpop.f32.mrf.mxu0  ;;  %v1234_v55 = vpop.f32.mrf.mxu1 }
 0x41d   :  { %v1277_v51 = vadd.f32 %v1214_v44, %v3682_v59  ;;  %v1278_v62 = vadd.f32 %v1234_v55, %v3683_v63  ;;  %v654_v44 = vpop.xlane.xlu0 %653  ;;  %v484_v55 = vsub.f32 -inf, %v3239_v0 }
 0x41e   :  { %v655_v59 = vadd.f32 %v3236_v61, %v654_v44 }
 0x41f   :  { %v1850_v4 = vmul.f32 -1.442695, %v1277_v51  ;;  %v1851_v52 = vmul.f32 -1.442695, %v1278_v62  ;;  %v485_v51 = vmul.f32 1.442695, %v484_v55  ;;  %v827_v62 = vpop.xlane.xlu1 %826 }
 0x420   :  { %v3244_v63 = vmax.f32 %v3239_v0, %v655_v59 }
 0x421   :  { %1951 = vpow2.f32 %v1850_v4 }
 0x422   :  { %1953 = vpow2.f32 %v1851_v52  ;;  %v660_v4 = vsub.f32 %v655_v59, %v3244_v63  ;;  %v3248_v52 = vadd.f32 %v3236_v61, %v827_v62 }
 0x423   :  { %v1254_v7 = vpop.f32.mrf.mxu2  ;;  %v1274_v25 = vpop.f32.mrf.mxu3 }
 0x424   :  { %v1279_v9 = vadd.f32 %v1254_v7, %v3684_v8  ;;  %v1280_v14 = vadd.f32 %v1274_v25, %v3685_v16  ;;  %v661_v7 = vmul.f32 1.442695, %v660_v4  ;;  %v3252_v8 = vmax.f32 %v3244_v63, %v3248_v52  ;;  %v1173_v25 = vpop.xlane.xlu2 %1172 }
 0x426   :  { %v1852_v58 = vmul.f32 -1.442695, %v1279_v9 }
 0x427   :  { %v1952_v11 = vpop.eup %1951  ;;  %v1000_v9 = vpop.xlane.xlu1 %999 }
 0x428   :  { %v1954_v26 = vpop.eup %1953  ;;  %v1290_v20 = vadd.f32 1.0, %v1952_v11  ;;  %1955 = vpow2.f32 %v1852_v58  ;;  %v830_v11 = vsub.f32 %v3244_v63, %v3252_v8 }
 0x429   :  { %v1291_v21 = vadd.f32 1.0, %v1954_v26  ;;  %v3260_v26 = vadd.f32 %v3236_v61, %v1000_v9 }
 0x42a   :  { %1957 = vrcp.f32 %v1290_v20  ;;  %v1304_v27 = vand.u32 2147483648, %v1290_v20  ;;  %v1302_v32 = vand.u32 2147483647, %v1290_v20  ;;  %vm1298_vm15 = vweird.f32 %v1290_v20 }
 0x42b   :  { %1959 = vrcp.f32 %v1291_v21  ;;  %v1319_v24 = vand.u32 2147483648, %v1291_v21  ;;  %v1317_v22 = vand.u32 2147483647, %v1291_v21  ;;  %vm1313_vm0 = vweird.f32 %v1291_v21 }
 0x42c   :  { %v1305_v38 = vor.u32 1.1754944e-38, %v1304_v27  ;;  %vm1303_vm3 = vcmp.eq.f32.partialorder %v1302_v32, 8.507059e+37  ;;  %v3687_v32 = vld [vmem:[#allocation57_spill] sm:$0xff] }
 0x42d   :  { %v1320_v40 = vor.u32 1.1754944e-38, %v1319_v24  ;;  %vm1318_vm4 = vcmp.eq.f32.partialorder %v1317_v22, 8.507059e+37  ;;  %v3686_v24 = vld [vmem:[#allocation56_spill] sm:$0xff] }
 0x42e   :  { %v1956_v17 = vpop.eup %1955 }
 0x42f   :  { %v1292_v12 = vadd.f32 1.0, %v1956_v17 }
 0x430   :  { %v1958_v30 = vpop.eup %1957 }
 0x431   :  { %v1960_v34 = vpop.eup %1959  ;;  %v1294_v28 = vmul.f32 %v1958_v30, %v1290_v20  ;;  %1961 = vrcp.f32 %v1292_v12  ;;  %vm1299_vm13 = vweird.f32 %v1958_v30  ;;  %v1334_v3 = vand.u32 2147483648, %v1292_v12 }
 0x432   :  { %v1309_v23 = vmul.f32 %v1960_v34, %v1291_v21  ;;  %1963 = vtanh.f32 %v1280_v14  ;;  %vm1314_vm14 = vweird.f32 %v1960_v34  ;;  %vm1300_vm1 = vmor %vm1298_vm15, %vm1299_vm13  ;;  %vm1328_vm6 = vweird.f32 %v1292_v12 }
 0x433   :  { %v1295_v33 = vsub.f32 1.0, %v1294_v28  ;;  %vm1315_vm2 = vmor %vm1313_vm0, %vm1314_vm14  ;;  %v1332_v5 = vand.u32 2147483647, %v1292_v12  ;;  %v1335_v31 = vor.u32 1.1754944e-38, %v1334_v3  ;;  %v831_v20 = vmul.f32 1.442695, %v830_v11 }
 0x434   :  { %v1310_v13 = vsub.f32 1.0, %v1309_v23  ;;  %v3264_v21 = vmax.f32 %v3252_v8, %v3260_v26 }
 0x435   :  { %v1296_v35 = vmul.f32 %v1958_v30, %v1295_v33  ;;  %vm1333_vm8 = vcmp.eq.f32.partialorder %v1332_v5, 8.507059e+37 }
 0x436   :  { %v1311_v1 = vmul.f32 %v1960_v34, %v1310_v13  ;;  %v1003_v17 = vsub.f32 %v3252_v8, %v3264_v21 }
 0x437   :  { %v1962_v10 = vpop.eup %1961  ;;  %v1297_v36 = vadd.f32 %v1958_v30, %v1296_v35 }
 0x438   :  { %v1324_v37 = vmul.f32 %v1962_v10, %v1292_v12  ;;  %v1312_v39 = vadd.f32 %v1960_v34, %v1311_v1  ;;  %v1964_v42 = vpop.eup %1963  ;;  %vm1329_vm5 = vweird.f32 %v1962_v10  ;;  %v1174_v12 = vadd.f32 %v3236_v61, %v1173_v25 }
 0x439   :  { %v1301_v41 = vsel %vm1300_vm1, %v1958_v30, %v1297_v36  ;;  %vm1330_vm7 = vmor %vm1328_vm6, %vm1329_vm5  ;;  %v1004_v30 = vmul.f32 1.442695, %v1003_v17 }
 0x43a   :  { %v1325_v43 = vsub.f32 1.0, %v1324_v37  ;;  %v1306_v45 = vsel %vm1303_vm3, %v1305_v38, %v1301_v41  ;;  %v1316_v46 = vsel %vm1315_vm2, %v1960_v34, %v1312_v39  ;;  %v3273_v16 = vmax.f32 %v3264_v21, %v1174_v12  ;;  %v3688_v37 = vld [vmem:[#allocation58_spill] sm:$0xff] }
 0x43b   :  { %v1321_v48 = vsel %vm1318_vm4, %v1320_v40, %v1316_v46  ;;  %v1340_v18 = vmul.f32 %v1964_v42, %v1306_v45 }
 0x43c   :  { %v1326_v2 = vmul.f32 %v1962_v10, %v1325_v43  ;;  %v1339_v50 = vmul.f32 %v1321_v48, %v3140_v29  ;;  %v1179_v34 = vsub.f32 %v1174_v12, %v3273_v16 }
 0x43e   :  { %v3225_v6 = vadd.f32 %v1340_v18, %v1339_v50  ;;  %v1327_v54 = vadd.f32 %v1962_v10, %v1326_v2  ;;  %v1180_v28 = vmul.f32 1.442695, %v1179_v34  ;;  %v3689_v2 = vld [vmem:[#allocation59_spill] sm:$0xff] }
 0x440   :  { %1965 = vtanh.f32 %v3225_v6  ;;  %v1331_v53 = vsel %vm1330_vm7, %v1962_v10, %v1327_v54 }
 0x441   :  { %v1336_v49 = vsel %vm1333_vm8, %v1335_v31, %v1331_v53  ;;  %1967 = vpow2.f32 %v485_v51 }
 0x442   :  { %1969 = vpow2.f32 %v661_v7 }
 0x443   :  { %1971 = vpow2.f32 %v831_v20 }
 0x444   :  { %1973 = vpow2.f32 %v1004_v30 }
 0x445   :  { %1975 = vpow2.f32 %v1180_v28 }
 0x446   :  { %v1966_v56 = vpop.eup %1965 }
 0x447   :  { %v3228_v60 = vmul.f32 %v1966_v56, %v1336_v49  ;;  %v3254_v58 = vpop.eup %1967 }
 0x448   :  { %v3266_v19 = vpop.eup %1969 }
 0x449   :  { %1386 = vmatmul.f32.vlgmr.msrb.gmra.mxu0 %v3228_v60  ;;  %1406 = vmatmul.f32.vlgmr.msrb.gmra.mxu1 %v3228_v60  ;;  %v1344_v29 = vmul.f32 %v3150_v47, %v3228_v60  ;;  %v3275_v14 = vpop.eup %1971 }
 0x44a   :  { %1426 = vmatmul.f32.vlgmr.msrb.gmra.mxu2 %v3228_v60  ;;  %1446 = vmatmul.f32.vlgmr.msrb.gmra.mxu3 %v3228_v60  ;;  %v3279_v23 = vpop.eup %1973 }
 0x44b   :  { %1345 = vadd.xlane.f32.xlu2 %v1344_v29  ;;  %v3282_v33 = vpop.eup %1975 }
 0x463   :  { %494 = vperm.xlu2 %1866, %v3254_v58  }
 0x46b   :  { %673 = vperm.xlu2 %1866, %v3266_v19  }
 0x473   :  { %840 = vperm.xlu2 %1866, %v3275_v14  }
 0x47b   :  { %1013 = vperm.xlu2 %1866, %v3279_v23  }
 0x483   :  { %1192 = vperm.xlu2 %1866, %v3282_v33  }
 0x4c6   :  { %v1387_v13 = vpop.f32.mrf.mxu0  ;;  %v1407_v27 = vpop.f32.mrf.mxu1 }
 0x4c7   :  { %v1450_v35 = vadd.f32 %v1387_v13, %v3686_v24  ;;  %v1451_v1 = vadd.f32 %v1407_v27, %v3687_v32 }
 0x4c9   :  { %v1853_v22 = vmul.f32 -1.442695, %v1450_v35  ;;  %v1854_v10 = vmul.f32 -1.442695, %v1451_v1 }
 0x4cb   :  { %1977 = vpow2.f32 %v1853_v22 }
 0x4cc   :  { %1979 = vpow2.f32 %v1854_v10 }
 0x4cd   :  { %v1427_v36 = vpop.f32.mrf.mxu2  ;;  %v1447_v45 = vpop.f32.mrf.mxu3 }
 0x4ce   :  { %v1452_v38 = vadd.f32 %v1427_v36, %v3688_v37  ;;  %v1453_v50 = vadd.f32 %v1447_v45, %v3689_v2 }
 0x4d0   :  { %v1855_v39 = vmul.f32 -1.442695, %v1452_v38  ;;  %v487_v38 = vsub.f32 %v3239_v0, %v3239_v0 }
 0x4d1   :  { %v1978_v40 = vpop.eup %1977 }
 0x4d2   :  { %v1980_v41 = vpop.eup %1979  ;;  %v1463_v42 = vadd.f32 1.0, %v1978_v40  ;;  %1981 = vpow2.f32 %v1855_v39  ;;  %v488_v39 = vmul.f32 1.442695, %v487_v38  ;;  %v1346_v40 = vpop.xlane.xlu2 %1345 }
 0x4d3   :  { %v1464_v43 = vadd.f32 1.0, %v1980_v41  ;;  %v1176_v41 = vsub.f32 %v3264_v21, %v3273_v16 }
 0x4d4   :  { %1983 = vrcp.f32 %v1463_v42  ;;  %v1477_v56 = vand.u32 2147483648, %v1463_v42  ;;  %v1475_v29 = vand.u32 2147483647, %v1463_v42  ;;  %vm1471_vm11 = vweird.f32 %v1463_v42 }
 0x4d5   :  { %1985 = vrcp.f32 %v1464_v43  ;;  %v1492_v49 = vand.u32 2147483648, %v1464_v43  ;;  %v1490_v55 = vand.u32 2147483647, %v1464_v43  ;;  %vm1486_vm12 = vweird.f32 %v1464_v43 }
 0x4d6   :  { %v1478_v4 = vor.u32 1.1754944e-38, %v1477_v56  ;;  %vm1476_vm15 = vcmp.eq.f32.partialorder %v1475_v29, 8.507059e+37 }
 0x4d7   :  { %v1493_v9 = vor.u32 1.1754944e-38, %v1492_v49  ;;  %vm1491_vm0 = vcmp.eq.f32.partialorder %v1490_v55, 8.507059e+37 }
 0x4d8   :  { %v1982_v46 = vpop.eup %1981 }
 0x4d9   :  { %v1465_v48 = vadd.f32 1.0, %v1982_v46 }
 0x4da   :  { %v1984_v18 = vpop.eup %1983 }
 0x4db   :  { %v1986_v54 = vpop.eup %1985  ;;  %v1467_v3 = vmul.f32 %v1984_v18, %v1463_v42  ;;  %1987 = vrcp.f32 %v1465_v48  ;;  %vm1472_vm9 = vweird.f32 %v1984_v18  ;;  %v1507_v35 = vand.u32 2147483648, %v1465_v48 }
 0x4dc   :  { %v1482_v5 = vmul.f32 %v1986_v54, %v1464_v43  ;;  %1989 = vtanh.f32 %v1453_v50  ;;  %vm1487_vm10 = vweird.f32 %v1986_v54  ;;  %vm1473_vm13 = vmor %vm1471_vm11, %vm1472_vm9  ;;  %vm1501_vm2 = vweird.f32 %v1465_v48 }
 0x4dd   :  { %v1468_v53 = vsub.f32 1.0, %v1467_v3  ;;  %vm1488_vm14 = vmor %vm1486_vm12, %vm1487_vm10  ;;  %v1505_v32 = vand.u32 2147483647, %v1465_v48  ;;  %v1508_v22 = vor.u32 1.1754944e-38, %v1507_v35  ;;  %v1347_v42 = vadd.f32 %v3236_v61, %v1346_v40 }
 0x4de   :  { %v1483_v31 = vsub.f32 1.0, %v1482_v5  ;;  %v1177_v43 = vmul.f32 1.442695, %v1176_v41 }
 0x4df   :  { %v1469_v57 = vmul.f32 %v1984_v18, %v1468_v53  ;;  %vm1506_vm4 = vcmp.eq.f32.partialorder %v1505_v32, 8.507059e+37  ;;  %v3307_v45 = vmax.f32 %v3273_v16, %v1347_v42 }
 0x4e0   :  { %v1484_v44 = vmul.f32 %v1986_v54, %v1483_v31 }
 0x4e1   :  { %v1988_v59 = vpop.eup %1987  ;;  %v1470_v51 = vadd.f32 %v1984_v18, %v1469_v57  ;;  %v3690_v57 = vld [vmem:[#allocation60_spill] sm:$0xff] }
 0x4e2   :  { %v1497_v62 = vmul.f32 %v1988_v59, %v1465_v48  ;;  %v1485_v7 = vadd.f32 %v1986_v54, %v1484_v44  ;;  %v1990_v20 = vpop.eup %1989  ;;  %vm1502_vm1 = vweird.f32 %v1988_v59  ;;  %v1352_v48 = vsub.f32 %v1347_v42, %v3307_v45  ;;  %v3691_v44 = vld [vmem:[#allocation61_spill] sm:$0xff] }
 0x4e3   :  { %v1474_v11 = vsel %vm1473_vm13, %v1984_v18, %v1470_v51  ;;  %vm1503_vm3 = vmor %vm1501_vm2, %vm1502_vm1 }
 0x4e4   :  { %v1498_v25 = vsub.f32 1.0, %v1497_v62  ;;  %v1479_v17 = vsel %vm1476_vm15, %v1478_v4, %v1474_v11  ;;  %v1489_v12 = vsel %vm1488_vm14, %v1986_v54, %v1485_v7  ;;  %v1353_v18 = vmul.f32 1.442695, %v1352_v48  ;;  %v3692_v7 = vld [vmem:[#allocation62_spill] sm:$0xff] }
 0x4e5   :  { %v1494_v30 = vsel %vm1491_vm0, %v1493_v9, %v1489_v12  ;;  %v1513_v34 = vmul.f32 %v1990_v20, %v1479_v17 }
 0x4e6   :  { %v1499_v28 = vmul.f32 %v1988_v59, %v1498_v25  ;;  %v1512_v13 = vmul.f32 %v1494_v30, %v3225_v6 }
 0x4e8   :  { %v3290_v27 = vadd.f32 %v1513_v34, %v1512_v13  ;;  %v1500_v24 = vadd.f32 %v1988_v59, %v1499_v28 }
 0x4ea   :  { %1991 = vtanh.f32 %v3290_v27  ;;  %v1504_v1 = vsel %vm1503_vm3, %v1988_v59, %v1500_v24  ;;  %v3693_v24 = vld [vmem:[#allocation63_spill] sm:$0xff] }
 0x4eb   :  { %v1509_v36 = vsel %vm1506_vm4, %v1508_v22, %v1504_v1  ;;  %1993 = vpow2.f32 %v488_v39 }
 0x4ec   :  { %1995 = vpow2.f32 %v1177_v43 }
 0x4ed   :  { %1997 = vpow2.f32 %v1353_v18 }
 0x4f0   :  { %v1992_v10 = vpop.eup %1991 }
 0x4f1   :  { %v3293_v37 = vmul.f32 %v1992_v10, %v1509_v36  ;;  %v3309_v46 = vpop.eup %1993 }
 0x4f2   :  { %v3313_v2 = vpop.eup %1995 }
 0x4f3   :  { %1559 = vmatmul.f32.vlgmr.msra.gmra.mxu0 %v3293_v37  ;;  %1579 = vmatmul.f32.vlgmr.msra.gmra.mxu1 %v3293_v37  ;;  %v1517_v6 = vmul.f32 %v3150_v47, %v3293_v37  ;;  %v3316_v50 = vpop.eup %1997 }
 0x4f4   :  { %1599 = vmatmul.f32.vlgmr.msra.gmra.mxu2 %v3293_v37  ;;  %1619 = vmatmul.f32.vlgmr.msra.gmra.mxu3 %v3293_v37 }
 0x4f5   :  { %1518 = vadd.xlane.f32.xlu0 %v1517_v6 }
 0x509   :  { %500 = vperm.xlu0 %1867, %v3309_v46  }
 0x511   :  { %1186 = vperm.xlu0 %1867, %v3313_v2  }
 0x519   :  { %1365 = vperm.xlu0 %1867, %v3316_v50  }
 0x568   :  { %v1519_v54 = vpop.xlane.xlu0 %1518 }
 0x569   :  { %v3320_v3 = vadd.f32 %v3236_v61, %v1519_v54 }
 0x56b   :  { %v3324_v5 = vmax.f32 %v3307_v45, %v3320_v3 }
 0x56d   :  { %v1522_v53 = vsub.f32 %v3307_v45, %v3324_v5 }
 0x56f   :  { %v1523_v31 = vmul.f32 1.442695, %v1522_v53 }
 0x570   :  { %v1560_v56 = vpop.f32.mrf.mxu0  ;;  %v1580_v49 = vpop.f32.mrf.mxu1 }
 0x571   :  { %1999 = vpow2.f32 %v1523_v31  ;;  %v1623_v29 = vadd.f32 %v1560_v56, %v3690_v57  ;;  %v1624_v55 = vadd.f32 %v1580_v49, %v3691_v44 }
 0x573   :  { %v1856_v59 = vmul.f32 -1.442695, %v1623_v29  ;;  %v1857_v51 = vmul.f32 -1.442695, %v1624_v55 }
 0x575   :  { %2001 = vpow2.f32 %v1856_v59 }
 0x576   :  { %2003 = vpow2.f32 %v1857_v51 }
 0x577   :  { %v3330_v62 = vpop.eup %1999  ;;  %v1600_v4 = vpop.f32.mrf.mxu2 }
 0x578   :  { %v1625_v9 = vadd.f32 %v1600_v4, %v3692_v7  ;;  %1532 = vperm.xlu2 %1866, %v3330_v62   ;;  %v1620_v30 = vpop.f32.mrf.mxu3 }
 0x579   :  { %v1626_v35 = vadd.f32 %v1620_v30, %v3693_v24 }
 0x57a   :  { %v1858_v11 = vmul.f32 -1.442695, %v1625_v9 }
 0x57b   :  { %v2002_v20 = vpop.eup %2001 }
 0x57c   :  { %v2004_v25 = vpop.eup %2003  ;;  %v1636_v17 = vadd.f32 1.0, %v2002_v20  ;;  %2005 = vpow2.f32 %v1858_v11 }
 0x57d   :  { %v1637_v12 = vadd.f32 1.0, %v2004_v25 }
 0x57e   :  { %2007 = vrcp.f32 %v1636_v17  ;;  %v1650_v6 = vand.u32 2147483648, %v1636_v17  ;;  %v1648_v40 = vand.u32 2147483647, %v1636_v17  ;;  %vm1644_vm7 = vweird.f32 %v1636_v17 }
 0x57f   :  { %2009 = vrcp.f32 %v1637_v12  ;;  %v1665_v38 = vand.u32 2147483648, %v1637_v12  ;;  %v1663_v42 = vand.u32 2147483647, %v1637_v12  ;;  %vm1659_vm8 = vweird.f32 %v1637_v12 }
 0x580   :  { %v1651_v18 = vor.u32 1.1754944e-38, %v1650_v6  ;;  %vm1649_vm11 = vcmp.eq.f32.partialorder %v1648_v40, 8.507059e+37 }
 0x581   :  { %v1666_v31 = vor.u32 1.1754944e-38, %v1665_v38  ;;  %vm1664_vm12 = vcmp.eq.f32.partialorder %v1663_v42, 8.507059e+37 }
 0x582   :  { %v2006_v34 = vpop.eup %2005 }
 0x583   :  { %v1638_v28 = vadd.f32 1.0, %v2006_v34 }
 0x584   :  { %v2008_v13 = vpop.eup %2007 }
 0x585   :  { %v2010_v32 = vpop.eup %2009  ;;  %v1640_v1 = vmul.f32 %v2008_v13, %v1636_v17  ;;  %2011 = vrcp.f32 %v1638_v28  ;;  %vm1645_vm5 = vweird.f32 %v2008_v13  ;;  %v1680_v11 = vand.u32 2147483648, %v1638_v28 }
 0x586   :  { %v1655_v22 = vmul.f32 %v2010_v32, %v1637_v12  ;;  %2013 = vtanh.f32 %v1626_v35  ;;  %vm1660_vm6 = vweird.f32 %v2010_v32  ;;  %vm1646_vm9 = vmor %vm1644_vm7, %vm1645_vm5  ;;  %vm1674_vm14 = vweird.f32 %v1638_v28 }
 0x587   :  { %v1641_v10 = vsub.f32 1.0, %v1640_v1  ;;  %vm1661_vm10 = vmor %vm1659_vm8, %vm1660_vm6  ;;  %v1678_v20 = vand.u32 2147483647, %v1638_v28  ;;  %v1681_v17 = vor.u32 1.1754944e-38, %v1680_v11  ;;  %v1006_v1 = vsub.f32 %v3260_v26, %v3264_v21 }
 0x588   :  { %v1656_v36 = vsub.f32 1.0, %v1655_v22  ;;  %v490_v26 = vmul.f32 0.0, %v3254_v58  ;;  %vm1784_vm8 = vcmask 57344  }
 0x589   :  { %v1642_v39 = vmul.f32 %v2008_v13, %v1641_v10  ;;  %vm1679_vm0 = vcmp.eq.f32.partialorder %v1678_v20, 8.507059e+37  ;;  %v1007_v22 = vmul.f32 1.442695, %v1006_v1  ;;  %v501_v20 = vpop.permute.xlu0 %500  ;;  %v3696_v1 = vld [vmem:[#allocation33_spill] sm:$0xff] }
 0x58a   :  { %v1657_v41 = vmul.f32 %v2010_v32, %v1656_v36  ;;  %v491_v21 = vadd.f32 %v3309_v46, %v490_v26 }
 0x58b   :  { %v2012_v43 = vpop.eup %2011  ;;  %v1643_v48 = vadd.f32 %v2008_v13, %v1642_v39 }
 0x58c   :  { %v1658_v54 = vadd.f32 %v2010_v32, %v1657_v41  ;;  %v1670_v53 = vmul.f32 %v2012_v43, %v1638_v28  ;;  %v2014_v49 = vpop.eup %2013  ;;  %vm1675_vm13 = vweird.f32 %v2012_v43  ;;  %v833_v28 = vsub.f32 %v3248_v52, %v3252_v8 }
 0x58d   :  { %v1647_v56 = vsel %vm1646_vm9, %v2008_v13, %v1643_v48  ;;  %vm1676_vm15 = vmor %vm1674_vm14, %vm1675_vm13  ;;  %v1525_v52 = vsub.f32 %v3320_v3, %v3324_v5 }
 0x58e   :  { %v1652_v57 = vsel %vm1649_vm11, %v1651_v18, %v1647_v56  ;;  %v1662_v29 = vsel %vm1661_vm10, %v2010_v32, %v1658_v54  ;;  %v1671_v44 = vsub.f32 1.0, %v1670_v53  ;;  %v834_v35 = vmul.f32 1.442695, %v833_v28  ;;  %v3695_v28 = vld [vmem:[#allocation10_spill] sm:$0xff] }
 0x58f   :  { %v1667_v55 = vsel %vm1664_vm12, %v1666_v31, %v1662_v29  ;;  %v1686_v59 = vmul.f32 %v2014_v49, %v1652_v57  ;;  %v1526_v8 = vmul.f32 1.442695, %v1525_v52  ;;  %v1738_v49 = vld [vmem:[#allocation3] sm:$0x1]  ;;  %v3697_v52 = vld [vmem:[#allocation39_spill] sm:$0xff] }
 0x590   :  { %v1685_v51 = vmul.f32 %v1667_v55, %v3290_v27  ;;  %v1672_v4 = vmul.f32 %v2012_v43, %v1671_v44  ;;  %v657_v27 = vsub.f32 %v3239_v0, %v3244_v63 }
 0x591   :  { %v1187_v26 = vpop.permute.xlu0 %1186 }
 0x592   :  { %v1687_v7 = vadd.f32 %v1686_v59, %v1685_v51  ;;  %v1673_v9 = vadd.f32 %v2012_v43, %v1672_v4  ;;  %v658_v24 = vmul.f32 1.442695, %v657_v27 }
 0x594   :  { %2015 = vtanh.f32 %v1687_v7  ;;  %v1677_v25 = vsel %vm1676_vm15, %v2012_v43, %v1673_v9  ;;  %v495_v7 = vpop.permute.xlu2 %494 }
 0x595   :  { %v1682_v30 = vsel %vm1679_vm0, %v1681_v17, %v1677_v25  ;;  %2017 = vpow2.f32 %v658_v24  ;;  %v3694_v25 = vld [vmem:[#allocation64_spill] sm:$0xff] }
 0x596   :  { %2019 = vpow2.f32 %v834_v35  ;;  %v503_v17 = vmul.f32 %v501_v20, %v3694_v25 }
 0x597   :  { %2021 = vpow2.f32 %v1007_v22 }
 0x59a   :  { %v2016_v12 = vpop.eup %2015 }
 0x59b   :  { %v3336_v34 = vmul.f32 %v2016_v12, %v1682_v30  ;;  %v2018_v32 = vpop.eup %2017  ;;  %v497_v12 = vmul.f32 0.0, %v495_v7 }
 0x59c   :  { %v2020_v10 = vpop.eup %2019  ;;  %v663_v38 = vmul.f32 %v2018_v32, %v491_v21  ;;  %v674_v9 = vpop.permute.xlu2 %673 }
 0x59d   :  { %v1690_v13 = vmul.f32 %v3150_v47, %v3336_v34  ;;  %v1349_v47 = vsub.f32 %v3273_v16, %v3307_v45  ;;  %v2022_v63 = vpop.eup %2021  ;;  %v504_v30 = vadd.f32 %v503_v17, %v497_v12  ;;  %v676_v35 = vmul.f32 %v674_v9, %v3695_v28 }
 0x59e   :  { %v664_v16 = vadd.f32 %v3266_v19, %v663_v38 }
 0x59f   :  { %1691 = vadd.xlane.f32.xlu1 %v1690_v13  ;;  %v1350_v0 = vmul.f32 1.442695, %v1349_v47 }
 0x5a0   :  { %v836_v45 = vmul.f32 %v3275_v14, %v664_v16 }
 0x5a1   :  { %2023 = vpow2.f32 %v1350_v0 }
 0x5a2   :  { %2025 = vpow2.f32 %v1526_v8  ;;  %v837_v39 = vadd.f32 %v2020_v10, %v836_v45 }
 0x5a4   :  { %v1009_v40 = vmul.f32 %v3279_v23, %v837_v39  ;;  %v841_v13 = vpop.permute.xlu2 %840 }
 0x5a6   :  { %v1010_v41 = vadd.f32 %v2022_v63, %v1009_v40  ;;  %v1366_v40 = vpop.permute.xlu0 %1365 }
 0x5a7   :  { %v2024_v36 = vpop.eup %2023 }
 0x5a8   :  { %v2026_v6 = vpop.eup %2025  ;;  %v1182_v3 = vmul.f32 %v3313_v2, %v1010_v41 }
 0x5aa   :  { %v1183_v48 = vadd.f32 %v3282_v33, %v1182_v3  ;;  %v1368_v3 = vmul.f32 %v1366_v40, %v3228_v60  ;;  %v1737_v60 = vld [vmem:[%s3382_s6] sm:$0x1] }
 0x5ac   :  { %v1355_v18 = vmul.f32 %v2024_v36, %v1183_v48  ;;  %v1014_v47 = vpop.permute.xlu2 %1013 }
 0x5ae   :  { %v1356_v14 = vadd.f32 %v3316_v50, %v1355_v18 }
 0x5b0   :  { %v1528_v23 = vmul.f32 %v3330_v62, %v1356_v14 }
 0x5b2   :  { %v1529_v2 = vadd.f32 %v2026_v6, %v1528_v23 }
 0x5b4   :  { %v1193_v21 = vpop.permute.xlu2 %1192 }
 0x5b5   :  { %v1195_v45 = vmul.f32 %v1193_v21, %v3143_v15 }
 0x5b8   :  { %667 = vperm.xlu1 %1868, %v2018_v32  }
 0x5c0   :  { %846 = vperm.xlu1 %1868, %v2020_v10  }
 0x5c8   :  { %1019 = vperm.xlu1 %1868, %v2022_v63  }
 0x5d0   :  { %1359 = vperm.xlu1 %1868, %v2024_v36  }
 0x5d8   :  { %1538 = vperm.xlu1 %1868, %v2026_v6  }
 0x612   :  { %v1692_v42 = vpop.xlane.xlu1 %1691 }
 0x613   :  { %v1693_v43 = vadd.f32 %v3236_v61, %v1692_v42  ;;  %v1533_v42 = vpop.permute.xlu2 %1532 }
 0x615   :  { %v1694_v58 = vmax.f32 %v3324_v5, %v1693_v43 }
 0x617   :  { %v1695_v46 = vsub.f32 %v3324_v5, %v1694_v58  ;;  %v1698_v54 = vsub.f32 %v1693_v43, %v1694_v58 }
 0x619   :  { %v1696_v19 = vmul.f32 1.442695, %v1695_v46  ;;  %v1699_v53 = vmul.f32 1.442695, %v1698_v54 }
 0x61b   :  { %2027 = vpow2.f32 %v1696_v19 }
 0x61c   :  { %2029 = vpow2.f32 %v1699_v53 }
 0x621   :  { %v2028_v31 = vpop.eup %2027 }
 0x622   :  { %v2030_v56 = vpop.eup %2029  ;;  %v1701_v61 = vmul.f32 %v2028_v31, %v1529_v2  ;;  %1705 = vperm.xlu0 %1867, %v2028_v31  }
 0x623   :  { %1711 = vperm.xlu2 %1866, %v2030_v56  }
 0x624   :  { %v1702_v33 = vadd.f32 %v2030_v56, %v1701_v61 }
 0x626   :  { %2031 = vrcp.f32 %v1702_v33  ;;  %v1727_v44 = vand.u32 2147483648, %v1702_v33  ;;  %v1725_v50 = vand.u32 2147483647, %v1702_v33  ;;  %vm1721_vm2 = vweird.f32 %v1702_v33 }
 0x628   :  { %v1728_v62 = vor.u32 1.1754944e-38, %v1727_v44  ;;  %vm1726_vm4 = vcmp.eq.f32.partialorder %v1725_v50, 8.507059e+37 }
 0x62a   :  { %1741 = vperm.xlu0 %1867, %v1738_v49   ;;  %v668_v11 = vpop.permute.xlu1 %667 }
 0x62b   :  { %v670_v24 = vmul.f32 %v668_v11, %v504_v30 }
 0x62c   :  { %v2032_v5 = vpop.eup %2031 }
 0x62d   :  { %v1717_v57 = vmul.f32 %v2032_v5, %v1702_v33  ;;  %vm1722_vm1 = vweird.f32 %v2032_v5  ;;  %v677_v32 = vadd.f32 %v676_v35, %v670_v24 }
 0x62e   :  { %vm1723_vm3 = vmor %vm1721_vm2, %vm1722_vm1 }
 0x62f   :  { %v1718_v29 = vsub.f32 1.0, %v1717_v57  ;;  %v843_v10 = vmul.f32 %v841_v13, %v677_v32 }
 0x631   :  { %v1719_v55 = vmul.f32 %v2032_v5, %v1718_v29 }
 0x632   :  { %v847_v27 = vpop.permute.xlu1 %846 }
 0x633   :  { %v1720_v59 = vadd.f32 %v2032_v5, %v1719_v55  ;;  %v849_v22 = vmul.f32 %v847_v27, %v3696_v1 }
 0x635   :  { %v1724_v51 = vsel %vm1723_vm3, %v2032_v5, %v1720_v59  ;;  %v850_v63 = vadd.f32 %v849_v22, %v843_v10 }
 0x636   :  { %v1729_v4 = vsel %vm1726_vm4, %v1728_v62, %v1724_v51 }
 0x637   :  { %1733 = vperm.xlu1 %1868, %v1729_v4   ;;  %v1016_v36 = vmul.f32 %v1014_v47, %v850_v63 }
 0x63a   :  { %v1020_v0 = vpop.permute.xlu1 %1019 }
 0x63b   :  { %v1022_v8 = vmul.f32 %v1020_v0, %v3697_v52 }
 0x63d   :  { %v1023_v6 = vadd.f32 %v1022_v8, %v1016_v36 }
 0x63f   :  { %v1189_v38 = vmul.f32 %v1187_v26, %v1023_v6 }
 0x641   :  { %v1196_v39 = vadd.f32 %v1195_v45, %v1189_v38 }
 0x642   :  { %v1360_v16 = vpop.permute.xlu1 %1359 }
 0x643   :  { %v1362_v41 = vmul.f32 %v1360_v16, %v1196_v39 }
 0x645   :  { %v1369_v48 = vadd.f32 %v1368_v3, %v1362_v41 }
 0x647   :  { %v1535_v18 = vmul.f32 %v1533_v42, %v1369_v48 }
 0x64a   :  { %v1539_v43 = vpop.permute.xlu1 %1538 }
 0x64b   :  { %v1541_v58 = vmul.f32 %v1539_v43, %v3293_v37 }
 0x64d   :  { %v1542_v54 = vadd.f32 %v1541_v58, %v1535_v18 }
 0x67d   :  { %v1712_v19 = vpop.permute.xlu2 %1711 }
 0x67e   :  { %v1714_v14 = vmul.f32 %v1712_v19, %v3336_v34 }
 0x694   :  { %v1706_v46 = vpop.permute.xlu0 %1705 }
 0x695   :  { %v1708_v53 = vmul.f32 %v1706_v46, %v1542_v54 }
 0x697   :  { %v1715_v23 = vadd.f32 %v1714_v14, %v1708_v53 }
 0x69c   :  { %v1742_v31 = vpop.permute.xlu0 %1741 }
 0x69d   :  { %v1744_v56 = vperm.slane %v1742_v31, 0 }
 0x6a9   :  { %v1734_v2 = vpop.permute.xlu1 %1733 }
 0x6aa   :  { %v1736_v15 = vmul.f32 %v1734_v2, %v1715_v23 }
 0x6ac   :  { %1760 = vmatpush.xpose.msrb.mxu0 %v1736_v15 }
 0x6af   :  { %1761 = vmatmul.f32.vlgmr.msrb.gmra.mxu0 %v1737_v60 }
 0x72c   :  { %v1762_v61 = vpop.f32.mrf.mxu0 }
 0x72d   :  { %v1763_v37 = vadd.f32 %v1762_v61, %v1744_v56 }
 0x72f   :  { %v1859_v33 = vmul.f32 -1.442695, %v1763_v37 }
 0x731   :  { %2033 = vpow2.f32 %v1859_v33 }
 0x737   :  { %v2034_v49 = vpop.eup %2033 }
 0x738   :  { %v1768_v5 = vadd.f32 1.0, %v2034_v49 }
 0x73a   :  { %2035 = vrcp.f32 %v1768_v5  ;;  %v1780_v44 = vand.u32 2147483648, %v1768_v5  ;;  %v1778_v50 = vand.u32 2147483647, %v1768_v5  ;;  %vm1774_vm6 = vweird.f32 %v1768_v5 }
 0x73c   :  { %v1781_v62 = vor.u32 1.1754944e-38, %v1780_v44  ;;  %vm1779_vm9 = vcmp.eq.f32.partialorder %v1778_v50, 8.507059e+37 }
 0x740   :  { %v2036_v57 = vpop.eup %2035 }
 0x741   :  { %v1770_v34 = vmul.f32 %v2036_v57, %v1768_v5  ;;  %vm1775_vm5 = vweird.f32 %v2036_v57 }
 0x742   :  { %vm1776_vm7 = vmor %vm1774_vm6, %vm1775_vm5 }
 0x743   :  { %v1771_v29 = vsub.f32 1.0, %v1770_v34 }
 0x745   :  { %v1772_v55 = vmul.f32 %v2036_v57, %v1771_v29 }
 0x747   :  { %v1773_v59 = vadd.f32 %v2036_v57, %v1772_v55 }
 0x749   :  { %v1777_v51 = vsel %vm1776_vm7, %v2036_v57, %v1773_v59 }
 0x74a   :  { %v1782_v4 = vsel %vm1779_vm9, %v1781_v62, %v1777_v51 }
 0x74b   :  { %1785 = vst.msk [vmem:[#allocation7] sm:$0x1] %vm1784_vm8, %v1782_v4 }
 0x74c   :  { %1796 = dma.vmem_to_hbm [thread:$0]  %s1792_s18, 16, %s1794_s2, [#allocation6]  }
 0x74d   :  { %2152 = dma.done.wait [#allocation6], 16  }
 0x74e   :  { %2153 = vsyncadd [#allocation6], 4294967280 }
 0x74f   :  { %1801 = vsyncpa [#allocation5], 1 }
 0x750   :  { %1802 = vsyncpa [#allocation6], 1 }

</bundles_post_ra>
